<compile_context>
chip_gen: v5e
topology: v5e:2x2
jax: 0.10.0
libtpu: 0.0.40
codegen_flags: <defaults>
</compile_context>

<pallas_src>
import math

import jax
import jax.numpy as jnp
from jax.experimental import pallas as pl
from jax.experimental.pallas import tpu as pltpu

# ----------------------------- config ---------------------------------------
B = 2            # batch
S = 8            # source sequence length
T = 8            # target sequence length
D = 128          # d_model (lane-aligned)
H = 4            # attention heads
DH = D // H      # head dim
F = 256          # FFN inner dim
V = 256          # vocab size
EPS = 1e-5
NEG_INF = -1e9
PAD_ID = 1       # mBART pad token id
IGNORE_INDEX = -100
EMB_SCALE = math.sqrt(D)
ATT_SCALE = 1.0 / math.sqrt(DH)   # folded into Q weights at init time
STATS_LANES = 128                 # lane-dense per-batch stats row


# ----------------------------- in-kernel helpers -----------------------------
def _layernorm(x, g, b):
    mu = jnp.mean(x, axis=-1, keepdims=True)
    var = jnp.mean(jnp.square(x - mu), axis=-1, keepdims=True)
    return (x - mu) * jax.lax.rsqrt(var + EPS) * g + b


def _mha(q, k, v, bias):
    """Multi-head attention, fully in-registers.

    q: (Tq, D) bf16 (ATT_SCALE already folded into the Q projection),
    k/v: (Tk, D) bf16, bias: (Tq, Tk) f32.
    Returns concat_heads(softmax(q k^T + bias) v) as (Tq, D) bf16 so the
    caller can do ONE (Tq,D)@(D,D) output-projection matmul.
    """
    outs = []
    for h in range(H):
        hs = slice(h * DH, (h + 1) * DH)
        s = jax.lax.dot_general(q[:, hs], k[:, hs], (((1,), (1,)), ((), ())),
                                preferred_element_type=jnp.float32)
        s = s + bias
        m = jnp.max(s, axis=-1, keepdims=True)
        p = jnp.exp(s - m)
        p = p * pl.reciprocal(jnp.sum(p, axis=-1, keepdims=True), approx=True)
        outs.append(jax.lax.dot_general(p.astype(jnp.bfloat16), v[:, hs],
                                        (((1,), (0,)), ((), ())),
                                        preferred_element_type=jnp.float32))
    return jnp.concatenate(outs, axis=-1).astype(jnp.bfloat16)


# ----------------------------- fused kernel ----------------------------------
def _mbart_fused_kernel(
        enc_emb_ref, dec_emb_ref, mask_ref, labels_ref,
        pos_enc, pos_dec,
        # encoder layer weights
        e_lne_g, e_lne_b,
        e_ln1_g, e_ln1_b, e_wqkv, e_bqkv, e_wo, e_bo,
        e_ln2_g, e_ln2_b, e_w1, e_b1, e_w2, e_b2,
        e_lnf_g, e_lnf_b,
        # decoder layer weights
        d_lne_g, d_lne_b,
        d_ln1_g, d_ln1_b, d_wqkv, d_bqkv, d_wo1, d_bo1,
        d_ln2_g, d_ln2_b, d_cwq, d_cbq, d_cwkv, d_cbkv, d_wo2, d_bo2,
        d_ln3_g, d_ln3_b, d_w1, d_b1, d_w2, d_b2,
        d_lnf_g, d_lnf_b,
        # tied LM head
        emb_ref, fbias_ref,
        # outputs
        logits_ref, stats_ref):
    # ---- masks built in-kernel (no HBM bias tensors) -------------------------
    mask_row = mask_ref[0].astype(jnp.float32)                       # (1, S)
    pad_bias = (1.0 - mask_row) * NEG_INF                            # (1, S)
    enc_bias = jnp.broadcast_to(pad_bias, (S, S))
    cross_bias = jnp.broadcast_to(pad_bias, (T, S))
    rows = jax.lax.broadcasted_iota(jnp.int32, (T, T), 0)
    cols = jax.lax.broadcasted_iota(jnp.int32, (T, T), 1)
    causal_bias = jnp.where(cols <= rows, 0.0, NEG_INF)              # (T, T)

    # ---- encoder layer --------------------------------------------------------
    x = enc_emb_ref[0].astype(jnp.float32) * EMB_SCALE + pos_enc[...]
    x = _layernorm(x, e_lne_g[...], e_lne_b[...])

    h = _layernorm(x, e_ln1_g[...], e_ln1_b[...]).astype(jnp.bfloat16)
    qkv = (jnp.dot(h, e_wqkv[...], preferred_element_type=jnp.float32)
           + e_bqkv[...]).astype(jnp.bfloat16)
    ctx = _mha(qkv[:, :D], qkv[:, D:2 * D], qkv[:, 2 * D:], enc_bias)
    x = x + jnp.dot(ctx, e_wo[...],
                    preferred_element_type=jnp.float32) + e_bo[...]

    h = _layernorm(x, e_ln2_g[...], e_ln2_b[...]).astype(jnp.bfloat16)
    hh = jax.nn.gelu(jnp.dot(h, e_w1[...],
                             preferred_element_type=jnp.float32) + e_b1[...])
    x = x + jnp.dot(hh.astype(jnp.bfloat16), e_w2[...],
                    preferred_element_type=jnp.float32) + e_b2[...]

    enc = _layernorm(x, e_lnf_g[...], e_lnf_b[...]).astype(jnp.bfloat16)  # (S,D)

    # ---- decoder layer --------------------------------------------------------
    y = dec_emb_ref[0].astype(jnp.float32) * EMB_SCALE + pos_dec[...]
    y = _layernorm(y, d_lne_g[...], d_lne_b[...])

    # causal self-attention (pre-LN, fused QKV)
    h = _layernorm(y, d_ln1_g[...], d_ln1_b[...]).astype(jnp.bfloat16)
    qkv = (jnp.dot(h, d_wqkv[...], preferred_element_type=jnp.float32)
           + d_bqkv[...]).astype(jnp.bfloat16)
    ctx = _mha(qkv[:, :D], qkv[:, D:2 * D], qkv[:, 2 * D:], causal_bias)
    y = y + jnp.dot(ctx, d_wo1[...],
                    preferred_element_type=jnp.float32) + d_bo1[...]

    # cross-attention (pre-LN, fused KV from the in-register encoder output)
    h = _layernorm(y, d_ln2_g[...], d_ln2_b[...]).astype(jnp.bfloat16)
    q = (jnp.dot(h, d_cwq[...], preferred_element_type=jnp.float32)
         + d_cbq[...]).astype(jnp.bfloat16)
    kv = (jnp.dot(enc, d_cwkv[...], preferred_element_type=jnp.float32)
          + d_cbkv[...]).astype(jnp.bfloat16)
    ctx = _mha(q, kv[:, :D], kv[:, D:], cross_bias)
    y = y + jnp.dot(ctx, d_wo2[...],
                    preferred_element_type=jnp.float32) + d_bo2[...]

    # pre-LN feed-forward (GELU, tanh approximation)
    h = _layernorm(y, d_ln3_g[...], d_ln3_b[...]).astype(jnp.bfloat16)
    hh = jax.nn.gelu(jnp.dot(h, d_w1[...],
                             preferred_element_type=jnp.float32) + d_b1[...])
    y = y + jnp.dot(hh.astype(jnp.bfloat16), d_w2[...],
                    preferred_element_type=jnp.float32) + d_b2[...]

    dec = _layernorm(y, d_lnf_g[...], d_lnf_b[...]).astype(jnp.bfloat16)  # (T,D)

    # ---- tied LM head (contract against embedding along D, no transpose) -----
    logits = jax.lax.dot_general(dec, emb_ref[...], (((1,), (1,)), ((), ())),
                                 preferred_element_type=jnp.float32)
    logits = logits + fbias_ref[...]                                 # (T, V)
    logits_ref[0] = logits.astype(logits_ref.dtype)

    # ---- vectorized cross-entropy (ignore_index = -100) -----------------------
    m = jnp.max(logits, axis=-1, keepdims=True)
    lse = jnp.log(jnp.sum(jnp.exp(logits - m), axis=-1, keepdims=True)) + m

    labels = labels_ref[0]                                           # (T, 1)
    vocab = jax.lax.broadcasted_iota(jnp.int32, (T, V), 1)
    onehot = vocab == labels                                         # (T, V)
    picked = jnp.sum(jnp.where(onehot, logits, 0.0), axis=-1, keepdims=True)
    valid = (labels != IGNORE_INDEX).astype(jnp.float32)             # (T, 1)
    nll = jnp.sum(valid * (lse - picked), keepdims=True)             # (1, 1)
    wsum = jnp.sum(valid, keepdims=True)                             # (1, 1)

    # lane-dense per-batch stats row: lane 0 = nll partial, lane 1 = weight
    lane = jax.lax.broadcasted_iota(jnp.int32, (1, STATS_LANES), 1)
    stats_ref[0] = (jnp.where(lane == 0, nll, 0.0)
                    + jnp.where(lane == 1, wsum, 0.0))


# ----------------------------- pallas_call wrapper ---------------------------
def mbart_fused_forward(params, enc_emb, dec_emb, mask3, labels3):
    ep = params["enc_layer"]
    dp = params["dec_layer"]
    esa, dsa, dca = ep["self_attn"], dp["self_attn"], dp["cross_attn"]
    ew1, eb1, ew2, eb2 = ep["ffn"]
    dw1, db1, dw2, db2 = dp["ffn"]

    weights = (
        params["pos_enc"], params["pos_dec"],
        params["ln_emb_enc"][0], params["ln_emb_enc"][1],
        ep["ln1"][0], ep["ln1"][1],
        esa["wqkv"], esa["bqkv"], esa["wo"], esa["bo"],
        ep["ln2"][0], ep["ln2"][1], ew1, eb1, ew2, eb2,
        params["ln_final_enc"][0], params["ln_final_enc"][1],
        params["ln_emb_dec"][0], params["ln_emb_dec"][1],
        dp["ln1"][0], dp["ln1"][1],
        dsa["wqkv"], dsa["bqkv"], dsa["wo"], dsa["bo"],
        dp["ln2"][0], dp["ln2"][1],
        dca["wq"], dca["bq"], dca["wkv"], dca["bkv"], dca["wo"], dca["bo"],
        dp["ln3"][0], dp["ln3"][1], dw1, db1, dw2, db2,
        params["ln_final_dec"][0], params["ln_final_dec"][1],
        params["embed"], params["final_logits_bias"],
    )

    in_specs = ([pl.BlockSpec((1, S, D), lambda b: (b, 0, 0)),   # enc embeds
                 pl.BlockSpec((1, T, D), lambda b: (b, 0, 0)),   # dec embeds
                 pl.BlockSpec((1, 1, S), lambda b: (b, 0, 0)),   # padding mask
                 pl.BlockSpec((1, T, 1), lambda b: (b, 0, 0))]   # labels
                + [pl.BlockSpec(wt.shape, lambda b: (0, 0)) for wt in weights])

    logits, stats = pl.pallas_call(
        _mbart_fused_kernel,
        out_shape=(jax.ShapeDtypeStruct((B, T, V), jnp.float32),
                   jax.ShapeDtypeStruct((B, 1, STATS_LANES), jnp.float32)),
        grid=(B,),
        in_specs=in_specs,
        out_specs=(pl.BlockSpec((1, T, V), lambda b: (b, 0, 0)),
                   pl.BlockSpec((1, 1, STATS_LANES), lambda b: (b, 0, 0))),
        compiler_params=pltpu.CompilerParams(
            dimension_semantics=("parallel",)),
    )(enc_emb, dec_emb, mask3, labels3, *weights)

    nll_total = jnp.sum(stats[:, 0, 0])
    w_total = jnp.sum(stats[:, 0, 1])
    loss = nll_total / jnp.maximum(w_total, 1.0)
    return loss, logits


# ----------------------------- model glue ------------------------------------
def shift_tokens_right(labels, pad_token_id=PAD_ID):
    """HF mBART shift: move the last non-pad token to position 0, shift right."""
    ids = jnp.where(labels == IGNORE_INDEX, pad_token_id, labels)
    idx_eos = jnp.clip(
        jnp.sum((ids != pad_token_id).astype(jnp.int32), axis=1) - 1,
        0, ids.shape[1] - 1)
    start = jnp.take_along_axis(ids, idx_eos[:, None], axis=1)        # (B, 1)
    return jnp.concatenate([start, ids[:, :-1]], axis=1)


def mbart_summarizer_forward(params, input_ids, attention_mask, out_ids):
    """Equivalent of self.model(input_ids, attention_mask, labels=out_ids).

    Returns (loss, lm_logits) — the first two fields of HF Seq2SeqLMOutput.
    """
    dec_input_ids = shift_tokens_right(out_ids)

    enc_emb = jnp.take(params["embed"], input_ids, axis=0)            # (B,S,D) bf16
    dec_emb = jnp.take(params["embed"], dec_input_ids, axis=0)        # (B,T,D) bf16
    mask3 = attention_mask.astype(jnp.int32).reshape(B, 1, S)
    labels3 = out_ids.astype(jnp.int32).reshape(B, T, 1)

    loss, logits = mbart_fused_forward(params, enc_emb, dec_emb, mask3, labels3)
    return loss, logits


# ----------------------------- parameter init --------------------------------
def init_params(key):
    ks = iter(jax.random.split(key, 64))

    def nrm(shape):
        return jax.random.normal(next(ks), shape, jnp.float32) * 0.02

    def w(shape):   # matmul weights stored bf16 (MXU inputs / half DMA bytes)
        return nrm(shape).astype(jnp.bfloat16)

    def ln():
        return (jnp.ones((1, D), jnp.float32), jnp.zeros((1, D), jnp.float32))

    def self_attn():
        # ATT_SCALE pre-folded into the Q projection (bias is zero so only W).
        wq = nrm((D, D)) * ATT_SCALE
        wk = nrm((D, D))
        wv = nrm((D, D))
        return {"wqkv": jnp.concatenate([wq, wk, wv], axis=1).astype(jnp.bfloat16),
                "bqkv": jnp.zeros((1, 3 * D), jnp.float32),
                "wo": w((D, D)), "bo": jnp.zeros((1, D), jnp.float32)}

    def cross_attn():
        return {"wq": (nrm((D, D)) * ATT_SCALE).astype(jnp.bfloat16),
                "bq": jnp.zeros((1, D), jnp.float32),
                "wkv": w((D, 2 * D)),
                "bkv": jnp.zeros((1, 2 * D), jnp.float32),
                "wo": w((D, D)), "bo": jnp.zeros((1, D), jnp.float32)}

    def ffn_block():
        return (w((D, F)), jnp.zeros((1, F), jnp.float32),
                w((F, D)), jnp.zeros((1, D), jnp.float32))

    return {
        "embed": w((V, D)),
        "pos_enc": nrm((S, D)),
        "pos_dec": nrm((T, D)),
        "ln_emb_enc": ln(),
        "ln_emb_dec": ln(),
        "ln_final_enc": ln(),
        "ln_final_dec": ln(),
        "final_logits_bias": jnp.zeros((1, V), jnp.float32),
        "enc_layer": {"self_attn": self_attn(), "ln1": ln(),
                      "ffn": ffn_block(), "ln2": ln()},
        "dec_layer": {"self_attn": self_attn(), "ln1": ln(),
                      "cross_attn": cross_attn(), "ln2": ln(),
                      "ffn": ffn_block(), "ln3": ln()},
    }


# ----------------------------- main -------------------------------------------
if __name__ == "__main__":
    key = jax.random.PRNGKey(0)
    k_params, k_in, k_out = jax.random.split(key, 3)

    params = init_params(k_params)

    input_ids = jax.random.randint(k_in, (B, S), 0, V, dtype=jnp.int32)
    out_ids = jax.random.randint(k_out, (B, T), 0, V, dtype=jnp.int32)
    attention_mask = jnp.ones((B, S), jnp.int32).at[1, S - 2:].set(0)

    fwd = jax.jit(mbart_summarizer_forward)
    loss, logits = fwd(params, input_ids, attention_mask, out_ids)
    jax.block_until_ready((loss, logits))

    assert logits.shape == (B, T, V)
    assert bool(jnp.isfinite(loss))
    print("KERNEL_OK")
</pallas_src>

<mosaic_0001>
module attributes {stable_mosaic.version = 11 : i64} {
  func.func @_mbart_fused_kernel(%arg0: i32, %arg1: memref<1x8x128xbf16, #tpu.memory_space<vmem>>, %arg2: memref<1x8x128xbf16, #tpu.memory_space<vmem>>, %arg3: memref<1x1x8xi32, #tpu.memory_space<vmem>>, %arg4: memref<1x8x1xi32, #tpu.memory_space<vmem>>, %arg5: memref<8x128xf32, #tpu.memory_space<vmem>>, %arg6: memref<8x128xf32, #tpu.memory_space<vmem>>, %arg7: memref<1x128xf32, #tpu.memory_space<vmem>>, %arg8: memref<1x128xf32, #tpu.memory_space<vmem>>, %arg9: memref<1x128xf32, #tpu.memory_space<vmem>>, %arg10: memref<1x128xf32, #tpu.memory_space<vmem>>, %arg11: memref<128x384xbf16, #tpu.memory_space<vmem>>, %arg12: memref<1x384xf32, #tpu.memory_space<vmem>>, %arg13: memref<128x128xbf16, #tpu.memory_space<vmem>>, %arg14: memref<1x128xf32, #tpu.memory_space<vmem>>, %arg15: memref<1x128xf32, #tpu.memory_space<vmem>>, %arg16: memref<1x128xf32, #tpu.memory_space<vmem>>, %arg17: memref<128x256xbf16, #tpu.memory_space<vmem>>, %arg18: memref<1x256xf32, #tpu.memory_space<vmem>>, %arg19: memref<256x128xbf16, #tpu.memory_space<vmem>>, %arg20: memref<1x128xf32, #tpu.memory_space<vmem>>, %arg21: memref<1x128xf32, #tpu.memory_space<vmem>>, %arg22: memref<1x128xf32, #tpu.memory_space<vmem>>, %arg23: memref<1x128xf32, #tpu.memory_space<vmem>>, %arg24: memref<1x128xf32, #tpu.memory_space<vmem>>, %arg25: memref<1x128xf32, #tpu.memory_space<vmem>>, %arg26: memref<1x128xf32, #tpu.memory_space<vmem>>, %arg27: memref<128x384xbf16, #tpu.memory_space<vmem>>, %arg28: memref<1x384xf32, #tpu.memory_space<vmem>>, %arg29: memref<128x128xbf16, #tpu.memory_space<vmem>>, %arg30: memref<1x128xf32, #tpu.memory_space<vmem>>, %arg31: memref<1x128xf32, #tpu.memory_space<vmem>>, %arg32: memref<1x128xf32, #tpu.memory_space<vmem>>, %arg33: memref<128x128xbf16, #tpu.memory_space<vmem>>, %arg34: memref<1x128xf32, #tpu.memory_space<vmem>>, %arg35: memref<128x256xbf16, #tpu.memory_space<vmem>>, %arg36: memref<1x256xf32, #tpu.memory_space<vmem>>, %arg37: memref<128x128xbf16, #tpu.memory_space<vmem>>, %arg38: memref<1x128xf32, #tpu.memory_space<vmem>>, %arg39: memref<1x128xf32, #tpu.memory_space<vmem>>, %arg40: memref<1x128xf32, #tpu.memory_space<vmem>>, %arg41: memref<128x256xbf16, #tpu.memory_space<vmem>>, %arg42: memref<1x256xf32, #tpu.memory_space<vmem>>, %arg43: memref<256x128xbf16, #tpu.memory_space<vmem>>, %arg44: memref<1x128xf32, #tpu.memory_space<vmem>>, %arg45: memref<1x128xf32, #tpu.memory_space<vmem>>, %arg46: memref<1x128xf32, #tpu.memory_space<vmem>>, %arg47: memref<256x128xbf16, #tpu.memory_space<vmem>>, %arg48: memref<1x256xf32, #tpu.memory_space<vmem>>, %arg49: memref<1x8x256xf32, #tpu.memory_space<vmem>>, %arg50: memref<1x1x128xf32, #tpu.memory_space<vmem>>) attributes {dimension_semantics = [#tpu.dimension_semantics<parallel>], iteration_bounds = array<i64: 2>, scalar_prefetch = 0 : i64, scratch_operands = 0 : i64, tpu.core_type = #tpu.core_type<tc>, window_params = [{transform_indices = @transform_0, window_bounds = array<i64: 1, 8, 128>}, {transform_indices = @transform_1, window_bounds = array<i64: 1, 8, 128>}, {transform_indices = @transform_2, window_bounds = array<i64: 1, 1, 8>}, {transform_indices = @transform_3, window_bounds = array<i64: 1, 8, 1>}, {pipeline_mode = #tpu.pipeline_mode<synchronous>, transform_indices = @transform_4, window_bounds = array<i64: 8, 128>}, {pipeline_mode = #tpu.pipeline_mode<synchronous>, transform_indices = @transform_5, window_bounds = array<i64: 8, 128>}, {pipeline_mode = #tpu.pipeline_mode<synchronous>, transform_indices = @transform_6, window_bounds = array<i64: 1, 128>}, {pipeline_mode = #tpu.pipeline_mode<synchronous>, transform_indices = @transform_7, window_bounds = array<i64: 1, 128>}, {pipeline_mode = #tpu.pipeline_mode<synchronous>, transform_indices = @transform_8, window_bounds = array<i64: 1, 128>}, {pipeline_mode = #tpu.pipeline_mode<synchronous>, transform_indices = @transform_9, window_bounds = array<i64: 1, 128>}, {pipeline_mode = #tpu.pipeline_mode<synchronous>, transform_indices = @transform_10, window_bounds = array<i64: 128, 384>}, {pipeline_mode = #tpu.pipeline_mode<synchronous>, transform_indices = @transform_11, window_bounds = array<i64: 1, 384>}, {pipeline_mode = #tpu.pipeline_mode<synchronous>, transform_indices = @transform_12, window_bounds = array<i64: 128, 128>}, {pipeline_mode = #tpu.pipeline_mode<synchronous>, transform_indices = @transform_13, window_bounds = array<i64: 1, 128>}, {pipeline_mode = #tpu.pipeline_mode<synchronous>, transform_indices = @transform_14, window_bounds = array<i64: 1, 128>}, {pipeline_mode = #tpu.pipeline_mode<synchronous>, transform_indices = @transform_15, window_bounds = array<i64: 1, 128>}, {pipeline_mode = #tpu.pipeline_mode<synchronous>, transform_indices = @transform_16, window_bounds = array<i64: 128, 256>}, {pipeline_mode = #tpu.pipeline_mode<synchronous>, transform_indices = @transform_17, window_bounds = array<i64: 1, 256>}, {pipeline_mode = #tpu.pipeline_mode<synchronous>, transform_indices = @transform_18, window_bounds = array<i64: 256, 128>}, {pipeline_mode = #tpu.pipeline_mode<synchronous>, transform_indices = @transform_19, window_bounds = array<i64: 1, 128>}, {pipeline_mode = #tpu.pipeline_mode<synchronous>, transform_indices = @transform_20, window_bounds = array<i64: 1, 128>}, {pipeline_mode = #tpu.pipeline_mode<synchronous>, transform_indices = @transform_21, window_bounds = array<i64: 1, 128>}, {pipeline_mode = #tpu.pipeline_mode<synchronous>, transform_indices = @transform_22, window_bounds = array<i64: 1, 128>}, {pipeline_mode = #tpu.pipeline_mode<synchronous>, transform_indices = @transform_23, window_bounds = array<i64: 1, 128>}, {pipeline_mode = #tpu.pipeline_mode<synchronous>, transform_indices = @transform_24, window_bounds = array<i64: 1, 128>}, {pipeline_mode = #tpu.pipeline_mode<synchronous>, transform_indices = @transform_25, window_bounds = array<i64: 1, 128>}, {pipeline_mode = #tpu.pipeline_mode<synchronous>, transform_indices = @transform_26, window_bounds = array<i64: 128, 384>}, {pipeline_mode = #tpu.pipeline_mode<synchronous>, transform_indices = @transform_27, window_bounds = array<i64: 1, 384>}, {pipeline_mode = #tpu.pipeline_mode<synchronous>, transform_indices = @transform_28, window_bounds = array<i64: 128, 128>}, {pipeline_mode = #tpu.pipeline_mode<synchronous>, transform_indices = @transform_29, window_bounds = array<i64: 1, 128>}, {pipeline_mode = #tpu.pipeline_mode<synchronous>, transform_indices = @transform_30, window_bounds = array<i64: 1, 128>}, {pipeline_mode = #tpu.pipeline_mode<synchronous>, transform_indices = @transform_31, window_bounds = array<i64: 1, 128>}, {pipeline_mode = #tpu.pipeline_mode<synchronous>, transform_indices = @transform_32, window_bounds = array<i64: 128, 128>}, {pipeline_mode = #tpu.pipeline_mode<synchronous>, transform_indices = @transform_33, window_bounds = array<i64: 1, 128>}, {pipeline_mode = #tpu.pipeline_mode<synchronous>, transform_indices = @transform_34, window_bounds = array<i64: 128, 256>}, {pipeline_mode = #tpu.pipeline_mode<synchronous>, transform_indices = @transform_35, window_bounds = array<i64: 1, 256>}, {pipeline_mode = #tpu.pipeline_mode<synchronous>, transform_indices = @transform_36, window_bounds = array<i64: 128, 128>}, {pipeline_mode = #tpu.pipeline_mode<synchronous>, transform_indices = @transform_37, window_bounds = array<i64: 1, 128>}, {pipeline_mode = #tpu.pipeline_mode<synchronous>, transform_indices = @transform_38, window_bounds = array<i64: 1, 128>}, {pipeline_mode = #tpu.pipeline_mode<synchronous>, transform_indices = @transform_39, window_bounds = array<i64: 1, 128>}, {pipeline_mode = #tpu.pipeline_mode<synchronous>, transform_indices = @transform_40, window_bounds = array<i64: 128, 256>}, {pipeline_mode = #tpu.pipeline_mode<synchronous>, transform_indices = @transform_41, window_bounds = array<i64: 1, 256>}, {pipeline_mode = #tpu.pipeline_mode<synchronous>, transform_indices = @transform_42, window_bounds = array<i64: 256, 128>}, {pipeline_mode = #tpu.pipeline_mode<synchronous>, transform_indices = @transform_43, window_bounds = array<i64: 1, 128>}, {pipeline_mode = #tpu.pipeline_mode<synchronous>, transform_indices = @transform_44, window_bounds = array<i64: 1, 128>}, {pipeline_mode = #tpu.pipeline_mode<synchronous>, transform_indices = @transform_45, window_bounds = array<i64: 1, 128>}, {pipeline_mode = #tpu.pipeline_mode<synchronous>, transform_indices = @transform_46, window_bounds = array<i64: 256, 128>}, {pipeline_mode = #tpu.pipeline_mode<synchronous>, transform_indices = @transform_47, window_bounds = array<i64: 1, 256>}, {transform_indices = @transform_48, window_bounds = array<i64: 1, 8, 256>}, {transform_indices = @transform_49, window_bounds = array<i64: 1, 1, 128>}]} {
    %c0 = arith.constant 0 : index
    %c0_0 = arith.constant 0 : index
    %c0_1 = arith.constant 0 : index
    %0 = vector.load %arg3[%c0, %c0_0, %c0_1] : memref<1x1x8xi32, #tpu.memory_space<vmem>>, vector<1x1x8xi32>
    %1 = vector.shape_cast %0 : vector<1x1x8xi32> to vector<1x8xi32>
    %2 = arith.sitofp %1 : vector<1x8xi32> to vector<1x8xf32>
    %cst = arith.constant 1.000000e+00 : f32
    %3 = vector.broadcast %cst : f32 to vector<1x8xf32>
    %4 = arith.subf %3, %2 : vector<1x8xf32>
    %cst_2 = arith.constant -1.000000e+09 : f32
    %5 = vector.broadcast %cst_2 : f32 to vector<1x8xf32>
    %6 = arith.mulf %4, %5 : vector<1x8xf32>
    %7 = vector.shape_cast %6 : vector<1x8xf32> to vector<1x8xf32>
    %8 = vector.broadcast %7 : vector<1x8xf32> to vector<8x8xf32>
    %9 = vector.shape_cast %6 : vector<1x8xf32> to vector<1x8xf32>
    %10 = vector.broadcast %9 : vector<1x8xf32> to vector<8x8xf32>
    %11 = tpu.iota {dimensions = array<i32: 0>} : vector<8x8xi32>
    %12 = tpu.iota {dimensions = array<i32: 1>} : vector<8x8xi32>
    %13 = arith.cmpi sle, %12, %11 : vector<8x8xi32>
    %cst_3 = arith.constant 0.000000e+00 : f32
    %cst_4 = arith.constant -1.000000e+09 : f32
    %14 = vector.broadcast %cst_3 : f32 to vector<8x8xf32>
    %15 = vector.broadcast %cst_4 : f32 to vector<8x8xf32>
    %16 = arith.select %13, %14, %15 : vector<8x8xi1>, vector<8x8xf32>
    %c0_5 = arith.constant 0 : index
    %c0_6 = arith.constant 0 : index
    %c0_7 = arith.constant 0 : index
    %17 = vector.load %arg1[%c0_5, %c0_6, %c0_7] : memref<1x8x128xbf16, #tpu.memory_space<vmem>>, vector<1x8x128xbf16>
    %18 = vector.shape_cast %17 : vector<1x8x128xbf16> to vector<8x128xbf16>
    %19 = arith.extf %18 : vector<8x128xbf16> to vector<8x128xf32>
    %cst_8 = arith.constant 11.3137083 : f32
    %20 = vector.broadcast %cst_8 : f32 to vector<8x128xf32>
    %21 = arith.mulf %19, %20 : vector<8x128xf32>
    %c0_9 = arith.constant 0 : index
    %c0_10 = arith.constant 0 : index
    %22 = vector.load %arg5[%c0_9, %c0_10] : memref<8x128xf32, #tpu.memory_space<vmem>>, vector<8x128xf32>
    %23 = arith.addf %21, %22 : vector<8x128xf32>
    %c0_11 = arith.constant 0 : index
    %c0_12 = arith.constant 0 : index
    %24 = vector.load %arg7[%c0_11, %c0_12] : memref<1x128xf32, #tpu.memory_space<vmem>>, vector<1x128xf32>
    %c0_13 = arith.constant 0 : index
    %c0_14 = arith.constant 0 : index
    %25 = vector.load %arg8[%c0_13, %c0_14] : memref<1x128xf32, #tpu.memory_space<vmem>>, vector<1x128xf32>
    %cst_15 = arith.constant dense<0.000000e+00> : vector<8xf32>
    %26 = vector.multi_reduction <add>, %23, %cst_15 [1] : vector<8x128xf32> to vector<8xf32>
    %27 = vector.shape_cast %26 : vector<8xf32> to vector<8x1xf32>
    %cst_16 = arith.constant 1.280000e+02 : f32
    %28 = vector.broadcast %cst_16 : f32 to vector<8x1xf32>
    %29 = arith.divf %27, %28 : vector<8x1xf32>
    %30 = vector.broadcast %29 : vector<8x1xf32> to vector<8x128xf32>
    %31 = arith.subf %23, %30 : vector<8x128xf32>
    %32 = arith.mulf %31, %31 : vector<8x128xf32>
    %cst_17 = arith.constant dense<0.000000e+00> : vector<8xf32>
    %33 = vector.multi_reduction <add>, %32, %cst_17 [1] : vector<8x128xf32> to vector<8xf32>
    %34 = vector.shape_cast %33 : vector<8xf32> to vector<8x1xf32>
    %cst_18 = arith.constant 1.280000e+02 : f32
    %35 = vector.broadcast %cst_18 : f32 to vector<8x1xf32>
    %36 = arith.divf %34, %35 : vector<8x1xf32>
    %37 = vector.broadcast %29 : vector<8x1xf32> to vector<8x128xf32>
    %38 = arith.subf %23, %37 : vector<8x128xf32>
    %cst_19 = arith.constant 9.99999974E-6 : f32
    %39 = vector.broadcast %cst_19 : f32 to vector<8x1xf32>
    %40 = arith.addf %36, %39 : vector<8x1xf32>
    %41 = math.rsqrt %40 : vector<8x1xf32>
    %42 = vector.broadcast %41 : vector<8x1xf32> to vector<8x128xf32>
    %43 = arith.mulf %38, %42 : vector<8x128xf32>
    %44 = vector.broadcast %24 : vector<1x128xf32> to vector<8x128xf32>
    %45 = arith.mulf %43, %44 : vector<8x128xf32>
    %46 = vector.broadcast %25 : vector<1x128xf32> to vector<8x128xf32>
    %47 = arith.addf %45, %46 : vector<8x128xf32>
    %c0_20 = arith.constant 0 : index
    %c0_21 = arith.constant 0 : index
    %48 = vector.load %arg9[%c0_20, %c0_21] : memref<1x128xf32, #tpu.memory_space<vmem>>, vector<1x128xf32>
    %c0_22 = arith.constant 0 : index
    %c0_23 = arith.constant 0 : index
    %49 = vector.load %arg10[%c0_22, %c0_23] : memref<1x128xf32, #tpu.memory_space<vmem>>, vector<1x128xf32>
    %cst_24 = arith.constant dense<0.000000e+00> : vector<8xf32>
    %50 = vector.multi_reduction <add>, %47, %cst_24 [1] : vector<8x128xf32> to vector<8xf32>
    %51 = vector.shape_cast %50 : vector<8xf32> to vector<8x1xf32>
    %cst_25 = arith.constant 1.280000e+02 : f32
    %52 = vector.broadcast %cst_25 : f32 to vector<8x1xf32>
    %53 = arith.divf %51, %52 : vector<8x1xf32>
    %54 = vector.broadcast %53 : vector<8x1xf32> to vector<8x128xf32>
    %55 = arith.subf %47, %54 : vector<8x128xf32>
    %56 = arith.mulf %55, %55 : vector<8x128xf32>
    %cst_26 = arith.constant dense<0.000000e+00> : vector<8xf32>
    %57 = vector.multi_reduction <add>, %56, %cst_26 [1] : vector<8x128xf32> to vector<8xf32>
    %58 = vector.shape_cast %57 : vector<8xf32> to vector<8x1xf32>
    %cst_27 = arith.constant 1.280000e+02 : f32
    %59 = vector.broadcast %cst_27 : f32 to vector<8x1xf32>
    %60 = arith.divf %58, %59 : vector<8x1xf32>
    %61 = vector.broadcast %53 : vector<8x1xf32> to vector<8x128xf32>
    %62 = arith.subf %47, %61 : vector<8x128xf32>
    %cst_28 = arith.constant 9.99999974E-6 : f32
    %63 = vector.broadcast %cst_28 : f32 to vector<8x1xf32>
    %64 = arith.addf %60, %63 : vector<8x1xf32>
    %65 = math.rsqrt %64 : vector<8x1xf32>
    %66 = vector.broadcast %65 : vector<8x1xf32> to vector<8x128xf32>
    %67 = arith.mulf %62, %66 : vector<8x128xf32>
    %68 = vector.broadcast %48 : vector<1x128xf32> to vector<8x128xf32>
    %69 = arith.mulf %67, %68 : vector<8x128xf32>
    %70 = vector.broadcast %49 : vector<1x128xf32> to vector<8x128xf32>
    %71 = arith.addf %69, %70 : vector<8x128xf32>
    %72 = arith.truncf %71 : vector<8x128xf32> to vector<8x128xbf16>
    %c0_29 = arith.constant 0 : index
    %c0_30 = arith.constant 0 : index
    %73 = vector.load %arg11[%c0_29, %c0_30] : memref<128x384xbf16, #tpu.memory_space<vmem>>, vector<128x384xbf16>
    %cst_31 = arith.constant dense<0.000000e+00> : vector<8x384xf32>
    %74 = tpu.matmul %72, %73, %cst_31 {dimension_numbers = #tpu.dot_dimension_numbers<[1], [0], [0], [1], [0, 0, 1, 1], [], []>} : vector<8x128xbf16>, vector<128x384xbf16>, vector<8x384xf32> -> vector<8x384xf32>
    %c0_32 = arith.constant 0 : index
    %c0_33 = arith.constant 0 : index
    %75 = vector.load %arg12[%c0_32, %c0_33] : memref<1x384xf32, #tpu.memory_space<vmem>>, vector<1x384xf32>
    %76 = vector.broadcast %75 : vector<1x384xf32> to vector<8x384xf32>
    %77 = arith.addf %74, %76 : vector<8x384xf32>
    %78 = arith.truncf %77 : vector<8x384xf32> to vector<8x384xbf16>
    %79 = vector.extract_strided_slice %78 {offsets = [0, 0], sizes = [8, 128], strides = [1, 1]} : vector<8x384xbf16> to vector<8x128xbf16>
    %80 = vector.extract_strided_slice %78 {offsets = [0, 128], sizes = [8, 128], strides = [1, 1]} : vector<8x384xbf16> to vector<8x128xbf16>
    %81 = vector.extract_strided_slice %78 {offsets = [0, 256], sizes = [8, 128], strides = [1, 1]} : vector<8x384xbf16> to vector<8x128xbf16>
    %82 = vector.extract_strided_slice %79 {offsets = [0, 0], sizes = [8, 32], strides = [1, 1]} : vector<8x128xbf16> to vector<8x32xbf16>
    %83 = vector.extract_strided_slice %80 {offsets = [0, 0], sizes = [8, 32], strides = [1, 1]} : vector<8x128xbf16> to vector<8x32xbf16>
    %cst_34 = arith.constant dense<0.000000e+00> : vector<8x8xf32>
    %84 = tpu.matmul %82, %83, %cst_34 {dimension_numbers = #tpu.dot_dimension_numbers<[1], [1], [0], [0], [0, 0, 1, 0], [], []>} : vector<8x32xbf16>, vector<8x32xbf16>, vector<8x8xf32> -> vector<8x8xf32>
    %85 = arith.addf %84, %8 : vector<8x8xf32>
    %cst_35 = arith.constant dense<0xFF800000> : vector<8xf32>
    %86 = vector.multi_reduction <maximumf>, %85, %cst_35 [1] : vector<8x8xf32> to vector<8xf32>
    %87 = vector.shape_cast %86 : vector<8xf32> to vector<8x1xf32>
    %88 = vector.broadcast %87 : vector<8x1xf32> to vector<8x8xf32>
    %89 = arith.subf %85, %88 : vector<8x8xf32>
    %90 = math.exp %89 : vector<8x8xf32>
    %cst_36 = arith.constant dense<0.000000e+00> : vector<8xf32>
    %91 = vector.multi_reduction <add>, %90, %cst_36 [1] : vector<8x8xf32> to vector<8xf32>
    %92 = vector.shape_cast %91 : vector<8xf32> to vector<8x1xf32>
    %93 = tpu.reciprocal %92 {approx = true} : vector<8x1xf32> -> vector<8x1xf32>
    %94 = vector.broadcast %93 : vector<8x1xf32> to vector<8x8xf32>
    %95 = arith.mulf %90, %94 : vector<8x8xf32>
    %96 = arith.truncf %95 : vector<8x8xf32> to vector<8x8xbf16>
    %97 = vector.extract_strided_slice %81 {offsets = [0, 0], sizes = [8, 32], strides = [1, 1]} : vector<8x128xbf16> to vector<8x32xbf16>
    %cst_37 = arith.constant dense<0.000000e+00> : vector<8x32xf32>
    %98 = tpu.matmul %96, %97, %cst_37 {dimension_numbers = #tpu.dot_dimension_numbers<[1], [0], [0], [1], [0, 0, 1, 1], [], []>} : vector<8x8xbf16>, vector<8x32xbf16>, vector<8x32xf32> -> vector<8x32xf32>
    %99 = vector.extract_strided_slice %79 {offsets = [0, 32], sizes = [8, 32], strides = [1, 1]} : vector<8x128xbf16> to vector<8x32xbf16>
    %100 = vector.extract_strided_slice %80 {offsets = [0, 32], sizes = [8, 32], strides = [1, 1]} : vector<8x128xbf16> to vector<8x32xbf16>
    %cst_38 = arith.constant dense<0.000000e+00> : vector<8x8xf32>
    %101 = tpu.matmul %99, %100, %cst_38 {dimension_numbers = #tpu.dot_dimension_numbers<[1], [1], [0], [0], [0, 0, 1, 0], [], []>} : vector<8x32xbf16>, vector<8x32xbf16>, vector<8x8xf32> -> vector<8x8xf32>
    %102 = arith.addf %101, %8 : vector<8x8xf32>
    %cst_39 = arith.constant dense<0xFF800000> : vector<8xf32>
    %103 = vector.multi_reduction <maximumf>, %102, %cst_39 [1] : vector<8x8xf32> to vector<8xf32>
    %104 = vector.shape_cast %103 : vector<8xf32> to vector<8x1xf32>
    %105 = vector.broadcast %104 : vector<8x1xf32> to vector<8x8xf32>
    %106 = arith.subf %102, %105 : vector<8x8xf32>
    %107 = math.exp %106 : vector<8x8xf32>
    %cst_40 = arith.constant dense<0.000000e+00> : vector<8xf32>
    %108 = vector.multi_reduction <add>, %107, %cst_40 [1] : vector<8x8xf32> to vector<8xf32>
    %109 = vector.shape_cast %108 : vector<8xf32> to vector<8x1xf32>
    %110 = tpu.reciprocal %109 {approx = true} : vector<8x1xf32> -> vector<8x1xf32>
    %111 = vector.broadcast %110 : vector<8x1xf32> to vector<8x8xf32>
    %112 = arith.mulf %107, %111 : vector<8x8xf32>
    %113 = arith.truncf %112 : vector<8x8xf32> to vector<8x8xbf16>
    %114 = vector.extract_strided_slice %81 {offsets = [0, 32], sizes = [8, 32], strides = [1, 1]} : vector<8x128xbf16> to vector<8x32xbf16>
    %cst_41 = arith.constant dense<0.000000e+00> : vector<8x32xf32>
    %115 = tpu.matmul %113, %114, %cst_41 {dimension_numbers = #tpu.dot_dimension_numbers<[1], [0], [0], [1], [0, 0, 1, 1], [], []>} : vector<8x8xbf16>, vector<8x32xbf16>, vector<8x32xf32> -> vector<8x32xf32>
    %116 = vector.extract_strided_slice %79 {offsets = [0, 64], sizes = [8, 32], strides = [1, 1]} : vector<8x128xbf16> to vector<8x32xbf16>
    %117 = vector.extract_strided_slice %80 {offsets = [0, 64], sizes = [8, 32], strides = [1, 1]} : vector<8x128xbf16> to vector<8x32xbf16>
    %cst_42 = arith.constant dense<0.000000e+00> : vector<8x8xf32>
    %118 = tpu.matmul %116, %117, %cst_42 {dimension_numbers = #tpu.dot_dimension_numbers<[1], [1], [0], [0], [0, 0, 1, 0], [], []>} : vector<8x32xbf16>, vector<8x32xbf16>, vector<8x8xf32> -> vector<8x8xf32>
    %119 = arith.addf %118, %8 : vector<8x8xf32>
    %cst_43 = arith.constant dense<0xFF800000> : vector<8xf32>
    %120 = vector.multi_reduction <maximumf>, %119, %cst_43 [1] : vector<8x8xf32> to vector<8xf32>
    %121 = vector.shape_cast %120 : vector<8xf32> to vector<8x1xf32>
    %122 = vector.broadcast %121 : vector<8x1xf32> to vector<8x8xf32>
    %123 = arith.subf %119, %122 : vector<8x8xf32>
    %124 = math.exp %123 : vector<8x8xf32>
    %cst_44 = arith.constant dense<0.000000e+00> : vector<8xf32>
    %125 = vector.multi_reduction <add>, %124, %cst_44 [1] : vector<8x8xf32> to vector<8xf32>
    %126 = vector.shape_cast %125 : vector<8xf32> to vector<8x1xf32>
    %127 = tpu.reciprocal %126 {approx = true} : vector<8x1xf32> -> vector<8x1xf32>
    %128 = vector.broadcast %127 : vector<8x1xf32> to vector<8x8xf32>
    %129 = arith.mulf %124, %128 : vector<8x8xf32>
    %130 = arith.truncf %129 : vector<8x8xf32> to vector<8x8xbf16>
    %131 = vector.extract_strided_slice %81 {offsets = [0, 64], sizes = [8, 32], strides = [1, 1]} : vector<8x128xbf16> to vector<8x32xbf16>
    %cst_45 = arith.constant dense<0.000000e+00> : vector<8x32xf32>
    %132 = tpu.matmul %130, %131, %cst_45 {dimension_numbers = #tpu.dot_dimension_numbers<[1], [0], [0], [1], [0, 0, 1, 1], [], []>} : vector<8x8xbf16>, vector<8x32xbf16>, vector<8x32xf32> -> vector<8x32xf32>
    %133 = vector.extract_strided_slice %79 {offsets = [0, 96], sizes = [8, 32], strides = [1, 1]} : vector<8x128xbf16> to vector<8x32xbf16>
    %134 = vector.extract_strided_slice %80 {offsets = [0, 96], sizes = [8, 32], strides = [1, 1]} : vector<8x128xbf16> to vector<8x32xbf16>
    %cst_46 = arith.constant dense<0.000000e+00> : vector<8x8xf32>
    %135 = tpu.matmul %133, %134, %cst_46 {dimension_numbers = #tpu.dot_dimension_numbers<[1], [1], [0], [0], [0, 0, 1, 0], [], []>} : vector<8x32xbf16>, vector<8x32xbf16>, vector<8x8xf32> -> vector<8x8xf32>
    %136 = arith.addf %135, %8 : vector<8x8xf32>
    %cst_47 = arith.constant dense<0xFF800000> : vector<8xf32>
    %137 = vector.multi_reduction <maximumf>, %136, %cst_47 [1] : vector<8x8xf32> to vector<8xf32>
    %138 = vector.shape_cast %137 : vector<8xf32> to vector<8x1xf32>
    %139 = vector.broadcast %138 : vector<8x1xf32> to vector<8x8xf32>
    %140 = arith.subf %136, %139 : vector<8x8xf32>
    %141 = math.exp %140 : vector<8x8xf32>
    %cst_48 = arith.constant dense<0.000000e+00> : vector<8xf32>
    %142 = vector.multi_reduction <add>, %141, %cst_48 [1] : vector<8x8xf32> to vector<8xf32>
    %143 = vector.shape_cast %142 : vector<8xf32> to vector<8x1xf32>
    %144 = tpu.reciprocal %143 {approx = true} : vector<8x1xf32> -> vector<8x1xf32>
    %145 = vector.broadcast %144 : vector<8x1xf32> to vector<8x8xf32>
    %146 = arith.mulf %141, %145 : vector<8x8xf32>
    %147 = arith.truncf %146 : vector<8x8xf32> to vector<8x8xbf16>
    %148 = vector.extract_strided_slice %81 {offsets = [0, 96], sizes = [8, 32], strides = [1, 1]} : vector<8x128xbf16> to vector<8x32xbf16>
    %cst_49 = arith.constant dense<0.000000e+00> : vector<8x32xf32>
    %149 = tpu.matmul %147, %148, %cst_49 {dimension_numbers = #tpu.dot_dimension_numbers<[1], [0], [0], [1], [0, 0, 1, 1], [], []>} : vector<8x8xbf16>, vector<8x32xbf16>, vector<8x32xf32> -> vector<8x32xf32>
    %150 = tpu.concatenate %98, %115, %132, %149 in 1 : vector<8x32xf32>, vector<8x32xf32>, vector<8x32xf32>, vector<8x32xf32> -> vector<8x128xf32>
    %151 = arith.truncf %150 : vector<8x128xf32> to vector<8x128xbf16>
    %c0_50 = arith.constant 0 : index
    %c0_51 = arith.constant 0 : index
    %152 = vector.load %arg13[%c0_50, %c0_51] : memref<128x128xbf16, #tpu.memory_space<vmem>>, vector<128x128xbf16>
    %cst_52 = arith.constant dense<0.000000e+00> : vector<8x128xf32>
    %153 = tpu.matmul %151, %152, %cst_52 {dimension_numbers = #tpu.dot_dimension_numbers<[1], [0], [0], [1], [0, 0, 1, 1], [], []>} : vector<8x128xbf16>, vector<128x128xbf16>, vector<8x128xf32> -> vector<8x128xf32>
    %154 = arith.addf %47, %153 : vector<8x128xf32>
    %c0_53 = arith.constant 0 : index
    %c0_54 = arith.constant 0 : index
    %155 = vector.load %arg14[%c0_53, %c0_54] : memref<1x128xf32, #tpu.memory_space<vmem>>, vector<1x128xf32>
    %156 = vector.broadcast %155 : vector<1x128xf32> to vector<8x128xf32>
    %157 = arith.addf %154, %156 : vector<8x128xf32>
    %c0_55 = arith.constant 0 : index
    %c0_56 = arith.constant 0 : index
    %158 = vector.load %arg15[%c0_55, %c0_56] : memref<1x128xf32, #tpu.memory_space<vmem>>, vector<1x128xf32>
    %c0_57 = arith.constant 0 : index
    %c0_58 = arith.constant 0 : index
    %159 = vector.load %arg16[%c0_57, %c0_58] : memref<1x128xf32, #tpu.memory_space<vmem>>, vector<1x128xf32>
    %cst_59 = arith.constant dense<0.000000e+00> : vector<8xf32>
    %160 = vector.multi_reduction <add>, %157, %cst_59 [1] : vector<8x128xf32> to vector<8xf32>
    %161 = vector.shape_cast %160 : vector<8xf32> to vector<8x1xf32>
    %cst_60 = arith.constant 1.280000e+02 : f32
    %162 = vector.broadcast %cst_60 : f32 to vector<8x1xf32>
    %163 = arith.divf %161, %162 : vector<8x1xf32>
    %164 = vector.broadcast %163 : vector<8x1xf32> to vector<8x128xf32>
    %165 = arith.subf %157, %164 : vector<8x128xf32>
    %166 = arith.mulf %165, %165 : vector<8x128xf32>
    %cst_61 = arith.constant dense<0.000000e+00> : vector<8xf32>
    %167 = vector.multi_reduction <add>, %166, %cst_61 [1] : vector<8x128xf32> to vector<8xf32>
    %168 = vector.shape_cast %167 : vector<8xf32> to vector<8x1xf32>
    %cst_62 = arith.constant 1.280000e+02 : f32
    %169 = vector.broadcast %cst_62 : f32 to vector<8x1xf32>
    %170 = arith.divf %168, %169 : vector<8x1xf32>
    %171 = vector.broadcast %163 : vector<8x1xf32> to vector<8x128xf32>
    %172 = arith.subf %157, %171 : vector<8x128xf32>
    %cst_63 = arith.constant 9.99999974E-6 : f32
    %173 = vector.broadcast %cst_63 : f32 to vector<8x1xf32>
    %174 = arith.addf %170, %173 : vector<8x1xf32>
    %175 = math.rsqrt %174 : vector<8x1xf32>
    %176 = vector.broadcast %175 : vector<8x1xf32> to vector<8x128xf32>
    %177 = arith.mulf %172, %176 : vector<8x128xf32>
    %178 = vector.broadcast %158 : vector<1x128xf32> to vector<8x128xf32>
    %179 = arith.mulf %177, %178 : vector<8x128xf32>
    %180 = vector.broadcast %159 : vector<1x128xf32> to vector<8x128xf32>
    %181 = arith.addf %179, %180 : vector<8x128xf32>
    %182 = arith.truncf %181 : vector<8x128xf32> to vector<8x128xbf16>
    %c0_64 = arith.constant 0 : index
    %c0_65 = arith.constant 0 : index
    %183 = vector.load %arg17[%c0_64, %c0_65] : memref<128x256xbf16, #tpu.memory_space<vmem>>, vector<128x256xbf16>
    %cst_66 = arith.constant dense<0.000000e+00> : vector<8x256xf32>
    %184 = tpu.matmul %182, %183, %cst_66 {dimension_numbers = #tpu.dot_dimension_numbers<[1], [0], [0], [1], [0, 0, 1, 1], [], []>} : vector<8x128xbf16>, vector<128x256xbf16>, vector<8x256xf32> -> vector<8x256xf32>
    %c0_67 = arith.constant 0 : index
    %c0_68 = arith.constant 0 : index
    %185 = vector.load %arg18[%c0_67, %c0_68] : memref<1x256xf32, #tpu.memory_space<vmem>>, vector<1x256xf32>
    %186 = vector.broadcast %185 : vector<1x256xf32> to vector<8x256xf32>
    %187 = arith.addf %184, %186 : vector<8x256xf32>
    %188 = arith.mulf %187, %187 : vector<8x256xf32>
    %189 = arith.mulf %187, %188 : vector<8x256xf32>
    %cst_69 = arith.constant 4.471500e-02 : f32
    %190 = vector.broadcast %cst_69 : f32 to vector<8x256xf32>
    %191 = arith.mulf %190, %189 : vector<8x256xf32>
    %192 = arith.addf %187, %191 : vector<8x256xf32>
    %cst_70 = arith.constant 0.797884583 : f32
    %193 = vector.broadcast %cst_70 : f32 to vector<8x256xf32>
    %194 = arith.mulf %193, %192 : vector<8x256xf32>
    %195 = math.tanh %194 : vector<8x256xf32>
    %cst_71 = arith.constant 1.000000e+00 : f32
    %196 = vector.broadcast %cst_71 : f32 to vector<8x256xf32>
    %197 = arith.addf %196, %195 : vector<8x256xf32>
    %cst_72 = arith.constant 5.000000e-01 : f32
    %198 = vector.broadcast %cst_72 : f32 to vector<8x256xf32>
    %199 = arith.mulf %198, %197 : vector<8x256xf32>
    %200 = arith.mulf %187, %199 : vector<8x256xf32>
    %201 = arith.truncf %200 : vector<8x256xf32> to vector<8x256xbf16>
    %c0_73 = arith.constant 0 : index
    %c0_74 = arith.constant 0 : index
    %202 = vector.load %arg19[%c0_73, %c0_74] : memref<256x128xbf16, #tpu.memory_space<vmem>>, vector<256x128xbf16>
    %cst_75 = arith.constant dense<0.000000e+00> : vector<8x128xf32>
    %203 = tpu.matmul %201, %202, %cst_75 {dimension_numbers = #tpu.dot_dimension_numbers<[1], [0], [0], [1], [0, 0, 1, 1], [], []>} : vector<8x256xbf16>, vector<256x128xbf16>, vector<8x128xf32> -> vector<8x128xf32>
    %204 = arith.addf %157, %203 : vector<8x128xf32>
    %c0_76 = arith.constant 0 : index
    %c0_77 = arith.constant 0 : index
    %205 = vector.load %arg20[%c0_76, %c0_77] : memref<1x128xf32, #tpu.memory_space<vmem>>, vector<1x128xf32>
    %206 = vector.broadcast %205 : vector<1x128xf32> to vector<8x128xf32>
    %207 = arith.addf %204, %206 : vector<8x128xf32>
    %c0_78 = arith.constant 0 : index
    %c0_79 = arith.constant 0 : index
    %208 = vector.load %arg21[%c0_78, %c0_79] : memref<1x128xf32, #tpu.memory_space<vmem>>, vector<1x128xf32>
    %c0_80 = arith.constant 0 : index
    %c0_81 = arith.constant 0 : index
    %209 = vector.load %arg22[%c0_80, %c0_81] : memref<1x128xf32, #tpu.memory_space<vmem>>, vector<1x128xf32>
    %cst_82 = arith.constant dense<0.000000e+00> : vector<8xf32>
    %210 = vector.multi_reduction <add>, %207, %cst_82 [1] : vector<8x128xf32> to vector<8xf32>
    %211 = vector.shape_cast %210 : vector<8xf32> to vector<8x1xf32>
    %cst_83 = arith.constant 1.280000e+02 : f32
    %212 = vector.broadcast %cst_83 : f32 to vector<8x1xf32>
    %213 = arith.divf %211, %212 : vector<8x1xf32>
    %214 = vector.broadcast %213 : vector<8x1xf32> to vector<8x128xf32>
    %215 = arith.subf %207, %214 : vector<8x128xf32>
    %216 = arith.mulf %215, %215 : vector<8x128xf32>
    %cst_84 = arith.constant dense<0.000000e+00> : vector<8xf32>
    %217 = vector.multi_reduction <add>, %216, %cst_84 [1] : vector<8x128xf32> to vector<8xf32>
    %218 = vector.shape_cast %217 : vector<8xf32> to vector<8x1xf32>
    %cst_85 = arith.constant 1.280000e+02 : f32
    %219 = vector.broadcast %cst_85 : f32 to vector<8x1xf32>
    %220 = arith.divf %218, %219 : vector<8x1xf32>
    %221 = vector.broadcast %213 : vector<8x1xf32> to vector<8x128xf32>
    %222 = arith.subf %207, %221 : vector<8x128xf32>
    %cst_86 = arith.constant 9.99999974E-6 : f32
    %223 = vector.broadcast %cst_86 : f32 to vector<8x1xf32>
    %224 = arith.addf %220, %223 : vector<8x1xf32>
    %225 = math.rsqrt %224 : vector<8x1xf32>
    %226 = vector.broadcast %225 : vector<8x1xf32> to vector<8x128xf32>
    %227 = arith.mulf %222, %226 : vector<8x128xf32>
    %228 = vector.broadcast %208 : vector<1x128xf32> to vector<8x128xf32>
    %229 = arith.mulf %227, %228 : vector<8x128xf32>
    %230 = vector.broadcast %209 : vector<1x128xf32> to vector<8x128xf32>
    %231 = arith.addf %229, %230 : vector<8x128xf32>
    %232 = arith.truncf %231 : vector<8x128xf32> to vector<8x128xbf16>
    %c0_87 = arith.constant 0 : index
    %c0_88 = arith.constant 0 : index
    %c0_89 = arith.constant 0 : index
    %233 = vector.load %arg2[%c0_87, %c0_88, %c0_89] : memref<1x8x128xbf16, #tpu.memory_space<vmem>>, vector<1x8x128xbf16>
    %234 = vector.shape_cast %233 : vector<1x8x128xbf16> to vector<8x128xbf16>
    %235 = arith.extf %234 : vector<8x128xbf16> to vector<8x128xf32>
    %cst_90 = arith.constant 11.3137083 : f32
    %236 = vector.broadcast %cst_90 : f32 to vector<8x128xf32>
    %237 = arith.mulf %235, %236 : vector<8x128xf32>
    %c0_91 = arith.constant 0 : index
    %c0_92 = arith.constant 0 : index
    %238 = vector.load %arg6[%c0_91, %c0_92] : memref<8x128xf32, #tpu.memory_space<vmem>>, vector<8x128xf32>
    %239 = arith.addf %237, %238 : vector<8x128xf32>
    %c0_93 = arith.constant 0 : index
    %c0_94 = arith.constant 0 : index
    %240 = vector.load %arg23[%c0_93, %c0_94] : memref<1x128xf32, #tpu.memory_space<vmem>>, vector<1x128xf32>
    %c0_95 = arith.constant 0 : index
    %c0_96 = arith.constant 0 : index
    %241 = vector.load %arg24[%c0_95, %c0_96] : memref<1x128xf32, #tpu.memory_space<vmem>>, vector<1x128xf32>
    %cst_97 = arith.constant dense<0.000000e+00> : vector<8xf32>
    %242 = vector.multi_reduction <add>, %239, %cst_97 [1] : vector<8x128xf32> to vector<8xf32>
    %243 = vector.shape_cast %242 : vector<8xf32> to vector<8x1xf32>
    %cst_98 = arith.constant 1.280000e+02 : f32
    %244 = vector.broadcast %cst_98 : f32 to vector<8x1xf32>
    %245 = arith.divf %243, %244 : vector<8x1xf32>
    %246 = vector.broadcast %245 : vector<8x1xf32> to vector<8x128xf32>
    %247 = arith.subf %239, %246 : vector<8x128xf32>
    %248 = arith.mulf %247, %247 : vector<8x128xf32>
    %cst_99 = arith.constant dense<0.000000e+00> : vector<8xf32>
    %249 = vector.multi_reduction <add>, %248, %cst_99 [1] : vector<8x128xf32> to vector<8xf32>
    %250 = vector.shape_cast %249 : vector<8xf32> to vector<8x1xf32>
    %cst_100 = arith.constant 1.280000e+02 : f32
    %251 = vector.broadcast %cst_100 : f32 to vector<8x1xf32>
    %252 = arith.divf %250, %251 : vector<8x1xf32>
    %253 = vector.broadcast %245 : vector<8x1xf32> to vector<8x128xf32>
    %254 = arith.subf %239, %253 : vector<8x128xf32>
    %cst_101 = arith.constant 9.99999974E-6 : f32
    %255 = vector.broadcast %cst_101 : f32 to vector<8x1xf32>
    %256 = arith.addf %252, %255 : vector<8x1xf32>
    %257 = math.rsqrt %256 : vector<8x1xf32>
    %258 = vector.broadcast %257 : vector<8x1xf32> to vector<8x128xf32>
    %259 = arith.mulf %254, %258 : vector<8x128xf32>
    %260 = vector.broadcast %240 : vector<1x128xf32> to vector<8x128xf32>
    %261 = arith.mulf %259, %260 : vector<8x128xf32>
    %262 = vector.broadcast %241 : vector<1x128xf32> to vector<8x128xf32>
    %263 = arith.addf %261, %262 : vector<8x128xf32>
    %c0_102 = arith.constant 0 : index
    %c0_103 = arith.constant 0 : index
    %264 = vector.load %arg25[%c0_102, %c0_103] : memref<1x128xf32, #tpu.memory_space<vmem>>, vector<1x128xf32>
    %c0_104 = arith.constant 0 : index
    %c0_105 = arith.constant 0 : index
    %265 = vector.load %arg26[%c0_104, %c0_105] : memref<1x128xf32, #tpu.memory_space<vmem>>, vector<1x128xf32>
    %cst_106 = arith.constant dense<0.000000e+00> : vector<8xf32>
    %266 = vector.multi_reduction <add>, %263, %cst_106 [1] : vector<8x128xf32> to vector<8xf32>
    %267 = vector.shape_cast %266 : vector<8xf32> to vector<8x1xf32>
    %cst_107 = arith.constant 1.280000e+02 : f32
    %268 = vector.broadcast %cst_107 : f32 to vector<8x1xf32>
    %269 = arith.divf %267, %268 : vector<8x1xf32>
    %270 = vector.broadcast %269 : vector<8x1xf32> to vector<8x128xf32>
    %271 = arith.subf %263, %270 : vector<8x128xf32>
    %272 = arith.mulf %271, %271 : vector<8x128xf32>
    %cst_108 = arith.constant dense<0.000000e+00> : vector<8xf32>
    %273 = vector.multi_reduction <add>, %272, %cst_108 [1] : vector<8x128xf32> to vector<8xf32>
    %274 = vector.shape_cast %273 : vector<8xf32> to vector<8x1xf32>
    %cst_109 = arith.constant 1.280000e+02 : f32
    %275 = vector.broadcast %cst_109 : f32 to vector<8x1xf32>
    %276 = arith.divf %274, %275 : vector<8x1xf32>
    %277 = vector.broadcast %269 : vector<8x1xf32> to vector<8x128xf32>
    %278 = arith.subf %263, %277 : vector<8x128xf32>
    %cst_110 = arith.constant 9.99999974E-6 : f32
    %279 = vector.broadcast %cst_110 : f32 to vector<8x1xf32>
    %280 = arith.addf %276, %279 : vector<8x1xf32>
    %281 = math.rsqrt %280 : vector<8x1xf32>
    %282 = vector.broadcast %281 : vector<8x1xf32> to vector<8x128xf32>
    %283 = arith.mulf %278, %282 : vector<8x128xf32>
    %284 = vector.broadcast %264 : vector<1x128xf32> to vector<8x128xf32>
    %285 = arith.mulf %283, %284 : vector<8x128xf32>
    %286 = vector.broadcast %265 : vector<1x128xf32> to vector<8x128xf32>
    %287 = arith.addf %285, %286 : vector<8x128xf32>
    %288 = arith.truncf %287 : vector<8x128xf32> to vector<8x128xbf16>
    %c0_111 = arith.constant 0 : index
    %c0_112 = arith.constant 0 : index
    %289 = vector.load %arg27[%c0_111, %c0_112] : memref<128x384xbf16, #tpu.memory_space<vmem>>, vector<128x384xbf16>
    %cst_113 = arith.constant dense<0.000000e+00> : vector<8x384xf32>
    %290 = tpu.matmul %288, %289, %cst_113 {dimension_numbers = #tpu.dot_dimension_numbers<[1], [0], [0], [1], [0, 0, 1, 1], [], []>} : vector<8x128xbf16>, vector<128x384xbf16>, vector<8x384xf32> -> vector<8x384xf32>
    %c0_114 = arith.constant 0 : index
    %c0_115 = arith.constant 0 : index
    %291 = vector.load %arg28[%c0_114, %c0_115] : memref<1x384xf32, #tpu.memory_space<vmem>>, vector<1x384xf32>
    %292 = vector.broadcast %291 : vector<1x384xf32> to vector<8x384xf32>
    %293 = arith.addf %290, %292 : vector<8x384xf32>
    %294 = arith.truncf %293 : vector<8x384xf32> to vector<8x384xbf16>
    %295 = vector.extract_strided_slice %294 {offsets = [0, 0], sizes = [8, 128], strides = [1, 1]} : vector<8x384xbf16> to vector<8x128xbf16>
    %296 = vector.extract_strided_slice %294 {offsets = [0, 128], sizes = [8, 128], strides = [1, 1]} : vector<8x384xbf16> to vector<8x128xbf16>
    %297 = vector.extract_strided_slice %294 {offsets = [0, 256], sizes = [8, 128], strides = [1, 1]} : vector<8x384xbf16> to vector<8x128xbf16>
    %298 = vector.extract_strided_slice %295 {offsets = [0, 0], sizes = [8, 32], strides = [1, 1]} : vector<8x128xbf16> to vector<8x32xbf16>
    %299 = vector.extract_strided_slice %296 {offsets = [0, 0], sizes = [8, 32], strides = [1, 1]} : vector<8x128xbf16> to vector<8x32xbf16>
    %cst_116 = arith.constant dense<0.000000e+00> : vector<8x8xf32>
    %300 = tpu.matmul %298, %299, %cst_116 {dimension_numbers = #tpu.dot_dimension_numbers<[1], [1], [0], [0], [0, 0, 1, 0], [], []>} : vector<8x32xbf16>, vector<8x32xbf16>, vector<8x8xf32> -> vector<8x8xf32>
    %301 = arith.addf %300, %16 : vector<8x8xf32>
    %cst_117 = arith.constant dense<0xFF800000> : vector<8xf32>
    %302 = vector.multi_reduction <maximumf>, %301, %cst_117 [1] : vector<8x8xf32> to vector<8xf32>
    %303 = vector.shape_cast %302 : vector<8xf32> to vector<8x1xf32>
    %304 = vector.broadcast %303 : vector<8x1xf32> to vector<8x8xf32>
    %305 = arith.subf %301, %304 : vector<8x8xf32>
    %306 = math.exp %305 : vector<8x8xf32>
    %cst_118 = arith.constant dense<0.000000e+00> : vector<8xf32>
    %307 = vector.multi_reduction <add>, %306, %cst_118 [1] : vector<8x8xf32> to vector<8xf32>
    %308 = vector.shape_cast %307 : vector<8xf32> to vector<8x1xf32>
    %309 = tpu.reciprocal %308 {approx = true} : vector<8x1xf32> -> vector<8x1xf32>
    %310 = vector.broadcast %309 : vector<8x1xf32> to vector<8x8xf32>
    %311 = arith.mulf %306, %310 : vector<8x8xf32>
    %312 = arith.truncf %311 : vector<8x8xf32> to vector<8x8xbf16>
    %313 = vector.extract_strided_slice %297 {offsets = [0, 0], sizes = [8, 32], strides = [1, 1]} : vector<8x128xbf16> to vector<8x32xbf16>
    %cst_119 = arith.constant dense<0.000000e+00> : vector<8x32xf32>
    %314 = tpu.matmul %312, %313, %cst_119 {dimension_numbers = #tpu.dot_dimension_numbers<[1], [0], [0], [1], [0, 0, 1, 1], [], []>} : vector<8x8xbf16>, vector<8x32xbf16>, vector<8x32xf32> -> vector<8x32xf32>
    %315 = vector.extract_strided_slice %295 {offsets = [0, 32], sizes = [8, 32], strides = [1, 1]} : vector<8x128xbf16> to vector<8x32xbf16>
    %316 = vector.extract_strided_slice %296 {offsets = [0, 32], sizes = [8, 32], strides = [1, 1]} : vector<8x128xbf16> to vector<8x32xbf16>
    %cst_120 = arith.constant dense<0.000000e+00> : vector<8x8xf32>
    %317 = tpu.matmul %315, %316, %cst_120 {dimension_numbers = #tpu.dot_dimension_numbers<[1], [1], [0], [0], [0, 0, 1, 0], [], []>} : vector<8x32xbf16>, vector<8x32xbf16>, vector<8x8xf32> -> vector<8x8xf32>
    %318 = arith.addf %317, %16 : vector<8x8xf32>
    %cst_121 = arith.constant dense<0xFF800000> : vector<8xf32>
    %319 = vector.multi_reduction <maximumf>, %318, %cst_121 [1] : vector<8x8xf32> to vector<8xf32>
    %320 = vector.shape_cast %319 : vector<8xf32> to vector<8x1xf32>
    %321 = vector.broadcast %320 : vector<8x1xf32> to vector<8x8xf32>
    %322 = arith.subf %318, %321 : vector<8x8xf32>
    %323 = math.exp %322 : vector<8x8xf32>
    %cst_122 = arith.constant dense<0.000000e+00> : vector<8xf32>
    %324 = vector.multi_reduction <add>, %323, %cst_122 [1] : vector<8x8xf32> to vector<8xf32>
    %325 = vector.shape_cast %324 : vector<8xf32> to vector<8x1xf32>
    %326 = tpu.reciprocal %325 {approx = true} : vector<8x1xf32> -> vector<8x1xf32>
    %327 = vector.broadcast %326 : vector<8x1xf32> to vector<8x8xf32>
    %328 = arith.mulf %323, %327 : vector<8x8xf32>
    %329 = arith.truncf %328 : vector<8x8xf32> to vector<8x8xbf16>
    %330 = vector.extract_strided_slice %297 {offsets = [0, 32], sizes = [8, 32], strides = [1, 1]} : vector<8x128xbf16> to vector<8x32xbf16>
    %cst_123 = arith.constant dense<0.000000e+00> : vector<8x32xf32>
    %331 = tpu.matmul %329, %330, %cst_123 {dimension_numbers = #tpu.dot_dimension_numbers<[1], [0], [0], [1], [0, 0, 1, 1], [], []>} : vector<8x8xbf16>, vector<8x32xbf16>, vector<8x32xf32> -> vector<8x32xf32>
    %332 = vector.extract_strided_slice %295 {offsets = [0, 64], sizes = [8, 32], strides = [1, 1]} : vector<8x128xbf16> to vector<8x32xbf16>
    %333 = vector.extract_strided_slice %296 {offsets = [0, 64], sizes = [8, 32], strides = [1, 1]} : vector<8x128xbf16> to vector<8x32xbf16>
    %cst_124 = arith.constant dense<0.000000e+00> : vector<8x8xf32>
    %334 = tpu.matmul %332, %333, %cst_124 {dimension_numbers = #tpu.dot_dimension_numbers<[1], [1], [0], [0], [0, 0, 1, 0], [], []>} : vector<8x32xbf16>, vector<8x32xbf16>, vector<8x8xf32> -> vector<8x8xf32>
    %335 = arith.addf %334, %16 : vector<8x8xf32>
    %cst_125 = arith.constant dense<0xFF800000> : vector<8xf32>
    %336 = vector.multi_reduction <maximumf>, %335, %cst_125 [1] : vector<8x8xf32> to vector<8xf32>
    %337 = vector.shape_cast %336 : vector<8xf32> to vector<8x1xf32>
    %338 = vector.broadcast %337 : vector<8x1xf32> to vector<8x8xf32>
    %339 = arith.subf %335, %338 : vector<8x8xf32>
    %340 = math.exp %339 : vector<8x8xf32>
    %cst_126 = arith.constant dense<0.000000e+00> : vector<8xf32>
    %341 = vector.multi_reduction <add>, %340, %cst_126 [1] : vector<8x8xf32> to vector<8xf32>
    %342 = vector.shape_cast %341 : vector<8xf32> to vector<8x1xf32>
    %343 = tpu.reciprocal %342 {approx = true} : vector<8x1xf32> -> vector<8x1xf32>
    %344 = vector.broadcast %343 : vector<8x1xf32> to vector<8x8xf32>
    %345 = arith.mulf %340, %344 : vector<8x8xf32>
    %346 = arith.truncf %345 : vector<8x8xf32> to vector<8x8xbf16>
    %347 = vector.extract_strided_slice %297 {offsets = [0, 64], sizes = [8, 32], strides = [1, 1]} : vector<8x128xbf16> to vector<8x32xbf16>
    %cst_127 = arith.constant dense<0.000000e+00> : vector<8x32xf32>
    %348 = tpu.matmul %346, %347, %cst_127 {dimension_numbers = #tpu.dot_dimension_numbers<[1], [0], [0], [1], [0, 0, 1, 1], [], []>} : vector<8x8xbf16>, vector<8x32xbf16>, vector<8x32xf32> -> vector<8x32xf32>
    %349 = vector.extract_strided_slice %295 {offsets = [0, 96], sizes = [8, 32], strides = [1, 1]} : vector<8x128xbf16> to vector<8x32xbf16>
    %350 = vector.extract_strided_slice %296 {offsets = [0, 96], sizes = [8, 32], strides = [1, 1]} : vector<8x128xbf16> to vector<8x32xbf16>
    %cst_128 = arith.constant dense<0.000000e+00> : vector<8x8xf32>
    %351 = tpu.matmul %349, %350, %cst_128 {dimension_numbers = #tpu.dot_dimension_numbers<[1], [1], [0], [0], [0, 0, 1, 0], [], []>} : vector<8x32xbf16>, vector<8x32xbf16>, vector<8x8xf32> -> vector<8x8xf32>
    %352 = arith.addf %351, %16 : vector<8x8xf32>
    %cst_129 = arith.constant dense<0xFF800000> : vector<8xf32>
    %353 = vector.multi_reduction <maximumf>, %352, %cst_129 [1] : vector<8x8xf32> to vector<8xf32>
    %354 = vector.shape_cast %353 : vector<8xf32> to vector<8x1xf32>
    %355 = vector.broadcast %354 : vector<8x1xf32> to vector<8x8xf32>
    %356 = arith.subf %352, %355 : vector<8x8xf32>
    %357 = math.exp %356 : vector<8x8xf32>
    %cst_130 = arith.constant dense<0.000000e+00> : vector<8xf32>
    %358 = vector.multi_reduction <add>, %357, %cst_130 [1] : vector<8x8xf32> to vector<8xf32>
    %359 = vector.shape_cast %358 : vector<8xf32> to vector<8x1xf32>
    %360 = tpu.reciprocal %359 {approx = true} : vector<8x1xf32> -> vector<8x1xf32>
    %361 = vector.broadcast %360 : vector<8x1xf32> to vector<8x8xf32>
    %362 = arith.mulf %357, %361 : vector<8x8xf32>
    %363 = arith.truncf %362 : vector<8x8xf32> to vector<8x8xbf16>
    %364 = vector.extract_strided_slice %297 {offsets = [0, 96], sizes = [8, 32], strides = [1, 1]} : vector<8x128xbf16> to vector<8x32xbf16>
    %cst_131 = arith.constant dense<0.000000e+00> : vector<8x32xf32>
    %365 = tpu.matmul %363, %364, %cst_131 {dimension_numbers = #tpu.dot_dimension_numbers<[1], [0], [0], [1], [0, 0, 1, 1], [], []>} : vector<8x8xbf16>, vector<8x32xbf16>, vector<8x32xf32> -> vector<8x32xf32>
    %366 = tpu.concatenate %314, %331, %348, %365 in 1 : vector<8x32xf32>, vector<8x32xf32>, vector<8x32xf32>, vector<8x32xf32> -> vector<8x128xf32>
    %367 = arith.truncf %366 : vector<8x128xf32> to vector<8x128xbf16>
    %c0_132 = arith.constant 0 : index
    %c0_133 = arith.constant 0 : index
    %368 = vector.load %arg29[%c0_132, %c0_133] : memref<128x128xbf16, #tpu.memory_space<vmem>>, vector<128x128xbf16>
    %cst_134 = arith.constant dense<0.000000e+00> : vector<8x128xf32>
    %369 = tpu.matmul %367, %368, %cst_134 {dimension_numbers = #tpu.dot_dimension_numbers<[1], [0], [0], [1], [0, 0, 1, 1], [], []>} : vector<8x128xbf16>, vector<128x128xbf16>, vector<8x128xf32> -> vector<8x128xf32>
    %370 = arith.addf %263, %369 : vector<8x128xf32>
    %c0_135 = arith.constant 0 : index
    %c0_136 = arith.constant 0 : index
    %371 = vector.load %arg30[%c0_135, %c0_136] : memref<1x128xf32, #tpu.memory_space<vmem>>, vector<1x128xf32>
    %372 = vector.broadcast %371 : vector<1x128xf32> to vector<8x128xf32>
    %373 = arith.addf %370, %372 : vector<8x128xf32>
    %c0_137 = arith.constant 0 : index
    %c0_138 = arith.constant 0 : index
    %374 = vector.load %arg31[%c0_137, %c0_138] : memref<1x128xf32, #tpu.memory_space<vmem>>, vector<1x128xf32>
    %c0_139 = arith.constant 0 : index
    %c0_140 = arith.constant 0 : index
    %375 = vector.load %arg32[%c0_139, %c0_140] : memref<1x128xf32, #tpu.memory_space<vmem>>, vector<1x128xf32>
    %cst_141 = arith.constant dense<0.000000e+00> : vector<8xf32>
    %376 = vector.multi_reduction <add>, %373, %cst_141 [1] : vector<8x128xf32> to vector<8xf32>
    %377 = vector.shape_cast %376 : vector<8xf32> to vector<8x1xf32>
    %cst_142 = arith.constant 1.280000e+02 : f32
    %378 = vector.broadcast %cst_142 : f32 to vector<8x1xf32>
    %379 = arith.divf %377, %378 : vector<8x1xf32>
    %380 = vector.broadcast %379 : vector<8x1xf32> to vector<8x128xf32>
    %381 = arith.subf %373, %380 : vector<8x128xf32>
    %382 = arith.mulf %381, %381 : vector<8x128xf32>
    %cst_143 = arith.constant dense<0.000000e+00> : vector<8xf32>
    %383 = vector.multi_reduction <add>, %382, %cst_143 [1] : vector<8x128xf32> to vector<8xf32>
    %384 = vector.shape_cast %383 : vector<8xf32> to vector<8x1xf32>
    %cst_144 = arith.constant 1.280000e+02 : f32
    %385 = vector.broadcast %cst_144 : f32 to vector<8x1xf32>
    %386 = arith.divf %384, %385 : vector<8x1xf32>
    %387 = vector.broadcast %379 : vector<8x1xf32> to vector<8x128xf32>
    %388 = arith.subf %373, %387 : vector<8x128xf32>
    %cst_145 = arith.constant 9.99999974E-6 : f32
    %389 = vector.broadcast %cst_145 : f32 to vector<8x1xf32>
    %390 = arith.addf %386, %389 : vector<8x1xf32>
    %391 = math.rsqrt %390 : vector<8x1xf32>
    %392 = vector.broadcast %391 : vector<8x1xf32> to vector<8x128xf32>
    %393 = arith.mulf %388, %392 : vector<8x128xf32>
    %394 = vector.broadcast %374 : vector<1x128xf32> to vector<8x128xf32>
    %395 = arith.mulf %393, %394 : vector<8x128xf32>
    %396 = vector.broadcast %375 : vector<1x128xf32> to vector<8x128xf32>
    %397 = arith.addf %395, %396 : vector<8x128xf32>
    %398 = arith.truncf %397 : vector<8x128xf32> to vector<8x128xbf16>
    %c0_146 = arith.constant 0 : index
    %c0_147 = arith.constant 0 : index
    %399 = vector.load %arg33[%c0_146, %c0_147] : memref<128x128xbf16, #tpu.memory_space<vmem>>, vector<128x128xbf16>
    %cst_148 = arith.constant dense<0.000000e+00> : vector<8x128xf32>
    %400 = tpu.matmul %398, %399, %cst_148 {dimension_numbers = #tpu.dot_dimension_numbers<[1], [0], [0], [1], [0, 0, 1, 1], [], []>} : vector<8x128xbf16>, vector<128x128xbf16>, vector<8x128xf32> -> vector<8x128xf32>
    %c0_149 = arith.constant 0 : index
    %c0_150 = arith.constant 0 : index
    %401 = vector.load %arg34[%c0_149, %c0_150] : memref<1x128xf32, #tpu.memory_space<vmem>>, vector<1x128xf32>
    %402 = vector.broadcast %401 : vector<1x128xf32> to vector<8x128xf32>
    %403 = arith.addf %400, %402 : vector<8x128xf32>
    %404 = arith.truncf %403 : vector<8x128xf32> to vector<8x128xbf16>
    %c0_151 = arith.constant 0 : index
    %c0_152 = arith.constant 0 : index
    %405 = vector.load %arg35[%c0_151, %c0_152] : memref<128x256xbf16, #tpu.memory_space<vmem>>, vector<128x256xbf16>
    %cst_153 = arith.constant dense<0.000000e+00> : vector<8x256xf32>
    %406 = tpu.matmul %232, %405, %cst_153 {dimension_numbers = #tpu.dot_dimension_numbers<[1], [0], [0], [1], [0, 0, 1, 1], [], []>} : vector<8x128xbf16>, vector<128x256xbf16>, vector<8x256xf32> -> vector<8x256xf32>
    %c0_154 = arith.constant 0 : index
    %c0_155 = arith.constant 0 : index
    %407 = vector.load %arg36[%c0_154, %c0_155] : memref<1x256xf32, #tpu.memory_space<vmem>>, vector<1x256xf32>
    %408 = vector.broadcast %407 : vector<1x256xf32> to vector<8x256xf32>
    %409 = arith.addf %406, %408 : vector<8x256xf32>
    %410 = arith.truncf %409 : vector<8x256xf32> to vector<8x256xbf16>
    %411 = vector.extract_strided_slice %410 {offsets = [0, 0], sizes = [8, 128], strides = [1, 1]} : vector<8x256xbf16> to vector<8x128xbf16>
    %412 = vector.extract_strided_slice %410 {offsets = [0, 128], sizes = [8, 128], strides = [1, 1]} : vector<8x256xbf16> to vector<8x128xbf16>
    %413 = vector.extract_strided_slice %404 {offsets = [0, 0], sizes = [8, 32], strides = [1, 1]} : vector<8x128xbf16> to vector<8x32xbf16>
    %414 = vector.extract_strided_slice %411 {offsets = [0, 0], sizes = [8, 32], strides = [1, 1]} : vector<8x128xbf16> to vector<8x32xbf16>
    %cst_156 = arith.constant dense<0.000000e+00> : vector<8x8xf32>
    %415 = tpu.matmul %413, %414, %cst_156 {dimension_numbers = #tpu.dot_dimension_numbers<[1], [1], [0], [0], [0, 0, 1, 0], [], []>} : vector<8x32xbf16>, vector<8x32xbf16>, vector<8x8xf32> -> vector<8x8xf32>
    %416 = arith.addf %415, %10 : vector<8x8xf32>
    %cst_157 = arith.constant dense<0xFF800000> : vector<8xf32>
    %417 = vector.multi_reduction <maximumf>, %416, %cst_157 [1] : vector<8x8xf32> to vector<8xf32>
    %418 = vector.shape_cast %417 : vector<8xf32> to vector<8x1xf32>
    %419 = vector.broadcast %418 : vector<8x1xf32> to vector<8x8xf32>
    %420 = arith.subf %416, %419 : vector<8x8xf32>
    %421 = math.exp %420 : vector<8x8xf32>
    %cst_158 = arith.constant dense<0.000000e+00> : vector<8xf32>
    %422 = vector.multi_reduction <add>, %421, %cst_158 [1] : vector<8x8xf32> to vector<8xf32>
    %423 = vector.shape_cast %422 : vector<8xf32> to vector<8x1xf32>
    %424 = tpu.reciprocal %423 {approx = true} : vector<8x1xf32> -> vector<8x1xf32>
    %425 = vector.broadcast %424 : vector<8x1xf32> to vector<8x8xf32>
    %426 = arith.mulf %421, %425 : vector<8x8xf32>
    %427 = arith.truncf %426 : vector<8x8xf32> to vector<8x8xbf16>
    %428 = vector.extract_strided_slice %412 {offsets = [0, 0], sizes = [8, 32], strides = [1, 1]} : vector<8x128xbf16> to vector<8x32xbf16>
    %cst_159 = arith.constant dense<0.000000e+00> : vector<8x32xf32>
    %429 = tpu.matmul %427, %428, %cst_159 {dimension_numbers = #tpu.dot_dimension_numbers<[1], [0], [0], [1], [0, 0, 1, 1], [], []>} : vector<8x8xbf16>, vector<8x32xbf16>, vector<8x32xf32> -> vector<8x32xf32>
    %430 = vector.extract_strided_slice %404 {offsets = [0, 32], sizes = [8, 32], strides = [1, 1]} : vector<8x128xbf16> to vector<8x32xbf16>
    %431 = vector.extract_strided_slice %411 {offsets = [0, 32], sizes = [8, 32], strides = [1, 1]} : vector<8x128xbf16> to vector<8x32xbf16>
    %cst_160 = arith.constant dense<0.000000e+00> : vector<8x8xf32>
    %432 = tpu.matmul %430, %431, %cst_160 {dimension_numbers = #tpu.dot_dimension_numbers<[1], [1], [0], [0], [0, 0, 1, 0], [], []>} : vector<8x32xbf16>, vector<8x32xbf16>, vector<8x8xf32> -> vector<8x8xf32>
    %433 = arith.addf %432, %10 : vector<8x8xf32>
    %cst_161 = arith.constant dense<0xFF800000> : vector<8xf32>
    %434 = vector.multi_reduction <maximumf>, %433, %cst_161 [1] : vector<8x8xf32> to vector<8xf32>
    %435 = vector.shape_cast %434 : vector<8xf32> to vector<8x1xf32>
    %436 = vector.broadcast %435 : vector<8x1xf32> to vector<8x8xf32>
    %437 = arith.subf %433, %436 : vector<8x8xf32>
    %438 = math.exp %437 : vector<8x8xf32>
    %cst_162 = arith.constant dense<0.000000e+00> : vector<8xf32>
    %439 = vector.multi_reduction <add>, %438, %cst_162 [1] : vector<8x8xf32> to vector<8xf32>
    %440 = vector.shape_cast %439 : vector<8xf32> to vector<8x1xf32>
    %441 = tpu.reciprocal %440 {approx = true} : vector<8x1xf32> -> vector<8x1xf32>
    %442 = vector.broadcast %441 : vector<8x1xf32> to vector<8x8xf32>
    %443 = arith.mulf %438, %442 : vector<8x8xf32>
    %444 = arith.truncf %443 : vector<8x8xf32> to vector<8x8xbf16>
    %445 = vector.extract_strided_slice %412 {offsets = [0, 32], sizes = [8, 32], strides = [1, 1]} : vector<8x128xbf16> to vector<8x32xbf16>
    %cst_163 = arith.constant dense<0.000000e+00> : vector<8x32xf32>
    %446 = tpu.matmul %444, %445, %cst_163 {dimension_numbers = #tpu.dot_dimension_numbers<[1], [0], [0], [1], [0, 0, 1, 1], [], []>} : vector<8x8xbf16>, vector<8x32xbf16>, vector<8x32xf32> -> vector<8x32xf32>
    %447 = vector.extract_strided_slice %404 {offsets = [0, 64], sizes = [8, 32], strides = [1, 1]} : vector<8x128xbf16> to vector<8x32xbf16>
    %448 = vector.extract_strided_slice %411 {offsets = [0, 64], sizes = [8, 32], strides = [1, 1]} : vector<8x128xbf16> to vector<8x32xbf16>
    %cst_164 = arith.constant dense<0.000000e+00> : vector<8x8xf32>
    %449 = tpu.matmul %447, %448, %cst_164 {dimension_numbers = #tpu.dot_dimension_numbers<[1], [1], [0], [0], [0, 0, 1, 0], [], []>} : vector<8x32xbf16>, vector<8x32xbf16>, vector<8x8xf32> -> vector<8x8xf32>
    %450 = arith.addf %449, %10 : vector<8x8xf32>
    %cst_165 = arith.constant dense<0xFF800000> : vector<8xf32>
    %451 = vector.multi_reduction <maximumf>, %450, %cst_165 [1] : vector<8x8xf32> to vector<8xf32>
    %452 = vector.shape_cast %451 : vector<8xf32> to vector<8x1xf32>
    %453 = vector.broadcast %452 : vector<8x1xf32> to vector<8x8xf32>
    %454 = arith.subf %450, %453 : vector<8x8xf32>
    %455 = math.exp %454 : vector<8x8xf32>
    %cst_166 = arith.constant dense<0.000000e+00> : vector<8xf32>
    %456 = vector.multi_reduction <add>, %455, %cst_166 [1] : vector<8x8xf32> to vector<8xf32>
    %457 = vector.shape_cast %456 : vector<8xf32> to vector<8x1xf32>
    %458 = tpu.reciprocal %457 {approx = true} : vector<8x1xf32> -> vector<8x1xf32>
    %459 = vector.broadcast %458 : vector<8x1xf32> to vector<8x8xf32>
    %460 = arith.mulf %455, %459 : vector<8x8xf32>
    %461 = arith.truncf %460 : vector<8x8xf32> to vector<8x8xbf16>
    %462 = vector.extract_strided_slice %412 {offsets = [0, 64], sizes = [8, 32], strides = [1, 1]} : vector<8x128xbf16> to vector<8x32xbf16>
    %cst_167 = arith.constant dense<0.000000e+00> : vector<8x32xf32>
    %463 = tpu.matmul %461, %462, %cst_167 {dimension_numbers = #tpu.dot_dimension_numbers<[1], [0], [0], [1], [0, 0, 1, 1], [], []>} : vector<8x8xbf16>, vector<8x32xbf16>, vector<8x32xf32> -> vector<8x32xf32>
    %464 = vector.extract_strided_slice %404 {offsets = [0, 96], sizes = [8, 32], strides = [1, 1]} : vector<8x128xbf16> to vector<8x32xbf16>
    %465 = vector.extract_strided_slice %411 {offsets = [0, 96], sizes = [8, 32], strides = [1, 1]} : vector<8x128xbf16> to vector<8x32xbf16>
    %cst_168 = arith.constant dense<0.000000e+00> : vector<8x8xf32>
    %466 = tpu.matmul %464, %465, %cst_168 {dimension_numbers = #tpu.dot_dimension_numbers<[1], [1], [0], [0], [0, 0, 1, 0], [], []>} : vector<8x32xbf16>, vector<8x32xbf16>, vector<8x8xf32> -> vector<8x8xf32>
    %467 = arith.addf %466, %10 : vector<8x8xf32>
    %cst_169 = arith.constant dense<0xFF800000> : vector<8xf32>
    %468 = vector.multi_reduction <maximumf>, %467, %cst_169 [1] : vector<8x8xf32> to vector<8xf32>
    %469 = vector.shape_cast %468 : vector<8xf32> to vector<8x1xf32>
    %470 = vector.broadcast %469 : vector<8x1xf32> to vector<8x8xf32>
    %471 = arith.subf %467, %470 : vector<8x8xf32>
    %472 = math.exp %471 : vector<8x8xf32>
    %cst_170 = arith.constant dense<0.000000e+00> : vector<8xf32>
    %473 = vector.multi_reduction <add>, %472, %cst_170 [1] : vector<8x8xf32> to vector<8xf32>
    %474 = vector.shape_cast %473 : vector<8xf32> to vector<8x1xf32>
    %475 = tpu.reciprocal %474 {approx = true} : vector<8x1xf32> -> vector<8x1xf32>
    %476 = vector.broadcast %475 : vector<8x1xf32> to vector<8x8xf32>
    %477 = arith.mulf %472, %476 : vector<8x8xf32>
    %478 = arith.truncf %477 : vector<8x8xf32> to vector<8x8xbf16>
    %479 = vector.extract_strided_slice %412 {offsets = [0, 96], sizes = [8, 32], strides = [1, 1]} : vector<8x128xbf16> to vector<8x32xbf16>
    %cst_171 = arith.constant dense<0.000000e+00> : vector<8x32xf32>
    %480 = tpu.matmul %478, %479, %cst_171 {dimension_numbers = #tpu.dot_dimension_numbers<[1], [0], [0], [1], [0, 0, 1, 1], [], []>} : vector<8x8xbf16>, vector<8x32xbf16>, vector<8x32xf32> -> vector<8x32xf32>
    %481 = tpu.concatenate %429, %446, %463, %480 in 1 : vector<8x32xf32>, vector<8x32xf32>, vector<8x32xf32>, vector<8x32xf32> -> vector<8x128xf32>
    %482 = arith.truncf %481 : vector<8x128xf32> to vector<8x128xbf16>
    %c0_172 = arith.constant 0 : index
    %c0_173 = arith.constant 0 : index
    %483 = vector.load %arg37[%c0_172, %c0_173] : memref<128x128xbf16, #tpu.memory_space<vmem>>, vector<128x128xbf16>
    %cst_174 = arith.constant dense<0.000000e+00> : vector<8x128xf32>
    %484 = tpu.matmul %482, %483, %cst_174 {dimension_numbers = #tpu.dot_dimension_numbers<[1], [0], [0], [1], [0, 0, 1, 1], [], []>} : vector<8x128xbf16>, vector<128x128xbf16>, vector<8x128xf32> -> vector<8x128xf32>
    %485 = arith.addf %373, %484 : vector<8x128xf32>
    %c0_175 = arith.constant 0 : index
    %c0_176 = arith.constant 0 : index
    %486 = vector.load %arg38[%c0_175, %c0_176] : memref<1x128xf32, #tpu.memory_space<vmem>>, vector<1x128xf32>
    %487 = vector.broadcast %486 : vector<1x128xf32> to vector<8x128xf32>
    %488 = arith.addf %485, %487 : vector<8x128xf32>
    %c0_177 = arith.constant 0 : index
    %c0_178 = arith.constant 0 : index
    %489 = vector.load %arg39[%c0_177, %c0_178] : memref<1x128xf32, #tpu.memory_space<vmem>>, vector<1x128xf32>
    %c0_179 = arith.constant 0 : index
    %c0_180 = arith.constant 0 : index
    %490 = vector.load %arg40[%c0_179, %c0_180] : memref<1x128xf32, #tpu.memory_space<vmem>>, vector<1x128xf32>
    %cst_181 = arith.constant dense<0.000000e+00> : vector<8xf32>
    %491 = vector.multi_reduction <add>, %488, %cst_181 [1] : vector<8x128xf32> to vector<8xf32>
    %492 = vector.shape_cast %491 : vector<8xf32> to vector<8x1xf32>
    %cst_182 = arith.constant 1.280000e+02 : f32
    %493 = vector.broadcast %cst_182 : f32 to vector<8x1xf32>
    %494 = arith.divf %492, %493 : vector<8x1xf32>
    %495 = vector.broadcast %494 : vector<8x1xf32> to vector<8x128xf32>
    %496 = arith.subf %488, %495 : vector<8x128xf32>
    %497 = arith.mulf %496, %496 : vector<8x128xf32>
    %cst_183 = arith.constant dense<0.000000e+00> : vector<8xf32>
    %498 = vector.multi_reduction <add>, %497, %cst_183 [1] : vector<8x128xf32> to vector<8xf32>
    %499 = vector.shape_cast %498 : vector<8xf32> to vector<8x1xf32>
    %cst_184 = arith.constant 1.280000e+02 : f32
    %500 = vector.broadcast %cst_184 : f32 to vector<8x1xf32>
    %501 = arith.divf %499, %500 : vector<8x1xf32>
    %502 = vector.broadcast %494 : vector<8x1xf32> to vector<8x128xf32>
    %503 = arith.subf %488, %502 : vector<8x128xf32>
    %cst_185 = arith.constant 9.99999974E-6 : f32
    %504 = vector.broadcast %cst_185 : f32 to vector<8x1xf32>
    %505 = arith.addf %501, %504 : vector<8x1xf32>
    %506 = math.rsqrt %505 : vector<8x1xf32>
    %507 = vector.broadcast %506 : vector<8x1xf32> to vector<8x128xf32>
    %508 = arith.mulf %503, %507 : vector<8x128xf32>
    %509 = vector.broadcast %489 : vector<1x128xf32> to vector<8x128xf32>
    %510 = arith.mulf %508, %509 : vector<8x128xf32>
    %511 = vector.broadcast %490 : vector<1x128xf32> to vector<8x128xf32>
    %512 = arith.addf %510, %511 : vector<8x128xf32>
    %513 = arith.truncf %512 : vector<8x128xf32> to vector<8x128xbf16>
    %c0_186 = arith.constant 0 : index
    %c0_187 = arith.constant 0 : index
    %514 = vector.load %arg41[%c0_186, %c0_187] : memref<128x256xbf16, #tpu.memory_space<vmem>>, vector<128x256xbf16>
    %cst_188 = arith.constant dense<0.000000e+00> : vector<8x256xf32>
    %515 = tpu.matmul %513, %514, %cst_188 {dimension_numbers = #tpu.dot_dimension_numbers<[1], [0], [0], [1], [0, 0, 1, 1], [], []>} : vector<8x128xbf16>, vector<128x256xbf16>, vector<8x256xf32> -> vector<8x256xf32>
    %c0_189 = arith.constant 0 : index
    %c0_190 = arith.constant 0 : index
    %516 = vector.load %arg42[%c0_189, %c0_190] : memref<1x256xf32, #tpu.memory_space<vmem>>, vector<1x256xf32>
    %517 = vector.broadcast %516 : vector<1x256xf32> to vector<8x256xf32>
    %518 = arith.addf %515, %517 : vector<8x256xf32>
    %519 = arith.mulf %518, %518 : vector<8x256xf32>
    %520 = arith.mulf %518, %519 : vector<8x256xf32>
    %cst_191 = arith.constant 4.471500e-02 : f32
    %521 = vector.broadcast %cst_191 : f32 to vector<8x256xf32>
    %522 = arith.mulf %521, %520 : vector<8x256xf32>
    %523 = arith.addf %518, %522 : vector<8x256xf32>
    %cst_192 = arith.constant 0.797884583 : f32
    %524 = vector.broadcast %cst_192 : f32 to vector<8x256xf32>
    %525 = arith.mulf %524, %523 : vector<8x256xf32>
    %526 = math.tanh %525 : vector<8x256xf32>
    %cst_193 = arith.constant 1.000000e+00 : f32
    %527 = vector.broadcast %cst_193 : f32 to vector<8x256xf32>
    %528 = arith.addf %527, %526 : vector<8x256xf32>
    %cst_194 = arith.constant 5.000000e-01 : f32
    %529 = vector.broadcast %cst_194 : f32 to vector<8x256xf32>
    %530 = arith.mulf %529, %528 : vector<8x256xf32>
    %531 = arith.mulf %518, %530 : vector<8x256xf32>
    %532 = arith.truncf %531 : vector<8x256xf32> to vector<8x256xbf16>
    %c0_195 = arith.constant 0 : index
    %c0_196 = arith.constant 0 : index
    %533 = vector.load %arg43[%c0_195, %c0_196] : memref<256x128xbf16, #tpu.memory_space<vmem>>, vector<256x128xbf16>
    %cst_197 = arith.constant dense<0.000000e+00> : vector<8x128xf32>
    %534 = tpu.matmul %532, %533, %cst_197 {dimension_numbers = #tpu.dot_dimension_numbers<[1], [0], [0], [1], [0, 0, 1, 1], [], []>} : vector<8x256xbf16>, vector<256x128xbf16>, vector<8x128xf32> -> vector<8x128xf32>
    %535 = arith.addf %488, %534 : vector<8x128xf32>
    %c0_198 = arith.constant 0 : index
    %c0_199 = arith.constant 0 : index
    %536 = vector.load %arg44[%c0_198, %c0_199] : memref<1x128xf32, #tpu.memory_space<vmem>>, vector<1x128xf32>
    %537 = vector.broadcast %536 : vector<1x128xf32> to vector<8x128xf32>
    %538 = arith.addf %535, %537 : vector<8x128xf32>
    %c0_200 = arith.constant 0 : index
    %c0_201 = arith.constant 0 : index
    %539 = vector.load %arg45[%c0_200, %c0_201] : memref<1x128xf32, #tpu.memory_space<vmem>>, vector<1x128xf32>
    %c0_202 = arith.constant 0 : index
    %c0_203 = arith.constant 0 : index
    %540 = vector.load %arg46[%c0_202, %c0_203] : memref<1x128xf32, #tpu.memory_space<vmem>>, vector<1x128xf32>
    %cst_204 = arith.constant dense<0.000000e+00> : vector<8xf32>
    %541 = vector.multi_reduction <add>, %538, %cst_204 [1] : vector<8x128xf32> to vector<8xf32>
    %542 = vector.shape_cast %541 : vector<8xf32> to vector<8x1xf32>
    %cst_205 = arith.constant 1.280000e+02 : f32
    %543 = vector.broadcast %cst_205 : f32 to vector<8x1xf32>
    %544 = arith.divf %542, %543 : vector<8x1xf32>
    %545 = vector.broadcast %544 : vector<8x1xf32> to vector<8x128xf32>
    %546 = arith.subf %538, %545 : vector<8x128xf32>
    %547 = arith.mulf %546, %546 : vector<8x128xf32>
    %cst_206 = arith.constant dense<0.000000e+00> : vector<8xf32>
    %548 = vector.multi_reduction <add>, %547, %cst_206 [1] : vector<8x128xf32> to vector<8xf32>
    %549 = vector.shape_cast %548 : vector<8xf32> to vector<8x1xf32>
    %cst_207 = arith.constant 1.280000e+02 : f32
    %550 = vector.broadcast %cst_207 : f32 to vector<8x1xf32>
    %551 = arith.divf %549, %550 : vector<8x1xf32>
    %552 = vector.broadcast %544 : vector<8x1xf32> to vector<8x128xf32>
    %553 = arith.subf %538, %552 : vector<8x128xf32>
    %cst_208 = arith.constant 9.99999974E-6 : f32
    %554 = vector.broadcast %cst_208 : f32 to vector<8x1xf32>
    %555 = arith.addf %551, %554 : vector<8x1xf32>
    %556 = math.rsqrt %555 : vector<8x1xf32>
    %557 = vector.broadcast %556 : vector<8x1xf32> to vector<8x128xf32>
    %558 = arith.mulf %553, %557 : vector<8x128xf32>
    %559 = vector.broadcast %539 : vector<1x128xf32> to vector<8x128xf32>
    %560 = arith.mulf %558, %559 : vector<8x128xf32>
    %561 = vector.broadcast %540 : vector<1x128xf32> to vector<8x128xf32>
    %562 = arith.addf %560, %561 : vector<8x128xf32>
    %563 = arith.truncf %562 : vector<8x128xf32> to vector<8x128xbf16>
    %c0_209 = arith.constant 0 : index
    %c0_210 = arith.constant 0 : index
    %564 = vector.load %arg47[%c0_209, %c0_210] : memref<256x128xbf16, #tpu.memory_space<vmem>>, vector<256x128xbf16>
    %cst_211 = arith.constant dense<0.000000e+00> : vector<8x256xf32>
    %565 = tpu.matmul %563, %564, %cst_211 {dimension_numbers = #tpu.dot_dimension_numbers<[1], [1], [0], [0], [0, 0, 1, 0], [], []>} : vector<8x128xbf16>, vector<256x128xbf16>, vector<8x256xf32> -> vector<8x256xf32>
    %c0_212 = arith.constant 0 : index
    %c0_213 = arith.constant 0 : index
    %566 = vector.load %arg48[%c0_212, %c0_213] : memref<1x256xf32, #tpu.memory_space<vmem>>, vector<1x256xf32>
    %567 = vector.broadcast %566 : vector<1x256xf32> to vector<8x256xf32>
    %568 = arith.addf %565, %567 : vector<8x256xf32>
    %c0_214 = arith.constant 0 : index
    %c0_215 = arith.constant 0 : index
    %c0_216 = arith.constant 0 : index
    %569 = vector.load %arg49[%c0_214, %c0_215, %c0_216] : memref<1x8x256xf32, #tpu.memory_space<vmem>>, vector<1x8x256xf32>
    %570 = vector.shape_cast %569 : vector<1x8x256xf32> to vector<8x256xf32>
    %571 = vector.shape_cast %568 : vector<8x256xf32> to vector<1x8x256xf32>
    tpu.vector_store %arg49[%c0_214, %c0_215, %c0_216], %571 {strides = array<i32>} : memref<1x8x256xf32, #tpu.memory_space<vmem>>, vector<1x8x256xf32>,
    %cst_217 = arith.constant dense<0xFF800000> : vector<8xf32>
    %572 = vector.multi_reduction <maximumf>, %568, %cst_217 [1] : vector<8x256xf32> to vector<8xf32>
    %573 = vector.shape_cast %572 : vector<8xf32> to vector<8x1xf32>
    %574 = vector.broadcast %573 : vector<8x1xf32> to vector<8x256xf32>
    %575 = arith.subf %568, %574 : vector<8x256xf32>
    %576 = math.exp %575 : vector<8x256xf32>
    %cst_218 = arith.constant dense<0.000000e+00> : vector<8xf32>
    %577 = vector.multi_reduction <add>, %576, %cst_218 [1] : vector<8x256xf32> to vector<8xf32>
    %578 = vector.shape_cast %577 : vector<8xf32> to vector<8x1xf32>
    %579 = math.log %578 : vector<8x1xf32>
    %580 = arith.addf %579, %573 : vector<8x1xf32>
    %c0_219 = arith.constant 0 : index
    %c0_220 = arith.constant 0 : index
    %c0_221 = arith.constant 0 : index
    %581 = vector.load %arg4[%c0_219, %c0_220, %c0_221] : memref<1x8x1xi32, #tpu.memory_space<vmem>>, vector<1x8x1xi32>
    %582 = vector.shape_cast %581 : vector<1x8x1xi32> to vector<8x1xi32>
    %583 = tpu.iota {dimensions = array<i32: 1>} : vector<8x256xi32>
    %584 = vector.broadcast %582 : vector<8x1xi32> to vector<8x256xi32>
    %585 = arith.cmpi eq, %583, %584 : vector<8x256xi32>
    %cst_222 = arith.constant 0.000000e+00 : f32
    %586 = vector.broadcast %cst_222 : f32 to vector<8x256xf32>
    %587 = arith.select %585, %568, %586 : vector<8x256xi1>, vector<8x256xf32>
    %cst_223 = arith.constant dense<0.000000e+00> : vector<8xf32>
    %588 = vector.multi_reduction <add>, %587, %cst_223 [1] : vector<8x256xf32> to vector<8xf32>
    %589 = vector.shape_cast %588 : vector<8xf32> to vector<8x1xf32>
    %c-100_i32 = arith.constant -100 : i32
    %590 = vector.broadcast %c-100_i32 : i32 to vector<8x1xi32>
    %591 = arith.cmpi ne, %582, %590 : vector<8x1xi32>
    %592 = arith.extui %591 : vector<8x1xi1> to vector<8x1xi32>
    %593 = arith.sitofp %592 : vector<8x1xi32> to vector<8x1xf32>
    %594 = arith.subf %580, %589 : vector<8x1xf32>
    %595 = arith.mulf %593, %594 : vector<8x1xf32>
    %596 = vector.shape_cast %595 : vector<8x1xf32> to vector<1x8x1xf32>
    %cst_224 = arith.constant dense<0.000000e+00> : vector<1xf32>
    %597 = vector.multi_reduction <add>, %596, %cst_224 [1, 2] : vector<1x8x1xf32> to vector<1xf32>
    %598 = vector.shape_cast %597 : vector<1xf32> to vector<1x1x1xf32>
    %599 = vector.extract %598[0, 0, 0] : f32 from vector<1x1x1xf32>
    %600 = vector.broadcast %599 : f32 to vector<1x1xf32>
    %601 = vector.shape_cast %593 : vector<8x1xf32> to vector<1x8x1xf32>
    %cst_225 = arith.constant dense<0.000000e+00> : vector<1xf32>
    %602 = vector.multi_reduction <add>, %601, %cst_225 [1, 2] : vector<1x8x1xf32> to vector<1xf32>
    %603 = vector.shape_cast %602 : vector<1xf32> to vector<1x1x1xf32>
    %604 = vector.extract %603[0, 0, 0] : f32 from vector<1x1x1xf32>
    %605 = vector.broadcast %604 : f32 to vector<1x1xf32>
    %606 = tpu.iota {dimensions = array<i32: 1>} : vector<1x128xi32>
    %c0_i32 = arith.constant 0 : i32
    %607 = vector.broadcast %c0_i32 : i32 to vector<1x128xi32>
    %608 = arith.cmpi eq, %606, %607 : vector<1x128xi32>
    %cst_226 = arith.constant 0.000000e+00 : f32
    %609 = vector.shape_cast %600 : vector<1x1xf32> to vector<1x1xf32>
    %610 = vector.broadcast %609 : vector<1x1xf32> to vector<1x128xf32>
    %611 = vector.broadcast %cst_226 : f32 to vector<1x128xf32>
    %612 = arith.select %608, %610, %611 : vector<1x128xi1>, vector<1x128xf32>
    %c1_i32 = arith.constant 1 : i32
    %613 = vector.broadcast %c1_i32 : i32 to vector<1x128xi32>
    %614 = arith.cmpi eq, %606, %613 : vector<1x128xi32>
    %cst_227 = arith.constant 0.000000e+00 : f32
    %615 = vector.shape_cast %605 : vector<1x1xf32> to vector<1x1xf32>
    %616 = vector.broadcast %615 : vector<1x1xf32> to vector<1x128xf32>
    %617 = vector.broadcast %cst_227 : f32 to vector<1x128xf32>
    %618 = arith.select %614, %616, %617 : vector<1x128xi1>, vector<1x128xf32>
    %619 = arith.addf %612, %618 : vector<1x128xf32>
    %c0_228 = arith.constant 0 : index
    %c0_229 = arith.constant 0 : index
    %c0_230 = arith.constant 0 : index
    %620 = vector.load %arg50[%c0_228, %c0_229, %c0_230] : memref<1x1x128xf32, #tpu.memory_space<vmem>>, vector<1x1x128xf32>
    %621 = vector.shape_cast %620 : vector<1x1x128xf32> to vector<1x128xf32>
    %622 = vector.shape_cast %619 : vector<1x128xf32> to vector<1x1x128xf32>
    tpu.vector_store %arg50[%c0_228, %c0_229, %c0_230], %622 {strides = array<i32>} : memref<1x1x128xf32, #tpu.memory_space<vmem>>, vector<1x1x128xf32>,
    return
  }
  func.func @transform_0(%arg0: i32) -> (i32, i32, i32) {
    %c0_i32 = arith.constant 0 : i32
    %c0_i32_0 = arith.constant 0 : i32
    %c0_i32_1 = arith.constant 0 : i32
    return %arg0, %c0_i32, %c0_i32_0 : i32, i32, i32
  }
  func.func @transform_1(%arg0: i32) -> (i32, i32, i32) {
    %c0_i32 = arith.constant 0 : i32
    %c0_i32_0 = arith.constant 0 : i32
    %c0_i32_1 = arith.constant 0 : i32
    return %arg0, %c0_i32, %c0_i32_0 : i32, i32, i32
  }
  func.func @transform_2(%arg0: i32) -> (i32, i32, i32) {
    %c0_i32 = arith.constant 0 : i32
    %c0_i32_0 = arith.constant 0 : i32
    %c0_i32_1 = arith.constant 0 : i32
    return %arg0, %c0_i32, %c0_i32_0 : i32, i32, i32
  }
  func.func @transform_3(%arg0: i32) -> (i32, i32, i32) {
    %c0_i32 = arith.constant 0 : i32
    %c0_i32_0 = arith.constant 0 : i32
    %c0_i32_1 = arith.constant 0 : i32
    return %arg0, %c0_i32, %c0_i32_0 : i32, i32, i32
  }
  func.func @transform_4(%arg0: i32) -> (i32, i32) {
    %c0_i32 = arith.constant 0 : i32
    %c0_i32_0 = arith.constant 0 : i32
    %c0_i32_1 = arith.constant 0 : i32
    return %c0_i32, %c0_i32_0 : i32, i32
  }
  func.func @transform_5(%arg0: i32) -> (i32, i32) {
    %c0_i32 = arith.constant 0 : i32
    %c0_i32_0 = arith.constant 0 : i32
    %c0_i32_1 = arith.constant 0 : i32
    return %c0_i32, %c0_i32_0 : i32, i32
  }
  func.func @transform_6(%arg0: i32) -> (i32, i32) {
    %c0_i32 = arith.constant 0 : i32
    %c0_i32_0 = arith.constant 0 : i32
    %c0_i32_1 = arith.constant 0 : i32
    return %c0_i32, %c0_i32_0 : i32, i32
  }
  func.func @transform_7(%arg0: i32) -> (i32, i32) {
    %c0_i32 = arith.constant 0 : i32
    %c0_i32_0 = arith.constant 0 : i32
    %c0_i32_1 = arith.constant 0 : i32
    return %c0_i32, %c0_i32_0 : i32, i32
  }
  func.func @transform_8(%arg0: i32) -> (i32, i32) {
    %c0_i32 = arith.constant 0 : i32
    %c0_i32_0 = arith.constant 0 : i32
    %c0_i32_1 = arith.constant 0 : i32
    return %c0_i32, %c0_i32_0 : i32, i32
  }
  func.func @transform_9(%arg0: i32) -> (i32, i32) {
    %c0_i32 = arith.constant 0 : i32
    %c0_i32_0 = arith.constant 0 : i32
    %c0_i32_1 = arith.constant 0 : i32
    return %c0_i32, %c0_i32_0 : i32, i32
  }
  func.func @transform_10(%arg0: i32) -> (i32, i32) {
    %c0_i32 = arith.constant 0 : i32
    %c0_i32_0 = arith.constant 0 : i32
    %c0_i32_1 = arith.constant 0 : i32
    return %c0_i32, %c0_i32_0 : i32, i32
  }
  func.func @transform_11(%arg0: i32) -> (i32, i32) {
    %c0_i32 = arith.constant 0 : i32
    %c0_i32_0 = arith.constant 0 : i32
    %c0_i32_1 = arith.constant 0 : i32
    return %c0_i32, %c0_i32_0 : i32, i32
  }
  func.func @transform_12(%arg0: i32) -> (i32, i32) {
    %c0_i32 = arith.constant 0 : i32
    %c0_i32_0 = arith.constant 0 : i32
    %c0_i32_1 = arith.constant 0 : i32
    return %c0_i32, %c0_i32_0 : i32, i32
  }
  func.func @transform_13(%arg0: i32) -> (i32, i32) {
    %c0_i32 = arith.constant 0 : i32
    %c0_i32_0 = arith.constant 0 : i32
    %c0_i32_1 = arith.constant 0 : i32
    return %c0_i32, %c0_i32_0 : i32, i32
  }
  func.func @transform_14(%arg0: i32) -> (i32, i32) {
    %c0_i32 = arith.constant 0 : i32
    %c0_i32_0 = arith.constant 0 : i32
    %c0_i32_1 = arith.constant 0 : i32
    return %c0_i32, %c0_i32_0 : i32, i32
  }
  func.func @transform_15(%arg0: i32) -> (i32, i32) {
    %c0_i32 = arith.constant 0 : i32
    %c0_i32_0 = arith.constant 0 : i32
    %c0_i32_1 = arith.constant 0 : i32
    return %c0_i32, %c0_i32_0 : i32, i32
  }
  func.func @transform_16(%arg0: i32) -> (i32, i32) {
    %c0_i32 = arith.constant 0 : i32
    %c0_i32_0 = arith.constant 0 : i32
    %c0_i32_1 = arith.constant 0 : i32
    return %c0_i32, %c0_i32_0 : i32, i32
  }
  func.func @transform_17(%arg0: i32) -> (i32, i32) {
    %c0_i32 = arith.constant 0 : i32
    %c0_i32_0 = arith.constant 0 : i32
    %c0_i32_1 = arith.constant 0 : i32
    return %c0_i32, %c0_i32_0 : i32, i32
  }
  func.func @transform_18(%arg0: i32) -> (i32, i32) {
    %c0_i32 = arith.constant 0 : i32
    %c0_i32_0 = arith.constant 0 : i32
    %c0_i32_1 = arith.constant 0 : i32
    return %c0_i32, %c0_i32_0 : i32, i32
  }
  func.func @transform_19(%arg0: i32) -> (i32, i32) {
    %c0_i32 = arith.constant 0 : i32
    %c0_i32_0 = arith.constant 0 : i32
    %c0_i32_1 = arith.constant 0 : i32
    return %c0_i32, %c0_i32_0 : i32, i32
  }
  func.func @transform_20(%arg0: i32) -> (i32, i32) {
    %c0_i32 = arith.constant 0 : i32
    %c0_i32_0 = arith.constant 0 : i32
    %c0_i32_1 = arith.constant 0 : i32
    return %c0_i32, %c0_i32_0 : i32, i32
  }
  func.func @transform_21(%arg0: i32) -> (i32, i32) {
    %c0_i32 = arith.constant 0 : i32
    %c0_i32_0 = arith.constant 0 : i32
    %c0_i32_1 = arith.constant 0 : i32
    return %c0_i32, %c0_i32_0 : i32, i32
  }
  func.func @transform_22(%arg0: i32) -> (i32, i32) {
    %c0_i32 = arith.constant 0 : i32
    %c0_i32_0 = arith.constant 0 : i32
    %c0_i32_1 = arith.constant 0 : i32
    return %c0_i32, %c0_i32_0 : i32, i32
  }
  func.func @transform_23(%arg0: i32) -> (i32, i32) {
    %c0_i32 = arith.constant 0 : i32
    %c0_i32_0 = arith.constant 0 : i32
    %c0_i32_1 = arith.constant 0 : i32
    return %c0_i32, %c0_i32_0 : i32, i32
  }
  func.func @transform_24(%arg0: i32) -> (i32, i32) {
    %c0_i32 = arith.constant 0 : i32
    %c0_i32_0 = arith.constant 0 : i32
    %c0_i32_1 = arith.constant 0 : i32
    return %c0_i32, %c0_i32_0 : i32, i32
  }
  func.func @transform_25(%arg0: i32) -> (i32, i32) {
    %c0_i32 = arith.constant 0 : i32
    %c0_i32_0 = arith.constant 0 : i32
    %c0_i32_1 = arith.constant 0 : i32
    return %c0_i32, %c0_i32_0 : i32, i32
  }
  func.func @transform_26(%arg0: i32) -> (i32, i32) {
    %c0_i32 = arith.constant 0 : i32
    %c0_i32_0 = arith.constant 0 : i32
    %c0_i32_1 = arith.constant 0 : i32
    return %c0_i32, %c0_i32_0 : i32, i32
  }
  func.func @transform_27(%arg0: i32) -> (i32, i32) {
    %c0_i32 = arith.constant 0 : i32
    %c0_i32_0 = arith.constant 0 : i32
    %c0_i32_1 = arith.constant 0 : i32
    return %c0_i32, %c0_i32_0 : i32, i32
  }
  func.func @transform_28(%arg0: i32) -> (i32, i32) {
    %c0_i32 = arith.constant 0 : i32
    %c0_i32_0 = arith.constant 0 : i32
    %c0_i32_1 = arith.constant 0 : i32
    return %c0_i32, %c0_i32_0 : i32, i32
  }
  func.func @transform_29(%arg0: i32) -> (i32, i32) {
    %c0_i32 = arith.constant 0 : i32
    %c0_i32_0 = arith.constant 0 : i32
    %c0_i32_1 = arith.constant 0 : i32
    return %c0_i32, %c0_i32_0 : i32, i32
  }
  func.func @transform_30(%arg0: i32) -> (i32, i32) {
    %c0_i32 = arith.constant 0 : i32
    %c0_i32_0 = arith.constant 0 : i32
    %c0_i32_1 = arith.constant 0 : i32
    return %c0_i32, %c0_i32_0 : i32, i32
  }
  func.func @transform_31(%arg0: i32) -> (i32, i32) {
    %c0_i32 = arith.constant 0 : i32
    %c0_i32_0 = arith.constant 0 : i32
    %c0_i32_1 = arith.constant 0 : i32
    return %c0_i32, %c0_i32_0 : i32, i32
  }
  func.func @transform_32(%arg0: i32) -> (i32, i32) {
    %c0_i32 = arith.constant 0 : i32
    %c0_i32_0 = arith.constant 0 : i32
    %c0_i32_1 = arith.constant 0 : i32
    return %c0_i32, %c0_i32_0 : i32, i32
  }
  func.func @transform_33(%arg0: i32) -> (i32, i32) {
    %c0_i32 = arith.constant 0 : i32
    %c0_i32_0 = arith.constant 0 : i32
    %c0_i32_1 = arith.constant 0 : i32
    return %c0_i32, %c0_i32_0 : i32, i32
  }
  func.func @transform_34(%arg0: i32) -> (i32, i32) {
    %c0_i32 = arith.constant 0 : i32
    %c0_i32_0 = arith.constant 0 : i32
    %c0_i32_1 = arith.constant 0 : i32
    return %c0_i32, %c0_i32_0 : i32, i32
  }
  func.func @transform_35(%arg0: i32) -> (i32, i32) {
    %c0_i32 = arith.constant 0 : i32
    %c0_i32_0 = arith.constant 0 : i32
    %c0_i32_1 = arith.constant 0 : i32
    return %c0_i32, %c0_i32_0 : i32, i32
  }
  func.func @transform_36(%arg0: i32) -> (i32, i32) {
    %c0_i32 = arith.constant 0 : i32
    %c0_i32_0 = arith.constant 0 : i32
    %c0_i32_1 = arith.constant 0 : i32
    return %c0_i32, %c0_i32_0 : i32, i32
  }
  func.func @transform_37(%arg0: i32) -> (i32, i32) {
    %c0_i32 = arith.constant 0 : i32
    %c0_i32_0 = arith.constant 0 : i32
    %c0_i32_1 = arith.constant 0 : i32
    return %c0_i32, %c0_i32_0 : i32, i32
  }
  func.func @transform_38(%arg0: i32) -> (i32, i32) {
    %c0_i32 = arith.constant 0 : i32
    %c0_i32_0 = arith.constant 0 : i32
    %c0_i32_1 = arith.constant 0 : i32
    return %c0_i32, %c0_i32_0 : i32, i32
  }
  func.func @transform_39(%arg0: i32) -> (i32, i32) {
    %c0_i32 = arith.constant 0 : i32
    %c0_i32_0 = arith.constant 0 : i32
    %c0_i32_1 = arith.constant 0 : i32
    return %c0_i32, %c0_i32_0 : i32, i32
  }
  func.func @transform_40(%arg0: i32) -> (i32, i32) {
    %c0_i32 = arith.constant 0 : i32
    %c0_i32_0 = arith.constant 0 : i32
    %c0_i32_1 = arith.constant 0 : i32
    return %c0_i32, %c0_i32_0 : i32, i32
  }
  func.func @transform_41(%arg0: i32) -> (i32, i32) {
    %c0_i32 = arith.constant 0 : i32
    %c0_i32_0 = arith.constant 0 : i32
    %c0_i32_1 = arith.constant 0 : i32
    return %c0_i32, %c0_i32_0 : i32, i32
  }
  func.func @transform_42(%arg0: i32) -> (i32, i32) {
    %c0_i32 = arith.constant 0 : i32
    %c0_i32_0 = arith.constant 0 : i32
    %c0_i32_1 = arith.constant 0 : i32
    return %c0_i32, %c0_i32_0 : i32, i32
  }
  func.func @transform_43(%arg0: i32) -> (i32, i32) {
    %c0_i32 = arith.constant 0 : i32
    %c0_i32_0 = arith.constant 0 : i32
    %c0_i32_1 = arith.constant 0 : i32
    return %c0_i32, %c0_i32_0 : i32, i32
  }
  func.func @transform_44(%arg0: i32) -> (i32, i32) {
    %c0_i32 = arith.constant 0 : i32
    %c0_i32_0 = arith.constant 0 : i32
    %c0_i32_1 = arith.constant 0 : i32
    return %c0_i32, %c0_i32_0 : i32, i32
  }
  func.func @transform_45(%arg0: i32) -> (i32, i32) {
    %c0_i32 = arith.constant 0 : i32
    %c0_i32_0 = arith.constant 0 : i32
    %c0_i32_1 = arith.constant 0 : i32
    return %c0_i32, %c0_i32_0 : i32, i32
  }
  func.func @transform_46(%arg0: i32) -> (i32, i32) {
    %c0_i32 = arith.constant 0 : i32
    %c0_i32_0 = arith.constant 0 : i32
    %c0_i32_1 = arith.constant 0 : i32
    return %c0_i32, %c0_i32_0 : i32, i32
  }
  func.func @transform_47(%arg0: i32) -> (i32, i32) {
    %c0_i32 = arith.constant 0 : i32
    %c0_i32_0 = arith.constant 0 : i32
    %c0_i32_1 = arith.constant 0 : i32
    return %c0_i32, %c0_i32_0 : i32, i32
  }
  func.func @transform_48(%arg0: i32) -> (i32, i32, i32) {
    %c0_i32 = arith.constant 0 : i32
    %c0_i32_0 = arith.constant 0 : i32
    %c0_i32_1 = arith.constant 0 : i32
    return %arg0, %c0_i32, %c0_i32_0 : i32, i32, i32
  }
  func.func @transform_49(%arg0: i32) -> (i32, i32, i32) {
    %c0_i32 = arith.constant 0 : i32
    %c0_i32_0 = arith.constant 0 : i32
    %c0_i32_1 = arith.constant 0 : i32
    return %arg0, %c0_i32, %c0_i32_0 : i32, i32, i32
  }
}

</mosaic_0001>

<bundles_post_ra>
// kernel: mbart_summarizer_forward.1
= control target key start
LH: loop header
LB: loop body
LE: loop exit
PB: predicated region body
PF: predicated region fallthrough
CT: control target
= control target key end

     0   :  { %s6675_s6 = smov 1   ;;  %s6676_s10 = smov 2   ;;  %s7822_s0 = inlined_call_operand.smem [shape: u32[50], index: -1, kind: input, shape index: {}] }
   0x1   :  { %s6756_s5 = sld [smem:[%s7822_s0]]   ;;  %s6677_s14 = smov 3  }
   0x2   :  { %s6761_s9 = sld [smem:[%s7822_s0 + %s6675_s6]]   ;;  %s6678_s18 = smov 4  }
   0x3   :  { %s6766_s13 = sld [smem:[%s7822_s0 + %s6676_s10]]   ;;  %s6679_s22 = smov 5  }
   0x4   :  { %s6771_s17 = sld [smem:[%s7822_s0 + %s6677_s14]]   ;;  %s6680_s26 = smov 6  }
   0x5   :  { %s6776_s21 = sld [smem:[%s7822_s0 + %s6678_s18]]   ;;  %s6681_s30 = smov 7  }
   0x6   :  { %s6781_s25 = sld [smem:[%s7822_s0 + %s6679_s22]]   ;;  %s6682_s4 = smov 8  }
   0x7   :  { %7854 = sst [smem:[#allocation36_spill]] %s6756_s5  ;;  %s6683_s10 = smov 9  }
   0x8   :  { %7855 = sst [smem:[#allocation37_spill]] %s6761_s9  ;;  %s6684_s15 = smov 10  }
   0x9   :  { %7856 = sst [smem:[#allocation38_spill]] %s6766_s13  ;;  %s6685_s20 = smov 11  }
   0xa   :  { %7857 = sst [smem:[#allocation39_spill]] %s6771_s17  ;;  %s6687_s1 = smov 13  }
   0xb   :  { %7858 = sst [smem:[#allocation40_spill]] %s6776_s21  ;;  %s6688_s7 = smov 14  }
   0xc   :  { %7859 = sst [smem:[#allocation41_spill]] %s6781_s25  ;;  %s6690_s22 = smov 16  }
   0xd   :  { %s6786_s29 = sld [smem:[%s7822_s0 + %s6680_s26]]   ;;  %s6686_s26 = smov 12  }
   0xe   :  { %s6791_s3 = sld [smem:[%s7822_s0 + %s6681_s30]]   ;;  %s6691_s28 = smov 17  }
   0xf   :  { %s6796_s8 = sld [smem:[%s7822_s0 + %s6682_s4]]  }
  0x10   :  { %s6801_s14 = sld [smem:[%s7822_s0 + %s6683_s10]]  }
  0x11   :  { %s6806_s19 = sld [smem:[%s7822_s0 + %s6684_s15]]   ;;  %s6689_s15 = smov 15  }
  0x12   :  { %s6811_s24 = sld [smem:[%s7822_s0 + %s6685_s20]]  }
  0x13   :  { %7860 = sst [smem:[#allocation42_spill]] %s6786_s29 }
  0x14   :  { %7861 = sst [smem:[#allocation43_spill]] %s6791_s3 }
  0x15   :  { %7862 = sst [smem:[#allocation44_spill]] %s6796_s8 }
  0x16   :  { %7863 = sst [smem:[#allocation45_spill]] %s6801_s14 }
  0x17   :  { %7864 = sst [smem:[#allocation46_spill]] %s6806_s19 }
  0x18   :  { %7865 = sst [smem:[#allocation47_spill]] %s6811_s24 }
  0x19   :  { %s6816_s30 = sld [smem:[%s7822_s0 + %s6686_s26]]  }
  0x1a   :  { %s6821_s6 = sld [smem:[%s7822_s0 + %s6687_s1]]  }
  0x1b   :  { %s6826_s12 = sld [smem:[%s7822_s0 + %s6688_s7]]   ;;  %s6692_s7 = smov 18  }
  0x1c   :  { %s6831_s20 = sld [smem:[%s7822_s0 + %s6689_s15]]   ;;  %s6693_s15 = smov 19  }
  0x1d   :  { %s6836_s27 = sld [smem:[%s7822_s0 + %s6690_s22]]   ;;  %s6694_s22 = smov 20  }
  0x1e   :  { %s6841_s4 = sld [smem:[%s7822_s0 + %s6691_s28]]   ;;  %s6695_s28 = smov 21  }
  0x1f   :  { %7866 = sst [smem:[#allocation48_spill]] %s6816_s30 }
  0x20   :  { %7867 = sst [smem:[#allocation49_spill]] %s6821_s6 }
  0x21   :  { %7868 = sst [smem:[#allocation50_spill]] %s6826_s12 }
  0x22   :  { %7869 = sst [smem:[#allocation51_spill]] %s6831_s20 }
  0x23   :  { %7870 = sst [smem:[#allocation52_spill]] %s6836_s27 }
  0x24   :  { %7871 = sst [smem:[#allocation53_spill]] %s6841_s4 }
  0x25   :  { %s6846_s17 = sld [smem:[%s7822_s0 + %s6692_s7]]   ;;  %s6696_s7 = smov 22  }
  0x26   :  { %s6851_s20 = sld [smem:[%s7822_s0 + %s6693_s15]]   ;;  %s6697_s15 = smov 23  }
  0x27   :  { %s6856_s12 = sld [smem:[%s7822_s0 + %s6694_s22]]   ;;  %s6698_s22 = smov 24  }
  0x28   :  { %s6861_s4 = sld [smem:[%s7822_s0 + %s6695_s28]]   ;;  %s6699_s28 = smov 25  }
  0x2b   :  { %7872 = sst [smem:[#allocation54_spill]] %s6846_s17 }
  0x2c   :  { %7873 = sst [smem:[#allocation55_spill]] %s6851_s20 }
  0x2d   :  { %7874 = sst [smem:[#allocation56_spill]] %s6856_s12 }
  0x2e   :  { %7875 = sst [smem:[#allocation57_spill]] %s6861_s4 }
  0x2f   :  { %s6866_s17 = sld [smem:[%s7822_s0 + %s6696_s7]]   ;;  %s6700_s7 = smov 26  }
  0x30   :  { %s6871_s20 = sld [smem:[%s7822_s0 + %s6697_s15]]   ;;  %s6701_s15 = smov 27  }
  0x31   :  { %s6876_s12 = sld [smem:[%s7822_s0 + %s6698_s22]]   ;;  %s6702_s22 = smov 28  }
  0x32   :  { %s6881_s4 = sld [smem:[%s7822_s0 + %s6699_s28]]   ;;  %s6703_s28 = smov 29  }
  0x33   :  { %s6886_s27 = sld [smem:[%s7822_s0 + %s6700_s7]]   ;;  %s6704_s7 = smov 30  }
  0x34   :  { %s6891_s6 = sld [smem:[%s7822_s0 + %s6701_s15]]   ;;  %s6705_s15 = smov 31  }
  0x35   :  { %7876 = sst [smem:[#allocation58_spill]] %s6866_s17 }
  0x36   :  { %7877 = sst [smem:[#allocation59_spill]] %s6871_s20 }
  0x37   :  { %7878 = sst [smem:[#allocation60_spill]] %s6876_s12 }
  0x38   :  { %7879 = sst [smem:[#allocation61_spill]] %s6881_s4 }
  0x39   :  { %7880 = sst [smem:[#allocation62_spill]] %s6886_s27 }
  0x3a   :  { %7881 = sst [smem:[#allocation63_spill]] %s6891_s6 }
  0x3b   :  { %s6896_s20 = sld [smem:[%s7822_s0 + %s6702_s22]]   ;;  %s6706_s22 = smov 32  }
  0x3c   :  { %s6901_s17 = sld [smem:[%s7822_s0 + %s6703_s28]]   ;;  %s6707_s28 = smov 33  }
  0x3d   :  { %s6906_s27 = sld [smem:[%s7822_s0 + %s6704_s7]]   ;;  %s6708_s7 = smov 34  }
  0x3e   :  { %s6911_s30 = sld [smem:[%s7822_s0 + %s6705_s15]]   ;;  %s6709_s15 = smov 35  }
  0x3f   :  { %s6921_s25 = sld [smem:[%s7822_s0 + %s6707_s28]]   ;;  %s6711_s28 = smov 37  }
  0x40   :  { %s6926_s9 = sld [smem:[%s7822_s0 + %s6708_s7]]   ;;  %s6712_s7 = smov 38  }
  0x41   :  { %7882 = sst [smem:[#allocation64_spill]] %s6896_s20 }
  0x42   :  { %s6916_s20 = sld [smem:[%s7822_s0 + %s6706_s22]]   ;;  %s6710_s22 = smov 36  }
  0x43   :  { %s6931_s13 = sld [smem:[%s7822_s0 + %s6709_s15]]   ;;  %s6713_s15 = smov 39  }
  0x44   :  { %s6936_s24 = sld [smem:[%s7822_s0 + %s6710_s22]]   ;;  %s6714_s22 = smov 40  }
  0x45   :  { %s6941_s14 = sld [smem:[%s7822_s0 + %s6711_s28]]   ;;  %s6715_s28 = smov 41  }
  0x46   :  { %7883 = sst [smem:[#allocation65_spill]] %s6926_s9 }
  0x47   :  { %s6946_s9 = sld [smem:[%s7822_s0 + %s6712_s7]]   ;;  %s6716_s7 = smov 42  }
  0x48   :  { %s6951_s8 = sld [smem:[%s7822_s0 + %s6713_s15]]   ;;  %s6717_s15 = smov 43  }
  0x49   :  { %s6956_s19 = sld [smem:[%s7822_s0 + %s6714_s22]]   ;;  %s6718_s22 = smov 44  }
  0x4a   :  { %s6961_s3 = sld [smem:[%s7822_s0 + %s6715_s28]]   ;;  %s6719_s28 = smov 45  }
  0x4b   :  { %s6966_s29 = sld [smem:[%s7822_s0 + %s6716_s7]]   ;;  %s6720_s7 = smov 46  }
  0x4c   :  { %s6971_s21 = sld [smem:[%s7822_s0 + %s6717_s15]]   ;;  %s6721_s15 = smov 47  }
  0x4d   :  { %7884 = sst [smem:[#allocation66_spill]] %s6946_s9 }
  0x4e   :  { %7885 = sst [smem:[#allocation67_spill]] %s6951_s8 }
  0x4f   :  { %7886 = sst [smem:[#allocation68_spill]] %s6956_s19 }
  0x50   :  { %7887 = sst [smem:[#allocation69_spill]] %s6961_s3 }
  0x51   :  { %7888 = sst [smem:[#allocation70_spill]] %s6966_s29 }
  0x52   :  { %7889 = sst [smem:[#allocation71_spill]] %s6971_s21 }
  0x53   :  { %s6976_s19 = sld [smem:[%s7822_s0 + %s6718_s22]]   ;;  %s6722_s22 = smov 48  }
  0x54   :  { %s6981_s5 = sld [smem:[%s7822_s0 + %s6719_s28]]   ;;  %s6723_s28 = smov 49  }
  0x55   :  { %s6986_s29 = sld [smem:[%s7822_s0 + %s6720_s7]]  }
  0x56   :  { %s6991_s21 = sld [smem:[%s7822_s0 + %s6721_s15]]  }
  0x59   :  { %7890 = sst [smem:[#allocation72_spill]] %s6976_s19 }
  0x5a   :  { %7891 = sst [smem:[#allocation73_spill]] %s6981_s5 }
  0x5b   :  { %s6996_s19 = sld [smem:[%s7822_s0 + %s6722_s22]]  }
  0x5c   :  { %s7001_s5 = sld [smem:[%s7822_s0 + %s6723_s28]]  }
  0x61   :  { %7892 = sst [smem:[#allocation74_spill]] %s6996_s19 }
  0x62   :  { %7893 = sst [smem:[#allocation75_spill]] %s7001_s5 }
  0x63   :  { %105 = vsyncpa [#allocation3], 0 }
  0x64   :  { %106 = vsyncpa [#allocation6], 0 }
  0x65   :  { %107 = vsyncpa [#allocation9], 0 }
  0x66   :  { %108 = vsyncpa [#allocation12], 0 }
  0x67   :  { %109 = vsyncpa [#allocation15], 0 }
  0x68   :  { %110 = vsyncpa [#allocation18], 0 }
  0x69   :  { %111 = vsyncpa [#allocation21], 0 }
  0x6a   :  { %112 = vsyncpa [#allocation24], 0 }
  0x6b   :  { %113 = vsyncpa [#allocation4], 0 }
  0x6c   :  { %115 = vsyncpa [#allocation4 + $0x1], 0  ;;  %s7003_s7 = smov 0   ;;  %s7005_s10 = smov 0  }
  0x6d   :  { %s7007_s11 = smov 0   ;;  %s7009_s15 = smov 0  }
  0x6e LB: > { %s7894_s12 = sld [smem:[#allocation60_spill]]  ;;  %s7024_s0 = sadd.s32 4294967295, %s6673_s15   ;;  %s6665_s10 = sphi %s7005_s10, %s7959_s10   ;;  %s6661_s7 = sphi %s7003_s7, %s7958_s7   ;;  %s6673_s15 = sphi %s7009_s15, %s7955_s15   ;;  %s6669_s11 = sphi %s7007_s11, %s7957_s11  }
  0x6f   : > { %s7895_s9 = sld [smem:[#allocation66_spill]]  ;;  %s4821_s16 = sadd.s32 4294967294, %s6673_s15  }
  0x70   : > { %s7896_s8 = sld [smem:[#allocation67_spill]]  ;;  %s7028_s18 = sadd.s32 1, %s6673_s15  }
  0x71   : > { %s7897_s6 = sld [smem:[#allocation63_spill]]  ;;  %s1156_s22 = sadd.s32 1, %s6669_s11 }
  0x72   : > { %s7898_s3 = sld [smem:[#allocation69_spill]]  ;;  %s1153_s23 = ssub.s32 %s6673_s15, %s7028_s18 }
  0x73   : > { %s7899_s4 = sld [smem:[#allocation61_spill]]  ;;  %p1166_p0 = scmp.ne.s32.totalorder %s6669_s11, %s6665_s10 }
  0x74   : > { %7900 = sst [smem:[#allocation76_spill]] %s6661_s7  ;;  %p1154_p1 = scmp.eq.s32.totalorder %s1153_s23, 0 }
  0x75   : > { %7901 = sst [smem:[#allocation77_spill]] %s6669_s11  ;;  %p1167_p2 = scmp.eq.s32.totalorder %s7024_s0, 1 }
  0x76   : > { %7902 = sst [smem:[#allocation78_spill]] %s6673_s15  ;;  %p1172_p3 = scmp.ne.s32.totalorder %s6665_s10, %s6661_s7 }
  0x77   : > { %7903 = sst [smem:[#allocation79_spill]] %s7028_s18  ;;  %p1173_p4 = scmp.eq.s32.totalorder %s4821_s16, 1 }
  0x78   : > { %s7039_s26 = scalar_select %p1154_p1, %s6669_s11, %s1156_s22  }
  0x79   : > { %p7041_p5 = por %p1167_p2, %p1166_p0  ;;  %p7045_p6 = por %p1173_p4, %p1172_p3 }
  0x7a   : > { %7904 = sst [smem:[#allocation80_spill]] %s7039_s26  ;;  %p4822_p7 = scmp.ge.s32.totalorder %s6673_s15, 1 }
  0x7b   : > { %s7905_s28 = scalar_select %p7041_p5, 1, 0 }
  0x7c   : > { %s7907_s1 = scalar_select %p7045_p6, 1, 0 }
  0x7d   : > { %7906 = sst [smem:[#allocation81_spill]] %s7905_s28  ;;  %p1206_p8 = scmp.lt.s32.totalorder %s6673_s15, 3 }
  0x7e   : > { %7908 = sst [smem:[#allocation82_spill]] %s7907_s1  ;;  %p5886_p9 = scmp.eq.s32.totalorder %s7024_s0, 0 }
  0x7f   : > { %p7052_p10 = pnand %p4822_p7, %p1206_p8  ;;  %s1290_s16 = sshll.u32 %s7899_s4, 4  ;;  %s1291_s16 = int_to_ptr.hbm [resolvable:$true] %s1290_s16 }
  0x80   : > { %s6724_s22 = smov [#allocation5]   ;;  %s1320_s26 = sshll.u32 %s6901_s17, 4  ;;  %s7066_s26 = int_to_ptr.hbm [resolvable:$true] %s1320_s26 }
  0x81   : > { %p5836_p11 = pneg %p7052_p10  ;;  %s1292_s23 = sshll.u32 %s6724_s22, 4  ;;  %s1293_s23 = int_to_ptr.vmem [resolvable:$true] %s1292_s23 }
  0x82   : > { %s1344_s18 = sshll.u32 %s6911_s30, 4  ;;  %s6725_s1 = smov [#allocation8]   ;;  %s7084_s18 = int_to_ptr.hbm [resolvable:$true] %s1344_s18 }
  0x83   : > { %p7062_p12 = pnand %p5886_p9, %p5836_p11  ;;  %s7069_s7 = sshll.u32 %s6725_s1, 4  ;;  %s1323_s7 = int_to_ptr.vmem [resolvable:$true] %s7069_s7 }
  0x84   : > { %s6129_s15 = sshra.s32 %s1291_s16, 4  ;;  %s6136_s28 = scalar_lea.hbm %s7899_s4, 1  ;;  %s6130_s15 = int_to_ptr.hbm [resolvable:$true] %s6129_s15 }
  0x85   : > { %s6131_s5 = scalar_lea.hbm %s6130_s15, 1  ;;  %p7073_p0 = pneg %p7062_p12 }
  0x86   : > { %p6132_p13 = scmp.ne.s32.totalorder %s6130_s15, %s6131_s5  ;;  %p6137_p3 = scmp.lt.s32.totalorder %s6130_s15, %s7899_s4 }
  0x87   : > { %p6138_p4 = scmp.lt.s32.totalorder %s6136_s28, %s6131_s5 }
  0x88   : > { %p6134_p1 = pnand %p7073_p0, %p6132_p13 }
  0x89   : > { %p6139_p7 = por %p6138_p4, %p6137_p3 }
  0x8a   : > { %p6135_p2 = pneg %p6134_p1 }
  0x8c   : > { %p6140_p8 = pnand %p6139_p7, %p6135_p2 }
  0x8e   : > { %6143 = shalt.err (!%p6140_p8)
}
  0x8f   : > { %5842 = dma.hbm_to_vmem [thread:$0]  (!%p7062_p12), %s1291_s16, 16, %s1293_s23, [#allocation6]  }
  0x90   : > { %s6159_s1 = sshra.s32 %s7066_s26, 4  ;;  %s6166_s5 = scalar_lea.hbm %s6901_s17, 1  ;;  %s6160_s1 = int_to_ptr.hbm [resolvable:$true] %s6159_s1 }
  0x91   : > { %s6161_s19 = scalar_lea.hbm %s6160_s1, 1  ;;  %p6167_p2 = scmp.lt.s32.totalorder %s6160_s1, %s6901_s17 }
  0x92   : > { %p6162_p11 = scmp.ne.s32.totalorder %s6160_s1, %s6161_s19  ;;  %p6168_p3 = scmp.lt.s32.totalorder %s6166_s5, %s6161_s19 }
  0x94   : > { %p6164_p13 = pnand %p6162_p11, %p7073_p0  ;;  %p6169_p4 = por %p6168_p3, %p6167_p2 }
  0x96   : > { %p6165_p1 = pneg %p6164_p13 }
  0x98   : > { %p6170_p7 = pnand %p6169_p4, %p6165_p1 }
  0x9a   : > { %6173 = shalt.err (!%p6170_p7)
}
  0x9b   : > { %5848 = dma.hbm_to_vmem [thread:$0]  (!%p7062_p12), %s7066_s26, 16, %s1323_s7, [#allocation9]  }
  0x9c   : > { %s1370_s15 = sshll.u32 %s6921_s25, 4  ;;  %s6726_s28 = smov [#allocation11]   ;;  %s7095_s15 = int_to_ptr.hbm [resolvable:$true] %s1370_s15 }
  0x9d   : > { %s1346_s16 = sshll.u32 %s6726_s28, 4  ;;  %s6189_s23 = sshra.s32 %s7084_s18, 4  ;;  %s1347_s16 = int_to_ptr.vmem [resolvable:$true] %s1346_s16  ;;  %s6190_s23 = int_to_ptr.hbm [resolvable:$true] %s6189_s23 }
  0x9e   : > { %s6191_s19 = scalar_lea.hbm %s6190_s23, 1  ;;  %s6196_s1 = scalar_lea.hbm %s6911_s30, 1 }
  0x9f   : > { %p6192_p8 = scmp.ne.s32.totalorder %s6190_s23, %s6191_s19  ;;  %p6197_p1 = scmp.lt.s32.totalorder %s6190_s23, %s6911_s30 }
  0xa0   : > { %p6198_p2 = scmp.lt.s32.totalorder %s6196_s1, %s6191_s19 }
  0xa1   : > { %p6194_p11 = pnand %p6192_p8, %p7073_p0 }
  0xa2   : > { %p6199_p3 = por %p6198_p2, %p6197_p1 }
  0xa3   : > { %p6195_p13 = pneg %p6194_p11 }
  0xa5   : > { %p6200_p4 = pnand %p6199_p3, %p6195_p13 }
  0xa7   : > { %6203 = shalt.err (!%p6200_p4)
}
  0xa8   : > { %5854 = dma.hbm_to_vmem [thread:$0]  (!%p7062_p12), %s7084_s18, 16, %s1347_s16, [#allocation12]  }
  0xa9   : > { %s6727_s7 = smov [#allocation14]   ;;  %s6219_s5 = sshra.s32 %s7095_s15, 4  ;;  %s6220_s5 = int_to_ptr.hbm [resolvable:$true] %s6219_s5 }
  0xaa   : > { %s1372_s26 = sshll.u32 %s6727_s7, 4  ;;  %s6221_s28 = scalar_lea.hbm %s6220_s5, 1  ;;  %s1373_s26 = int_to_ptr.vmem [resolvable:$true] %s1372_s26 }
  0xab   : > { %p6222_p7 = scmp.ne.s32.totalorder %s6220_s5, %s6221_s28  ;;  %s6226_s23 = scalar_lea.hbm %s6921_s25, 1 }
  0xac   : > { %p6227_p13 = scmp.lt.s32.totalorder %s6220_s5, %s6921_s25  ;;  %p6228_p1 = scmp.lt.s32.totalorder %s6226_s23, %s6221_s28 }
  0xad   : > { %p6224_p8 = pnand %p6222_p7, %p7073_p0 }
  0xae   : > { %p6229_p2 = por %p6228_p1, %p6227_p13 }
  0xaf   : > { %p6225_p11 = pneg %p6224_p8 }
  0xb1   : > { %p6230_p3 = pnand %p6229_p2, %p6225_p11 }
  0xb3   : > { %6233 = shalt.err (!%p6230_p3)
}
  0xb4   : > { %5860 = dma.hbm_to_vmem [thread:$0]  (!%p7062_p12), %s7095_s15, 16, %s1373_s26, [#allocation15]  }
  0xb5   : > { %s1396_s18 = sshll.u32 %s6936_s24, 4  ;;  %s6728_s16 = smov [#allocation17]   ;;  %s1397_s18 = int_to_ptr.hbm [resolvable:$true] %s1396_s18 }
  0xb6   : > { %s1398_s19 = sshll.u32 %s6728_s16, 4  ;;  %s1423_s1 = sshll.u32 %s7895_s9, 4  ;;  %s1399_s19 = int_to_ptr.vmem [resolvable:$true] %s1398_s19  ;;  %s1424_s1 = int_to_ptr.hbm [resolvable:$true] %s1423_s1 }
  0xb7   : > { %s6249_s7 = sshra.s32 %s1397_s18, 4  ;;  %s6256_s28 = scalar_lea.hbm %s6936_s24, 64  ;;  %s6250_s7 = int_to_ptr.hbm [resolvable:$true] %s6249_s7 }
  0xb8   : > { %s6251_s5 = scalar_lea.hbm %s6250_s7, 64  ;;  %p6257_p11 = scmp.lt.s32.totalorder %s6250_s7, %s6936_s24 }
  0xb9   : > { %p6252_p4 = scmp.ne.s32.totalorder %s6250_s7, %s6251_s5  ;;  %p6258_p13 = scmp.lt.s32.totalorder %s6256_s28, %s6251_s5 }
  0xbb   : > { %p6254_p7 = pnand %p6252_p4, %p7073_p0  ;;  %p6259_p1 = por %p6258_p13, %p6257_p11 }
  0xbd   : > { %p6255_p8 = pneg %p6254_p7 }
  0xbf   : > { %p6260_p2 = pnand %p6259_p1, %p6255_p8 }
  0xc1   : > { %6263 = shalt.err (!%p6260_p2)
}
  0xc2   : > { %s7843_s15 = smov 64   ;;  %s6730_s26 = smov 4  }
  0xc3   : > { %5866 = dma.hbm_to_vmem [thread:$0]  (!%p7062_p12), %s1397_s18, 1024, %s1399_s19, [#allocation18], %s7843_s15, %s7843_s15, %s6730_s26  }
  0xc4   : > { %s6731_s23 = smov [#allocation20]   ;;  %s1450_s7 = sshll.u32 %s7898_s3, 4  ;;  %s7125_s7 = int_to_ptr.hbm [resolvable:$true] %s1450_s7 }
  0xc5   : > { %s1425_s16 = sshll.u32 %s6731_s23, 4  ;;  %s6279_s5 = sshra.s32 %s1424_s1, 4  ;;  %s1426_s16 = int_to_ptr.vmem [resolvable:$true] %s1425_s16  ;;  %s6280_s5 = int_to_ptr.hbm [resolvable:$true] %s6279_s5 }
  0xc6   : > { %s6281_s28 = scalar_lea.hbm %s6280_s5, 1  ;;  %s6286_s4 = scalar_lea.hbm %s7895_s9, 1 }
  0xc7   : > { %p6282_p3 = scmp.ne.s32.totalorder %s6280_s5, %s6281_s28  ;;  %p6287_p8 = scmp.lt.s32.totalorder %s6280_s5, %s7895_s9 }
  0xc8   : > { %p6288_p11 = scmp.lt.s32.totalorder %s6286_s4, %s6281_s28 }
  0xc9   : > { %p6284_p4 = pnand %p6282_p3, %p7073_p0 }
  0xca   : > { %p6289_p13 = por %p6288_p11, %p6287_p8 }
  0xcb   : > { %p6285_p7 = pneg %p6284_p4 }
  0xcd   : > { %p6290_p1 = pnand %p6289_p13, %p6285_p7 }
  0xcf   : > { %6293 = shalt.err (!%p6290_p1)
}
  0xd0   : > { %5872 = dma.hbm_to_vmem [thread:$0]  (!%p7062_p12), %s1424_s1, 16, %s1426_s16, [#allocation21]  }
  0xd1   : > { %s1278_s18 = sshll.u32 %s7894_s12, 4  ;;  %s6732_s19 = smov [#allocation23]   ;;  %s7134_s18 = int_to_ptr.hbm [resolvable:$true] %s1278_s18 }
  0xd2   : > { %s1452_s23 = sshll.u32 %s6732_s19, 4  ;;  %s6309_s15 = sshra.s32 %s7125_s7, 4  ;;  %s1453_s23 = int_to_ptr.vmem [resolvable:$true] %s1452_s23  ;;  %s6310_s15 = int_to_ptr.hbm [resolvable:$true] %s6309_s15 }
  0xd3   : > { %s6311_s4 = scalar_lea.hbm %s6310_s15, 2  ;;  %s6316_s5 = scalar_lea.hbm %s7898_s3, 2 }
  0xd4   : > { %p6312_p2 = scmp.ne.s32.totalorder %s6310_s15, %s6311_s4  ;;  %p6317_p7 = scmp.lt.s32.totalorder %s6310_s15, %s7898_s3 }
  0xd5   : > { %p6318_p8 = scmp.lt.s32.totalorder %s6316_s5, %s6311_s4 }
  0xd6   : > { %p6314_p3 = pnand %p6312_p2, %p7073_p0 }
  0xd7   : > { %p6319_p11 = por %p6318_p8, %p6317_p7 }
  0xd8   : > { %p6315_p4 = pneg %p6314_p3 }
  0xda   : > { %p6320_p13 = pnand %p6319_p11, %p6315_p4 }
  0xdc   : > { %6323 = shalt.err (!%p6320_p13)
}
  0xdd   : > { %5878 = dma.hbm_to_vmem [thread:$0]  (!%p7062_p12), %s7125_s7, 32, %s1453_s23, [#allocation24]  }
  0xde   : > { %s6733_s1 = smov [#allocation2]   ;;  %s1305_s28 = sshll.u32 %s7897_s6, 4  ;;  %s7145_s28 = int_to_ptr.hbm [resolvable:$true] %s1305_s28 }
  0xdf   : > { %s1280_s16 = sshll.u32 %s6733_s1, 4  ;;  %s6339_s15 = sshra.s32 %s7134_s18, 4  ;;  %s1281_s16 = int_to_ptr.vmem [resolvable:$true] %s1280_s16  ;;  %s6340_s15 = int_to_ptr.hbm [resolvable:$true] %s6339_s15 }
  0xe0   : > { %s6341_s19 = scalar_lea.hbm %s6340_s15, 1  ;;  %s6346_s4 = scalar_lea.hbm %s7894_s12, 1 }
  0xe1   : > { %p6342_p1 = scmp.ne.s32.totalorder %s6340_s15, %s6341_s19  ;;  %p6347_p4 = scmp.lt.s32.totalorder %s6340_s15, %s7894_s12 }
  0xe2   : > { %p6348_p7 = scmp.lt.s32.totalorder %s6346_s4, %s6341_s19 }
  0xe3   : > { %p6344_p2 = pnand %p6342_p1, %p7073_p0 }
  0xe4   : > { %p6349_p8 = por %p6348_p7, %p6347_p4 }
  0xe5   : > { %p6345_p3 = pneg %p6344_p2 }
  0xe7   : > { %p6350_p11 = pnand %p6349_p8, %p6345_p3 }
  0xe9   : > { %6353 = shalt.err (!%p6350_p11)
}
  0xea   : > { %5839 = dma.hbm_to_vmem [thread:$0]  (!%p7062_p12), %s7134_s18, 16, %s1281_s16, [#allocation3]  }
  0xeb   : > { %s1332_s7 = sshll.u32 %s6906_s27, 4  ;;  %s6734_s23 = smov [#allocation7]   ;;  %s7156_s7 = int_to_ptr.hbm [resolvable:$true] %s1332_s7 }
  0xec   : > { %s1307_s5 = sshll.u32 %s6734_s23, 4  ;;  %s6369_s1 = sshra.s32 %s7145_s28, 4  ;;  %s1308_s5 = int_to_ptr.vmem [resolvable:$true] %s1307_s5  ;;  %s6370_s1 = int_to_ptr.hbm [resolvable:$true] %s6369_s1 }
  0xed   : > { %s6371_s15 = scalar_lea.hbm %s6370_s1, 3  ;;  %s6376_s19 = scalar_lea.hbm %s7897_s6, 3 }
  0xee   : > { %p6372_p13 = scmp.ne.s32.totalorder %s6370_s1, %s6371_s15  ;;  %p6377_p3 = scmp.lt.s32.totalorder %s6370_s1, %s7897_s6 }
  0xef   : > { %p6378_p4 = scmp.lt.s32.totalorder %s6376_s19, %s6371_s15 }
  0xf0   : > { %p6374_p1 = pnand %p6372_p13, %p7073_p0 }
  0xf1   : > { %p6379_p7 = por %p6378_p4, %p6377_p3 }
  0xf2   : > { %p6375_p2 = pneg %p6374_p1 }
  0xf4   : > { %p6380_p8 = pnand %p6379_p7, %p6375_p2 }
  0xf6   : > { %6383 = shalt.err (!%p6380_p8)
}
  0xf7   : > { %5845 = dma.hbm_to_vmem [thread:$0]  (!%p7062_p12), %s7145_s28, 48, %s1308_s5, [#allocation6]  }
  0xf8   : > { %s6735_s18 = smov [#allocation10]   ;;  %s1355_s4 = sshll.u32 %s6916_s20, 4  ;;  %s7167_s4 = int_to_ptr.hbm [resolvable:$true] %s1355_s4 }
  0xf9   : > { %s1334_s16 = sshll.u32 %s6735_s18, 4  ;;  %s6399_s23 = sshra.s32 %s7156_s7, 4  ;;  %s1335_s16 = int_to_ptr.vmem [resolvable:$true] %s1334_s16  ;;  %s6400_s23 = int_to_ptr.hbm [resolvable:$true] %s6399_s23 }
  0xfa   : > { %s6401_s1 = scalar_lea.hbm %s6400_s23, 1  ;;  %s6406_s15 = scalar_lea.hbm %s6906_s27, 1 }
  0xfb   : > { %p6402_p11 = scmp.ne.s32.totalorder %s6400_s23, %s6401_s1  ;;  %p6407_p2 = scmp.lt.s32.totalorder %s6400_s23, %s6906_s27 }
  0xfc   : > { %p6408_p3 = scmp.lt.s32.totalorder %s6406_s15, %s6401_s1 }
  0xfd   : > { %p6404_p13 = pnand %p6402_p11, %p7073_p0 }
  0xfe   : > { %p6409_p4 = por %p6408_p3, %p6407_p2 }
  0xff   : > { %p6405_p1 = pneg %p6404_p13 }
 0x101   : > { %p6410_p7 = pnand %p6409_p4, %p6405_p1 }
 0x103   : > { %6413 = shalt.err (!%p6410_p7)
}
 0x104   : > { %5851 = dma.hbm_to_vmem [thread:$0]  (!%p7062_p12), %s7156_s7, 16, %s1335_s16, [#allocation9]  }
 0x105   : > { %s1385_s28 = sshll.u32 %s6931_s13, 4  ;;  %s6736_s5 = smov [#allocation13]   ;;  %s7178_s28 = int_to_ptr.hbm [resolvable:$true] %s1385_s28 }
 0x106   : > { %s1357_s19 = sshll.u32 %s6736_s5, 4  ;;  %s6429_s18 = sshra.s32 %s7167_s4, 4  ;;  %s1358_s19 = int_to_ptr.vmem [resolvable:$true] %s1357_s19  ;;  %s6430_s18 = int_to_ptr.hbm [resolvable:$true] %s6429_s18 }
 0x107   : > { %s6431_s23 = scalar_lea.hbm %s6430_s18, 64  ;;  %s6436_s1 = scalar_lea.hbm %s6916_s20, 64 }
 0x108   : > { %p6432_p8 = scmp.ne.s32.totalorder %s6430_s18, %s6431_s23  ;;  %p6437_p1 = scmp.lt.s32.totalorder %s6430_s18, %s6916_s20 }
 0x109   : > { %p6438_p2 = scmp.lt.s32.totalorder %s6436_s1, %s6431_s23 }
 0x10a   : > { %p6434_p11 = pnand %p6432_p8, %p7073_p0 }
 0x10b   : > { %p6439_p3 = por %p6438_p2, %p6437_p1 }
 0x10c   : > { %p6435_p13 = pneg %p6434_p11 }
 0x10e   : > { %p6440_p4 = pnand %p6439_p3, %p6435_p13 }
 0x110   : > { %6443 = shalt.err (!%p6440_p4)
}
 0x111   : > { %s7912_s7 = smov 64   ;;  %s6737_s16 = smov [#allocation16]  }
 0x112   : > { %5857 = dma.hbm_to_vmem [thread:$0]  (!%p7062_p12), %s7167_s4, 1024, %s1358_s19, [#allocation12], %s7912_s7, %s7912_s7, %s6730_s26  }
 0x113   : > { %s1387_s15 = sshll.u32 %s6737_s16, 4  ;;  %s1411_s5 = sshll.u32 %s6941_s14, 4  ;;  %s1388_s15 = int_to_ptr.vmem [resolvable:$true] %s1387_s15  ;;  %s7192_s5 = int_to_ptr.hbm [resolvable:$true] %s1411_s5 }
 0x114   : > { %s6459_s18 = sshra.s32 %s7178_s28, 4  ;;  %s6466_s1 = scalar_lea.hbm %s6931_s13, 2  ;;  %s6460_s18 = int_to_ptr.hbm [resolvable:$true] %s6459_s18 }
 0x115   : > { %s6461_s23 = scalar_lea.hbm %s6460_s18, 2  ;;  %p6467_p13 = scmp.lt.s32.totalorder %s6460_s18, %s6931_s13 }
 0x116   : > { %p6462_p7 = scmp.ne.s32.totalorder %s6460_s18, %s6461_s23  ;;  %p6468_p1 = scmp.lt.s32.totalorder %s6466_s1, %s6461_s23 }
 0x118   : > { %p6464_p8 = pnand %p6462_p7, %p7073_p0  ;;  %p6469_p2 = por %p6468_p1, %p6467_p13 }
 0x11a   : > { %p6465_p11 = pneg %p6464_p8 }
 0x11c   : > { %p6470_p3 = pnand %p6469_p2, %p6465_p11 }
 0x11e   : > { %6473 = shalt.err (!%p6470_p3)
}
 0x11f   : > { %5863 = dma.hbm_to_vmem [thread:$0]  (!%p7062_p12), %s7178_s28, 32, %s1388_s15, [#allocation15]  }
 0x120   : > { %s1435_s26 = sshll.u32 %s7896_s8, 4  ;;  %s6738_s4 = smov [#allocation19]   ;;  %s7203_s26 = int_to_ptr.hbm [resolvable:$true] %s1435_s26 }
 0x121   : > { %s1413_s19 = sshll.u32 %s6738_s4, 4  ;;  %s6489_s7 = sshra.s32 %s7192_s5, 4  ;;  %s1414_s19 = int_to_ptr.vmem [resolvable:$true] %s1413_s19  ;;  %s6490_s7 = int_to_ptr.hbm [resolvable:$true] %s6489_s7 }
 0x122   : > { %s6491_s16 = scalar_lea.hbm %s6490_s7, 1  ;;  %s6496_s18 = scalar_lea.hbm %s6941_s14, 1 }
 0x123   : > { %p6492_p4 = scmp.ne.s32.totalorder %s6490_s7, %s6491_s16  ;;  %p6497_p11 = scmp.lt.s32.totalorder %s6490_s7, %s6941_s14 }
 0x124   : > { %p6498_p13 = scmp.lt.s32.totalorder %s6496_s18, %s6491_s16 }
 0x125   : > { %p6494_p7 = pnand %p6492_p4, %p7073_p0 }
 0x126   : > { %p6499_p1 = por %p6498_p13, %p6497_p11 }
 0x127   : > { %p6495_p8 = pneg %p6494_p7 }
 0x129   : > { %p6500_p2 = pnand %p6499_p1, %p6495_p8 }
 0x12b   : > { %6503 = shalt.err (!%p6500_p2)
}
 0x12c   : > { %s7913_s28 = sld [smem:[#allocation71_spill]]  ;;  %s6739_s15 = smov [#allocation22]  }
 0x12d   : > { %5869 = dma.hbm_to_vmem [thread:$0]  (!%p7062_p12), %s7192_s5, 16, %s1414_s19, [#allocation18]  }
 0x12e   : > { %s1437_s23 = sshll.u32 %s6739_s15, 4  ;;  %s6519_s4 = sshra.s32 %s7203_s26, 4  ;;  %s1438_s23 = int_to_ptr.vmem [resolvable:$true] %s1437_s23  ;;  %s6520_s4 = int_to_ptr.hbm [resolvable:$true] %s6519_s4 }
 0x12f   : > { %s6521_s7 = scalar_lea.hbm %s6520_s4, 1  ;;  %s6526_s16 = scalar_lea.hbm %s7896_s8, 1 }
 0x130   : > { %p6522_p3 = scmp.ne.s32.totalorder %s6520_s4, %s6521_s7  ;;  %p6527_p8 = scmp.lt.s32.totalorder %s6520_s4, %s7896_s8 }
 0x131   : > { %p6528_p11 = scmp.lt.s32.totalorder %s6526_s16, %s6521_s7 }
 0x132   : > { %s1465_s1 = sshll.u32 %s7913_s28, 4  ;;  %p6524_p4 = pnand %p6522_p3, %p7073_p0  ;;  %s1466_s1 = int_to_ptr.hbm [resolvable:$true] %s1465_s1 }
 0x133   : > { %p6529_p13 = por %p6528_p11, %p6527_p8 }
 0x134   : > { %p6525_p7 = pneg %p6524_p4 }
 0x136   : > { %p6530_p1 = pnand %p6529_p13, %p6525_p7 }
 0x138   : > { %6533 = shalt.err (!%p6530_p1)
}
 0x139   : > { %5875 = dma.hbm_to_vmem [thread:$0]  (!%p7062_p12), %s7203_s26, 16, %s1438_s23, [#allocation21]  }
 0x13a   : > { %s6740_s5 = smov [#allocation25]   ;;  %s6549_s18 = sshra.s32 %s1466_s1, 4  ;;  %s6550_s18 = int_to_ptr.hbm [resolvable:$true] %s6549_s18 }
 0x13b   : > { %s1467_s19 = sshll.u32 %s6740_s5, 4  ;;  %s6551_s15 = scalar_lea.hbm %s6550_s18, 1  ;;  %s1468_s19 = int_to_ptr.vmem [resolvable:$true] %s1467_s19 }
 0x13c   : > { %p6552_p2 = scmp.ne.s32.totalorder %s6550_s18, %s6551_s15  ;;  %s6556_s4 = scalar_lea.hbm %s7913_s28, 1 }
 0x13d   : > { %p6557_p7 = scmp.lt.s32.totalorder %s6550_s18, %s7913_s28  ;;  %p6558_p8 = scmp.lt.s32.totalorder %s6556_s4, %s6551_s15 }
 0x13e   : > { %p6554_p3 = pnand %p6552_p2, %p7073_p0 }
 0x13f   : > { %p6559_p11 = por %p6558_p8, %p6557_p7 }
 0x140   : > { %p6555_p4 = pneg %p6554_p3 }
 0x142   : > { %p6560_p13 = pnand %p6559_p11, %p6555_p4 }
 0x144   : > { %6563 = shalt.err (!%p6560_p13)
}
 0x145   : > { %5881 = dma.hbm_to_vmem [thread:$0]  (!%p7062_p12), %s1466_s1, 16, %s1468_s19, [#allocation24]  }
 0x146   : > { %1519 = sbr.rel (%p7052_p10) target bundleno = 6291 (0x1893), region = 212 }
 0x14b   : > { %6624 = dma.done.wait (%p5886_p9), [#allocation3], 16  }
 0x14c   : > { %6626 = vsyncadd (%p5886_p9), [#allocation3], 4294967280 }
 0x14d   : > { %6628 = dma.done.wait (%p5886_p9), [#allocation6], 64  }
 0x14e   : > { %6630 = vsyncadd (%p5886_p9), [#allocation6], 4294967232 }
 0x14f   : > { %6632 = dma.done.wait (%p5886_p9), [#allocation9], 32  }
 0x150   : > { %6634 = vsyncadd (%p5886_p9), [#allocation9], 4294967264 }
 0x151   : > { %6636 = dma.done.wait (%p5886_p9), [#allocation12], 1040  }
 0x152   : > { %6638 = vsyncadd (%p5886_p9), [#allocation12], 4294966256 }
 0x153   : > { %6640 = dma.done.wait (%p5886_p9), [#allocation15], 48  }
 0x154   : > { %6642 = vsyncadd (%p5886_p9), [#allocation15], 4294967248 }
 0x155   : > { %6644 = dma.done.wait (%p5886_p9), [#allocation18], 1040  }
 0x156   : > { %6646 = vsyncadd (%p5886_p9), [#allocation18], 4294966256 }
 0x157   : > { %6648 = dma.done.wait (%p5886_p9), [#allocation21], 32  }
 0x158   : > { %6650 = vsyncadd (%p5886_p9), [#allocation21], 4294967264 }
 0x159   : > { %6652 = dma.done.wait (%p5886_p9), [#allocation24], 48  }
 0x15a   : > { %6654 = vsyncadd (%p5886_p9), [#allocation24], 4294967248  ;;  %s7914_s11 = sld [smem:[#allocation36_spill]]  ;;  %p1719_p10 = scmp.lt.s32.totalorder %s7024_s0, 1  ;;  %v6741_v5 = vmov 128.0   ;;  %vm2036_vm7 = vcmask 261120  }
 0x15b   : > { %s7915_s2 = sld [smem:[#allocation40_spill]]  ;;  %6047 = vrcp.f32 %v6741_v5  ;;  %s6742_s15 = smov 96   ;;  %vm2072_vm8 = vcmask 1043456   ;;  %vm2056_vm9 = vcmask 64512   ;;  %vm2275_vm10 = vcmask 523264  }
 0x15c   : > { %s7264_s22 = scalar_select %p1719_p10, %s7024_s0, 1  ;;  %vm2277_vm11 = vcmask 785408  }
 0x15d   : > { %s7916_s1 = sld [smem:[#allocation42_spill]] }
 0x15e   : > { %s4856_s26 = sshll.u32 %s7264_s22, 2  ;;  %s7917_s7 = sld [smem:[#allocation43_spill]] }
 0x15f   : > { %s7918_s16 = sld [smem:[#allocation46_spill]] }
 0x160   : > { %s1722_s23 = scalar_lea.vmem %s7914_s11, %s4856_s26  ;;  %s7919_s5 = sld [smem:[#allocation44_spill]] }
 0x161   : > { %v1751_v0 = vld [vmem:[%s1722_s23] sm:$0xf]  ;;  %v6048_v6 = vpop.eup %6047  ;;  %s7920_s19 = sld [smem:[#allocation45_spill]]  ;;  %s6743_s11 = smov 64  }
 0x162   : > { %v1752_v1 = vunpack.c.l.bf16 %v1751_v0  ;;  %v1754_v2 = vld [vmem:[%s7915_s2] sm:$0xff]  ;;  %v1761_v7 = vmul.f32 128.0, %v6048_v6  ;;  %vm1765_vm0 = vweird.f32 %v6048_v6  ;;  %s7921_s18 = sld [smem:[#allocation47_spill]]  ;;  %s6744_s23 = smov 32  }
 0x163   : > { %v6023_v25 = vld [vmem:[%s7916_s1] ss:$0 sm:$0xff]  ;;  %s7922_s4 = sld [smem:[#allocation38_spill]] }
 0x164   : > { %v1753_v3 = vmul.f32 11.313708, %v1752_v1  ;;  %v1762_v8 = vsub.f32 1.0, %v1761_v7  ;;  %v6024_v28 = vld [vmem:[%s7917_s7] ss:$0 sm:$0xff]  ;;  %s7923_s1 = sld [smem:[#allocation37_spill]] }
 0x165   : > { %v4945_v31 = vld [vmem:[%s7918_s16 + $0xa8] sm:$0xf]  ;;  %v5615_v32 = vld [vmem:[%s7918_s16 + $0xb0] sm:$0xf0]  ;;  %v5614_v33 = vld [vmem:[%s7918_s16 + $0xac] sm:$0xf] }
 0x166   : > { %v1755_v4 = vadd.f32 %v1754_v2, %v1753_v3  ;;  %v1763_v9 = vmul.f32 %v6048_v6, %v1762_v8  ;;  %v4946_v34 = vor.u32 %v5615_v32, %v4945_v31  ;;  %v4947_v35 = vld [vmem:[%s7918_s16 + $0xb4] sm:$0xf0]  ;;  %v4953_v36 = vld [vmem:[%s7918_s16 + $0xb0] sm:$0xf]  ;;  %v5616_v37 = vld [vmem:[%s7918_s16 + $0xb8] sm:$0xf0] }
 0x167   : > { %v4950_v38 = vor.u32 %v5614_v33, %v4947_v35  ;;  %v4954_v39 = vor.u32 %v5616_v37, %v4953_v36  ;;  %v4933_v44 = vld [vmem:[%s7918_s16 + $0x90] sm:$0xf]  ;;  %v5612_v45 = vld [vmem:[%s7918_s16 + $0x98] sm:$0xf0]  ;;  %v5611_v46 = vld [vmem:[%s7918_s16 + $0x94] sm:$0xf] }
 0x168   : > { %1758 = vadd.xlane.f32.xlu0 %v1755_v4  ;;  %v1764_v10 = vadd.f32 %v6048_v6, %v1763_v9  ;;  %1992 = vmatpush.bf16.msra.mxu0 %v4946_v34  ;;  %v4934_v47 = vor.u32 %v5612_v45, %v4933_v44  ;;  %v4935_v48 = vld [vmem:[%s7918_s16 + $0x9c] sm:$0xf0]  ;;  %v4941_v49 = vld [vmem:[%s7918_s16 + $0x98] sm:$0xf]  ;;  %v5613_v50 = vld [vmem:[%s7918_s16 + $0xa0] sm:$0xf0] }
 0x169   : > { %2005 = vmatpush.bf16.msra.mxu1 %v4950_v38  ;;  %2018 = vmatpush.bf16.msra.mxu2 %v4954_v39  ;;  %v4938_v51 = vor.u32 %v5611_v46, %v4935_v48  ;;  %v4942_v52 = vor.u32 %v5613_v50, %v4941_v49  ;;  %v4921_v53 = vld [vmem:[%s7918_s16 + $0x78] sm:$0xf]  ;;  %v5609_v54 = vld [vmem:[%s7918_s16 + $0x80] sm:$0xf0]  ;;  %v5608_v55 = vld [vmem:[%s7918_s16 + $0x7c] sm:$0xf]  ;;  %s1729_s2 = scalar_lea.vmem %s7922_s4, %s7264_s22 }
 0x16a   : > { %v7271_v11 = vsel %vm1765_vm0, %v6048_v6, %v1764_v10  ;;  %v4922_v56 = vor.u32 %v5609_v54, %v4921_v53  ;;  %v4923_v57 = vld [vmem:[%s7918_s16 + $0x84] sm:$0xf0]  ;;  %v4929_v58 = vld [vmem:[%s7918_s16 + $0x80] sm:$0xf]  ;;  %v5610_v59 = vld [vmem:[%s7918_s16 + $0x88] sm:$0xf0] }
 0x16b   : > { %v4926_v60 = vor.u32 %v5608_v55, %v4923_v57  ;;  %v4930_v61 = vor.u32 %v5610_v59, %v4929_v58  ;;  %v4909_v62 = vld [vmem:[%s7918_s16 + $0x60] sm:$0xf]  ;;  %v5606_v63 = vld [vmem:[%s7918_s16 + $0x68] sm:$0xf0]  ;;  %v5605_v0 = vld [vmem:[%s7918_s16 + $0x64] sm:$0xf] }
 0x16c   : > { %1993 = vmatpush.bf16.msra.mxu0 %v4934_v47  ;;  %v4910_v1 = vor.u32 %v5606_v63, %v4909_v62  ;;  %v4911_v2 = vld [vmem:[%s7918_s16 + $0x6c] sm:$0xf0]  ;;  %v4917_v3 = vld [vmem:[%s7918_s16 + $0x68] sm:$0xf]  ;;  %v5603_v8 = vld [vmem:[%s7918_s16 + $0x50] sm:$0xf0] }
 0x16d   : > { %2006 = vmatpush.bf16.msra.mxu1 %v4938_v51  ;;  %2019 = vmatpush.bf16.msra.mxu2 %v4942_v52  ;;  %v4914_v5 = vor.u32 %v5605_v0, %v4911_v2  ;;  %v4897_v7 = vld [vmem:[%s7918_s16 + $0x48] sm:$0xf]  ;;  %v5602_v9 = vld [vmem:[%s7918_s16 + $0x4c] sm:$0xf]  ;;  %v4881_v32 = vld [vmem:[%s7918_s16 + $0x20] sm:$0xf] }
 0x16e   : > { %v4898_v10 = vor.u32 %v5603_v8, %v4897_v7  ;;  %v4875_v31 = vld [vmem:[%s7918_s16 + $0x24] sm:$0xf0]  ;;  %v5598_v33 = vld [vmem:[%s7918_s16 + $0x28] sm:$0xf0]  ;;  %v4861_v36 = vld [vmem:[%s7918_s16] sm:$0xf] }
 0x16f   : > { %v4882_v35 = vor.u32 %v5598_v33, %v4881_v32  ;;  %v5594_v37 = vld [vmem:[%s7918_s16 + $0x8] sm:$0xf0]  ;;  %v5593_v38 = vld [vmem:[%s7918_s16 + $0x4] sm:$0xf]  ;;  %v6025_v55 = vld [vmem:[%s7919_s5] ss:$0 sm:$0xff]  ;;  %s1726_s5 = scalar_lea.vmem %s7923_s1, %s4856_s26 }
 0x170   : > { %1994 = vmatpush.bf16.msra.mxu0 %v4922_v56  ;;  %v4862_v39 = vor.u32 %v5594_v37, %v4861_v36  ;;  %v6026_v58 = vld [vmem:[%s7920_s19] ss:$0 sm:$0xff]  ;;  %s7924_s7 = sld [smem:[#allocation41_spill]] }
 0x171   : > { %2007 = vmatpush.bf16.msra.mxu1 %v4926_v60  ;;  %2020 = vmatpush.bf16.msra.mxu2 %v4930_v61  ;;  %v1856_v62 = vld [vmem:[%s7921_s18] sm:$0x7]  ;;  %s7925_s19 = sld [smem:[#allocation48_spill]] }
 0x172   : > { %v1858_v63 = vperm.slane %v1856_v62, 0  ;;  %v1859_v0 = vperm.slane %v1856_v62, 1  ;;  %s7926_s26 = sld [smem:[#allocation58_spill]] }
 0x173   : > { %s7927_s18 = sld [smem:[#allocation59_spill]] }
 0x174   : > { %1995 = vmatpush.bf16.msra.mxu0 %v4910_v1  ;;  %s7928_s4 = sld [smem:[#allocation49_spill]] }
 0x175   : > { %2008 = vmatpush.bf16.msra.mxu1 %v4914_v5  ;;  %s7930_s1 = sld [smem:[#allocation52_spill]] }
 0x178   : > { %1996 = vmatpush.bf16.msra.mxu0 %v4898_v10 }
 0x1db   : > { %v1759_v12 = vpop.xlane.xlu0 %1758 }
 0x1dc   : > { %v1767_v13 = vmul.f32 %v7271_v11, %v1759_v12  ;;  %v4899_v12 = vld [vmem:[%s7918_s16 + $0x54] sm:$0xf0] }
 0x1de   : > { %v1768_v14 = vsub.f32 %v1755_v4, %v1767_v13  ;;  %v5607_v4 = vld [vmem:[%s7918_s16 + $0x70] sm:$0xf0]  ;;  %v4905_v13 = vld [vmem:[%s7918_s16 + $0x50] sm:$0xf] }
 0x1df   : > { %v4918_v6 = vor.u32 %v5607_v4, %v4917_v3 }
 0x1e0   : > { %v1769_v15 = vmul.f32 %v1768_v14, %v1768_v14 }
 0x1e1   : > { %2021 = vmatpush.bf16.msra.mxu2 %v4918_v6  ;;  %v1860_v6 = vperm.slane %v1856_v62, 2 }
 0x1e2   : > { %1770 = vadd.xlane.f32.xlu0 %v1769_v15  ;;  %v4902_v15 = vor.u32 %v5602_v9, %v4899_v12 }
 0x1e4   : > { %2009 = vmatpush.bf16.msra.mxu1 %v4902_v15 }
 0x255   : > { %v1771_v16 = vpop.xlane.xlu0 %1770 }
 0x256   : > { %v1772_v17 = vmul.f32 %v1771_v16, %v7271_v11 }
 0x258   : > { %v1773_v18 = vadd.f32 1e-05, %v1772_v17  ;;  %v4885_v17 = vld [vmem:[%s7918_s16 + $0x30] sm:$0xf] }
 0x25a   : > { %6049 = vrsqrt.f32 %v1773_v18  ;;  %vm1780_vm2 = vweird.f32 %v1773_v18 }
 0x260   : > { %v6050_v19 = vpop.eup %6049 }
 0x261   : > { %v1775_v20 = vmul.f32 %v6050_v19, %v1773_v18  ;;  %vm1781_vm1 = vweird.f32 %v6050_v19  ;;  %v5600_v18 = vld [vmem:[%s7918_s16 + $0x38] sm:$0xf0] }
 0x262   : > { %vm1782_vm3 = vmor %vm1780_vm2, %vm1781_vm1 }
 0x263   : > { %v1776_v21 = vmul.f32 %v6050_v19, %v1775_v20  ;;  %v4886_v20 = vor.u32 %v5600_v18, %v4885_v17 }
 0x265   : > { %v1777_v22 = vmul.f32 0.5, %v1776_v21  ;;  %v4887_v21 = vld [vmem:[%s7918_s16 + $0x3c] sm:$0xf0]  ;;  %1997 = vmatpush.bf16.msra.mxu0 %v4886_v20 }
 0x267   : > { %v1778_v23 = vsub.f32 1.5, %v1777_v22  ;;  %v4893_v22 = vld [vmem:[%s7918_s16 + $0x38] sm:$0xf] }
 0x269   : > { %v1779_v24 = vmul.f32 %v6050_v19, %v1778_v23  ;;  %v5601_v23 = vld [vmem:[%s7918_s16 + $0x40] sm:$0xf0] }
 0x26b   : > { %v1783_v26 = vsel %vm1782_vm3, %v6050_v19, %v1779_v24  ;;  %v5599_v19 = vld [vmem:[%s7918_s16 + $0x34] sm:$0xf] }
 0x26c   : > { %v1784_v27 = vmul.f32 %v1783_v26, %v1768_v14  ;;  %v5604_v14 = vld [vmem:[%s7918_s16 + $0x58] sm:$0xf0]  ;;  %v4890_v24 = vor.u32 %v5599_v19, %v4887_v21  ;;  %v4873_v26 = vld [vmem:[%s7918_s16 + $0x18] sm:$0xf] }
 0x26d   : > { %v4906_v16 = vor.u32 %v5604_v14, %v4905_v13 }
 0x26e   : > { %v1788_v29 = vmul.f32 %v6023_v25, %v1784_v27  ;;  %v4894_v25 = vor.u32 %v5601_v23, %v4893_v22  ;;  %2010 = vmatpush.bf16.msra.mxu1 %v4890_v24  ;;  %v5597_v27 = vld [vmem:[%s7918_s16 + $0x20] sm:$0xf0]  ;;  %v1738_v22 = vld [vmem:[%s1729_s2] sm:$0x1]  ;;  %s7929_s2 = sld [smem:[#allocation62_spill]] }
 0x26f   : > { %2022 = vmatpush.bf16.msra.mxu2 %v4906_v16 }
 0x270   : > { %v7277_v30 = vadd.f32 %v6024_v28, %v1788_v29  ;;  %v5596_v28 = vld [vmem:[%s7918_s16 + $0x1c] sm:$0xf]  ;;  %v4874_v29 = vor.u32 %v5597_v27, %v4873_v26 }
 0x271   : > { %v4878_v34 = vor.u32 %v5596_v28, %v4875_v31 }
 0x272   : > { %1795 = vadd.xlane.f32.xlu1 %v7277_v30  ;;  %1998 = vmatpush.bf16.msra.mxu0 %v4874_v29 }
 0x273   : > { %2023 = vmatpush.bf16.msra.mxu2 %v4894_v25  ;;  %2011 = vmatpush.bf16.msra.mxu1 %v4878_v34  ;;  %v1739_v25 = vcvt.s32.f32 %v1738_v22 }
 0x275   : > { %v1740_v26 = vsub.f32 1.0, %v1739_v25 }
 0x276   : > { %1999 = vmatpush.bf16.msra.mxu0 %v4862_v39 }
 0x277   : > { %2024 = vmatpush.bf16.msra.mxu2 %v4882_v35  ;;  %v1741_v28 = vmul.f32 -1e+09, %v1740_v26 }
 0x279   : > { %v7351_v29 = vperm.slane %v1741_v28, 0  ;;  %v2733_v28 = vld [vmem:[%s1726_s5] sm:$0xf]  ;;  %s7932_s5 = sld [smem:[#allocation51_spill]] }
 0x2e5   : > { %v1796_v40 = vpop.xlane.xlu1 %1795 }
 0x2e6   : > { %v1797_v41 = vmul.f32 %v1796_v40, %v7271_v11  ;;  %v4863_v40 = vld [vmem:[%s7918_s16 + $0xc] sm:$0xf0] }
 0x2e7   : > { %v4866_v44 = vor.u32 %v5593_v38, %v4863_v40 }
 0x2e8   : > { %v7288_v42 = vsub.f32 %v7277_v30, %v1797_v41  ;;  %v4869_v41 = vld [vmem:[%s7918_s16 + $0x8] sm:$0xf] }
 0x2e9   : > { %2012 = vmatpush.bf16.msra.mxu1 %v4866_v44 }
 0x2ea   : > { %v1799_v43 = vmul.f32 %v7288_v42, %v7288_v42 }
 0x2ec   : > { %1800 = vadd.xlane.f32.xlu1 %v1799_v43  ;;  %v5595_v43 = vld [vmem:[%s7918_s16 + $0x10] sm:$0xf0] }
 0x2ed   : > { %v4870_v45 = vor.u32 %v5595_v43, %v4869_v41 }
 0x2ef   : > { %2025 = vmatpush.bf16.msra.mxu2 %v4870_v45 }
 0x35f   : > { %v1801_v46 = vpop.xlane.xlu1 %1800 }
 0x360   : > { %v1802_v47 = vmul.f32 %v1801_v46, %v7271_v11 }
 0x362   : > { %v1803_v48 = vadd.f32 1e-05, %v1802_v47 }
 0x364   : > { %6051 = vrsqrt.f32 %v1803_v48  ;;  %vm1810_vm5 = vweird.f32 %v1803_v48 }
 0x36a   : > { %v6052_v49 = vpop.eup %6051 }
 0x36b   : > { %v1805_v50 = vmul.f32 %v6052_v49, %v1803_v48  ;;  %vm1811_vm4 = vweird.f32 %v6052_v49 }
 0x36c   : > { %vm1812_vm6 = vmor %vm1810_vm5, %vm1811_vm4 }
 0x36d   : > { %v1806_v51 = vmul.f32 %v6052_v49, %v1805_v50 }
 0x36f   : > { %v1807_v52 = vmul.f32 0.5, %v1806_v51 }
 0x371   : > { %v1808_v53 = vsub.f32 1.5, %v1807_v52 }
 0x373   : > { %v1809_v54 = vmul.f32 %v6052_v49, %v1808_v53 }
 0x375   : > { %v1813_v56 = vsel %vm1812_vm6, %v6052_v49, %v1809_v54 }
 0x376   : > { %v1814_v57 = vmul.f32 %v1813_v56, %v7288_v42 }
 0x378   : > { %v1818_v59 = vmul.f32 %v6025_v55, %v1814_v57 }
 0x37a   : > { %v1822_v60 = vadd.f32 %v6026_v58, %v1818_v59 }
 0x37c   : > { %v1823_v61 = vpack.c.bf16 %v1822_v60, %v1822_v60 }
 0x37e   : > { %2000 = vmatmul.bf16.vlgmr.msra.gmra.mxu0 %v1823_v61  ;;  %2013 = vmatmul.bf16.vlgmr.msra.gmra.mxu1 %v1823_v61 }
 0x37f   : > { %2026 = vmatmul.bf16.vlgmr.msra.gmra.mxu2 %v1823_v61 }
 0x3fb   : > { %v2001_v1 = vpop.f32.mrf.mxu0  ;;  %v2014_v2 = vpop.f32.mrf.mxu1 }
 0x3fc   : > { %v2002_v3 = vadd.f32 %v2001_v1, %v1858_v63  ;;  %v2015_v4 = vadd.f32 %v2014_v2, %v1859_v0 }
 0x3fe   : > { %v2031_v5 = vpack.c.bf16 %v2015_v4, %v2002_v3 }
 0x400   : > { %v2034_v7 = vunpack.c.h.b16 %v2031_v5  ;;  %v2089_v8 = vunpack.c.l.b16 %v2031_v5 }
 0x402   : > { %v2027_v42 = vpop.f32.mrf.mxu2  ;;  %v2090_v9 = vpack.c.b16 %v2089_v8, %v2089_v8  ;;  %v2035_v10 = vpack.c.b16 %v2034_v7, %v2034_v7 }
 0x403   : > { %v2028_v12 = vadd.f32 %v2027_v42, %v1860_v6  ;;  %v2003_v13 = vpop.f32.mrf.mxu0  ;;  %v2016_v14 = vpop.f32.mrf.mxu1 }
 0x404   : > { %2091 = vrot.lane.b32.xlu1 %v2090_v9, %s6742_s15  ;;  %2093 = vrot.lane.b32.xlu0 %v2035_v10, %s6742_s15  ;;  %v2041_v15 = vsel %vm2036_vm7, %v2035_v10, 0 }
 0x405   : > { %v2032_v16 = vpack.c.bf16 %v2028_v12, %v2028_v12  ;;  %2050 = vmatpush.bf16.xpose.msra.mxu3 %v2041_v15 }
 0x407   : > { %v2074_v17 = vsel %vm2072_vm8, %v2032_v16, 0  ;;  %v2127_v45 = vunpack.c.l.b16 %v2032_v16 }
 0x409   : > { %v2128_v46 = vpack.c.b16 %v2127_v45, %v2127_v45 }
 0x40a   : > { %v2029_v18 = vpop.f32.mrf.mxu2 }
 0x40c   : > { %2150 = vrot.lane.b32.xlu1 %v2090_v9, %s6743_s11  ;;  %2152 = vrot.lane.b32.xlu0 %v2035_v10, %s6743_s11 }
 0x40d   : > { %2083 = vmatpush.bf16.msrb.mxu3 %v2074_v17 }
 0x40e   : > { %4955 = vmatmul.msk.bf16.vlgmr.msra.gmra.mxu3 %vm2036_vm7, %v2031_v5 }
 0x476   : > { %v2094_v19 = vpop.permute.xlu0 %2093  ;;  %v2092_v21 = vpop.permute.xlu1 %2091 }
 0x477   : > { %v2099_v20 = vsel %vm2036_vm7, %v2094_v19, 0 }
 0x478   : > { %2108 = vmatpush.bf16.xpose.msra.mxu3 %v2099_v20 }
 0x47e   : > { %v2153_v23 = vpop.permute.xlu0 %2152  ;;  %v2151_v27 = vpop.permute.xlu1 %2150 }
 0x47f   : > { %v2158_v24 = vsel %vm2036_vm7, %v2153_v23, 0 }
 0x480   : > { %2167 = vmatpush.bf16.xpose.msrb.mxu1 %v2158_v24 }
 0x487   : > { %4959 = vmatmul.msk.bf16.vlgmr.msrb.gmra.mxu1 %vm2036_vm7, %v2151_v27 }
 0x491   : > { %v2052_v31 = vpop.f32.mrf.mxu3 }
 0x492   : > { %v2053_v32 = vadd.f32 %v2052_v31, %v7351_v29  ;;  %v2734_v31 = vunpack.c.l.bf16 %v2733_v28 }
 0x494   : > { %v2057_v33 = vsel %vm2056_vm9, %v2053_v32, -inf }
 0x495   : > { %2058 = vmax.xlane.f32.xlu2 %v2057_v33  ;;  %v2735_v33 = vmul.f32 11.313708, %v2734_v31 }
 0x499   : > { %v2054_v34 = vpop.f32.mrf.mxu3 }
 0x504   : > { %v2169_v35 = vpop.f32.mrf.mxu1 }
 0x505   : > { %v2170_v43 = vadd.f32 %v2169_v35, %v7351_v29 }
 0x507   : > { %v2173_v44 = vsel %vm2056_vm9, %v2170_v43, -inf }
 0x508   : > { %v2059_v36 = vpop.xlane.xlu2 %2058 }
 0x509   : > { %v2060_v37 = vsub.f32 %v2053_v32, %v2059_v36  ;;  %v2736_v32 = vld [vmem:[%s7924_s7] sm:$0xff]  ;;  %s7931_s7 = sld [smem:[#allocation50_spill]] }
 0x50a   : > { %v2737_v35 = vadd.f32 %v2736_v32, %v2735_v33 }
 0x50b   : > { %v2061_v38 = vmul.f32 1.442695, %v2060_v37 }
 0x50c   : > { %v2171_v39 = vpop.f32.mrf.mxu1 }
 0x50d   : > { %6053 = vpow2.f32 %v2061_v38 }
 0x513   : > { %v6054_v40 = vpop.eup %6053 }
 0x514   : > { %v2063_v41 = vsel %vm2056_vm9, %v6054_v40, 0.0 }
 0x515   : > { %2064 = vadd.xlane.f32.xlu2 %v2063_v41 }
 0x52d   : > { %2208 = vrot.lane.b32.xlu2 %v2035_v10, %s6744_s23 }
 0x535   : > { %2206 = vrot.lane.b32.xlu2 %v2090_v9, %s6744_s23 }
 0x55e   : > { %2174 = vmax.xlane.f32.xlu2 %v2173_v44 }
 0x576   : > { %2129 = vrot.lane.b32.xlu2 %v2128_v46, %s6742_s15 }
 0x588   : > { %v2065_v47 = vpop.xlane.xlu2 %2064 }
 0x589   : > { %6055 = vrcp.f32 %v2065_v47 }
 0x58f   : > { %v6056_v48 = vpop.eup %6055 }
 0x590   : > { %v2067_v49 = vmul.f32 %v6056_v48, %v6054_v40  ;;  %v2209_v50 = vpop.permute.xlu2 %2208 }
 0x591   : > { %v2214_v52 = vsel %vm2036_vm7, %v2209_v50, 0 }
 0x592   : > { %v2068_v51 = vpack.c.bf16 %v2067_v49, %v2067_v49 }
 0x594   : > { %4956 = vmatmul.msk.bf16.vlgmr.msrb.gmra.mxu3 %vm2056_vm9, %v2068_v51  ;;  %v5624_v51 = vld [vmem:[%s7925_s19 + $0x38] sm:$0xff] }
 0x595   : > { %2223 = vmatpush.bf16.xpose.msrb.mxu3 %v2214_v52  ;;  %v5623_v52 = vld [vmem:[%s7925_s19 + $0x30] sm:$0xff] }
 0x598   : > { %v2207_v53 = vpop.permute.xlu2 %2206 }
 0x5a4   : > { %4957 = vmatmul.msk.bf16.vlgmr.msra.gmra.mxu3 %vm2036_vm7, %v2092_v21 }
 0x5b4   : > { %4961 = vmatmul.msk.bf16.vlgmr.msrb.gmra.mxu3 %vm2036_vm7, %v2207_v53  ;;  %v5622_v53 = vld [vmem:[%s7925_s19 + $0x28] sm:$0xff] }
 0x5d1   : > { %v2175_v54 = vpop.xlane.xlu2 %2174 }
 0x5d2   : > { %v2176_v63 = vsub.f32 %v2170_v43, %v2175_v54  ;;  %v5621_v54 = vld [vmem:[%s7925_s19 + $0x20] sm:$0xff] }
 0x5d4   : > { %v2177_v0 = vmul.f32 1.442695, %v2176_v63 }
 0x5d6   : > { %6057 = vpow2.f32 %v2177_v0 }
 0x5d9   : > { %v2130_v55 = vpop.permute.xlu2 %2129 }
 0x5da   : > { %v2135_v56 = vsel %vm2072_vm8, %v2130_v55, 0  ;;  %v5620_v55 = vld [vmem:[%s7925_s19 + $0x18] sm:$0xff] }
 0x5db   : > { %2144 = vmatpush.bf16.msrb.mxu0 %v2135_v56  ;;  %v5619_v56 = vld [vmem:[%s7925_s19 + $0x10] sm:$0xff] }
 0x5dc   : > { %v6058_v4 = vpop.eup %6057 }
 0x5dd   : > { %v2179_v6 = vsel %vm2056_vm9, %v6058_v4, 0.0 }
 0x617   : > { %v7366_v57 = vpop.f32.mrf.mxu3 }
 0x61f   : > { %v2087_v58 = vpop.f32.mrf.mxu3 }
 0x620   : > { %v5618_v58 = vld [vmem:[%s7925_s19 + $0x8] sm:$0xff] }
 0x627   : > { %v2110_v59 = vpop.f32.mrf.mxu3 }
 0x628   : > { %v2111_v60 = vadd.f32 %v2110_v59, %v7351_v29  ;;  %v5617_v59 = vld [vmem:[%s7925_s19] sm:$0xff] }
 0x62a   : > { %v2114_v61 = vsel %vm2056_vm9, %v2111_v60, -inf }
 0x62b   : > { %2115 = vmax.xlane.f32.xlu0 %v2114_v61 }
 0x62f   : > { %v2112_v62 = vpop.f32.mrf.mxu3 }
 0x637   : > { %v2225_v1 = vpop.f32.mrf.mxu3 }
 0x638   : > { %v2226_v2 = vadd.f32 %v2225_v1, %v7351_v29 }
 0x63a   : > { %v2229_v3 = vsel %vm2056_vm9, %v2226_v2, -inf }
 0x63b   : > { %2230 = vmax.xlane.f32.xlu1 %v2229_v3 }
 0x63f   : > { %v2227_v5 = vpop.f32.mrf.mxu3 }
 0x643   : > { %2180 = vadd.xlane.f32.xlu1 %v2179_v6 }
 0x65c   : > { %2185 = vrot.lane.b32.xlu1 %v2128_v46, %s6743_s11 }
 0x686   : > { %2740 = vadd.xlane.f32.xlu1 %v2737_v35 }
 0x69e   : > { %v2116_v7 = vpop.xlane.xlu0 %2115 }
 0x69f   : > { %v2117_v8 = vsub.f32 %v2111_v60, %v2116_v7 }
 0x6a1   : > { %v2118_v42 = vmul.f32 1.442695, %v2117_v8 }
 0x6a3   : > { %6059 = vpow2.f32 %v2118_v42 }
 0x6a9   : > { %v6060_v9 = vpop.eup %6059 }
 0x6aa   : > { %v2120_v10 = vsel %vm2056_vm9, %v6060_v9, 0.0 }
 0x6ab   : > { %2121 = vadd.xlane.f32.xlu0 %v2120_v10  ;;  %v6027_v10 = vld [vmem:[%s7926_s26] ss:$0 sm:$0xff]  ;;  %s7933_s26 = sld [smem:[#allocation54_spill]] }
 0x6ae   : > { %v2231_v12 = vpop.xlane.xlu1 %2230 }
 0x6af   : > { %v2232_v13 = vsub.f32 %v2226_v2, %v2231_v12 }
 0x6b1   : > { %v2233_v14 = vmul.f32 1.442695, %v2232_v13 }
 0x6b3   : > { %6061 = vpow2.f32 %v2233_v14  ;;  %v6028_v14 = vld [vmem:[%s7927_s18] ss:$0 sm:$0xff]  ;;  %s7934_s18 = sld [smem:[#allocation53_spill]] }
 0x6b6   : > { %v2181_v17 = vpop.xlane.xlu1 %2180 }
 0x6b7   : > { %6063 = vrcp.f32 %v2181_v17  ;;  %v6029_v17 = vld [vmem:[%s7928_s4] ss:$0 sm:$0xff]  ;;  %s7935_s4 = sld [smem:[#allocation55_spill]] }
 0x6b9   : > { %v6062_v15 = vpop.eup %6061 }
 0x6ba   : > { %v2235_v16 = vsel %vm2056_vm9, %v6062_v15, 0.0 }
 0x6bb   : > { %2236 = vadd.xlane.f32.xlu0 %v2235_v16 }
 0x6bd   : > { %v6064_v18 = vpop.eup %6063 }
 0x6be   : > { %v2183_v19 = vmul.f32 %v6064_v18, %v6058_v4 }
 0x6c0   : > { %v2184_v22 = vpack.c.bf16 %v2183_v19, %v2183_v19 }
 0x6ce   : > { %v2186_v20 = vpop.permute.xlu1 %2185 }
 0x6cf   : > { %v2191_v21 = vsel %vm2072_vm8, %v2186_v20, 0  ;;  %2241 = vrot.lane.b32.xlu0 %v2128_v46, %s6744_s23 }
 0x6d0   : > { %2200 = vmatpush.bf16.msra.mxu1 %v2191_v21 }
 0x6d3   : > { %4960 = vmatmul.msk.bf16.vlgmr.msra.gmra.mxu1 %vm2056_vm9, %v2184_v22 }
 0x6d4   : > { %2344 = vmatpush.bf16.msrb.mxu1 %v5624_v51  ;;  %v5139_v51 = vld [vmem:[%s7929_s2 + $0x24] sm:$0xf0] }
 0x6d8   : > { %2345 = vmatpush.bf16.msrb.mxu1 %v5623_v52 }
 0x6dc   : > { %2346 = vmatpush.bf16.msrb.mxu1 %v5622_v53  ;;  %v5657_v53 = vld [vmem:[%s7929_s2 + $0x4] sm:$0xf] }
 0x6e0   : > { %2347 = vmatpush.bf16.msrb.mxu1 %v5621_v54  ;;  %v5127_v54 = vld [vmem:[%s7929_s2 + $0xc] sm:$0xf0] }
 0x6e4   : > { %2348 = vmatpush.bf16.msrb.mxu1 %v5620_v55  ;;  %v5130_v55 = vor.u32 %v5657_v53, %v5127_v54  ;;  %v5679_v53 = vld [vmem:[%s7929_s2 + $0xb0] sm:$0xf0] }
 0x6e8   : > { %2349 = vmatpush.bf16.msrb.mxu1 %v5619_v56  ;;  %v5053_v56 = vld [vmem:[%s7930_s1 + $0x70] sm:$0xf] }
 0x6ec   : > { %2350 = vmatpush.bf16.msrb.mxu1 %v5618_v58  ;;  %v5640_v58 = vld [vmem:[%s7930_s1 + $0x74] sm:$0xf0] }
 0x6f0   : > { %2351 = vmatpush.bf16.msrb.mxu1 %v5617_v59  ;;  %v5045_v59 = vld [vmem:[%s7930_s1 + $0x60] sm:$0xf] }
 0x6f9   : > { %v2741_v46 = vpop.xlane.xlu1 %2740 }
 0x6fa   : > { %v2742_v48 = vmul.f32 %v2741_v46, %v7271_v11 }
 0x6fc   : > { %v2743_v49 = vsub.f32 %v2737_v35, %v2742_v48  ;;  %v5199_v35 = vld [vmem:[%s7929_s2 + $0x9c] sm:$0xf0] }
 0x6fd   : > { %v5151_v48 = vld [vmem:[%s7929_s2 + $0x3c] sm:$0xf0] }
 0x6fe   : > { %v2744_v50 = vmul.f32 %v2743_v49, %v2743_v49 }
 0x71e   : > { %v2122_v23 = vpop.xlane.xlu0 %2121 }
 0x71f   : > { %6065 = vrcp.f32 %v2122_v23 }
 0x725   : > { %v6066_v24 = vpop.eup %6065 }
 0x726   : > { %v2124_v25 = vmul.f32 %v6066_v24, %v6060_v9 }
 0x728   : > { %v2125_v26 = vpack.c.bf16 %v2124_v25, %v2124_v25 }
 0x72a   : > { %4958 = vmatmul.msk.bf16.vlgmr.msrb.gmra.mxu0 %vm2056_vm9, %v2125_v26  ;;  %v5211_v26 = vld [vmem:[%s7929_s2 + $0xb4] sm:$0xf0] }
 0x72e   : > { %v2237_v27 = vpop.xlane.xlu0 %2236 }
 0x72f   : > { %6067 = vrcp.f32 %v2237_v27 }
 0x735   : > { %v6068_v34 = vpop.eup %6067 }
 0x736   : > { %v2239_v36 = vmul.f32 %v6068_v34, %v6062_v15  ;;  %v5675_v34 = vld [vmem:[%s7929_s2 + $0x94] sm:$0xf] }
 0x738   : > { %v2240_v39 = vpack.c.bf16 %v2239_v36, %v2239_v36  ;;  %v5202_v36 = vor.u32 %v5675_v34, %v5199_v35  ;;  %v5630_v34 = vld [vmem:[%s7930_s1 + $0x24] sm:$0xf0] }
 0x741   : > { %v2242_v37 = vpop.permute.xlu0 %2241 }
 0x742   : > { %v2247_v38 = vsel %vm2072_vm8, %v2242_v37, 0  ;;  %v5672_v37 = vld [vmem:[%s7929_s2 + $0x7c] sm:$0xf] }
 0x743   : > { %2256 = vmatpush.bf16.msra.mxu0 %v2247_v38  ;;  %v5187_v38 = vld [vmem:[%s7929_s2 + $0x84] sm:$0xf0] }
 0x746   : > { %4962 = vmatmul.msk.bf16.vlgmr.msra.gmra.mxu0 %vm2056_vm9, %v2240_v39  ;;  %v5190_v39 = vor.u32 %v5672_v37, %v5187_v38  ;;  %v5039_v37 = vld [vmem:[%s7930_s1 + $0x58] sm:$0xf0] }
 0x750   : > { %v2202_v40 = vpop.f32.mrf.mxu1 }
 0x758   : > { %v2204_v41 = vpop.f32.mrf.mxu1 }
 0x759   : > { %v5175_v41 = vld [vmem:[%s7929_s2 + $0x6c] sm:$0xf0] }
 0x7a7   : > { %v2146_v43 = vpop.f32.mrf.mxu0 }
 0x7a8   : > { %2263 = vrot.lane.b32.xlu2 %v2146_v43, %s6744_s23 }
 0x7af   : > { %v2148_v44 = vpop.f32.mrf.mxu0 }
 0x7b0   : > { %2267 = vrot.lane.b32.xlu2 %v2202_v40, %s6743_s11  ;;  %v5669_v40 = vld [vmem:[%s7929_s2 + $0x64] sm:$0xf]  ;;  %v5666_v44 = vld [vmem:[%s7929_s2 + $0x4c] sm:$0xf] }
 0x7b1   : > { %v5178_v43 = vor.u32 %v5669_v40, %v5175_v41  ;;  %v5628_v40 = vld [vmem:[%s7930_s1 + $0x14] sm:$0xf0] }
 0x7c3   : > { %v2258_v45 = vpop.f32.mrf.mxu0 }
 0x7c4   : > { %2271 = vrot.lane.b32.xlu0 %v2258_v45, %s6742_s15  ;;  %v5163_v45 = vld [vmem:[%s7929_s2 + $0x54] sm:$0xf0] }
 0x7c5   : > { %v5166_v46 = vor.u32 %v5666_v44, %v5163_v45  ;;  %v5031_v44 = vld [vmem:[%s7930_s1 + $0x48] sm:$0xf0] }
 0x7cb   : > { %v2260_v47 = vpop.f32.mrf.mxu0 }
 0x7cc   : > { %v5663_v47 = vld [vmem:[%s7929_s2 + $0x34] sm:$0xf] }
 0x7d9   : > { %2745 = vadd.xlane.f32.xlu2 %v2744_v50  ;;  %v5660_v50 = vld [vmem:[%s7929_s2 + $0x1c] sm:$0xf] }
 0x7da   : > { %v5142_v52 = vor.u32 %v5660_v50, %v5139_v51  ;;  %v5023_v50 = vld [vmem:[%s7930_s1 + $0x38] sm:$0xf0]  ;;  %v5209_v51 = vld [vmem:[%s7929_s2 + $0xa8] sm:$0xf] }
 0x7db   : > { %v5210_v54 = vor.u32 %v5679_v53, %v5209_v51  ;;  %v5644_v51 = vld [vmem:[%s7933_s26 + $0x18] sm:$0xff]  ;;  %v5643_v53 = vld [vmem:[%s7933_s26 + $0x10] sm:$0xff] }
 0x802   : > { %v2264_v60 = vpop.permute.xlu2 %2263 }
 0x803   : > { %v2274_v62 = vsel %vm2036_vm7, %v7366_v57, %v2264_v60 }
 0x80a   : > { %v2268_v61 = vpop.permute.xlu2 %2267 }
 0x80b   : > { %v2276_v63 = vsel %vm2275_vm10, %v2274_v62, %v2268_v61  ;;  %v5054_v61 = vor.u32 %v5640_v58, %v5053_v56  ;;  %v5638_v62 = vld [vmem:[%s7930_s1 + $0x64] sm:$0xf0]  ;;  %v5015_v56 = vld [vmem:[%s7930_s1 + $0x28] sm:$0xf0]  ;;  %v5197_v58 = vld [vmem:[%s7929_s2 + $0x90] sm:$0xf] }
 0x80d   : > { %2496 = vmatpush.bf16.msrb.mxu2 %v5054_v61 }
 0x836   : > { %v2272_v0 = vpop.permute.xlu0 %2271 }
 0x837   : > { %v2278_v1 = vsel %vm2277_vm11, %v2276_v63, %v2272_v0  ;;  %v5639_v0 = vld [vmem:[%s7930_s1 + $0x74] sm:$0xf] }
 0x838   : > { %v2279_v2 = vpack.c.bf16 %v2278_v1, %v2278_v1  ;;  %v5046_v1 = vor.u32 %v5638_v62, %v5045_v59  ;;  %v5627_v62 = vld [vmem:[%s7930_s1 + $0x14] sm:$0xf] }
 0x83a   : > { %2352 = vmatmul.bf16.vlgmr.msrb.gmra.mxu1 %v2279_v2  ;;  %v5055_v2 = vld [vmem:[%s7930_s1 + $0x78] sm:$0xf0]  ;;  %2497 = vmatpush.bf16.msrb.mxu2 %v5046_v1 }
 0x84c   : > { %v2746_v3 = vpop.xlane.xlu2 %2745 }
 0x84d   : > { %v2747_v4 = vmul.f32 %v2746_v3, %v7271_v11 }
 0x84f   : > { %v2748_v5 = vadd.f32 1e-05, %v2747_v4  ;;  %v5037_v4 = vld [vmem:[%s7930_s1 + $0x50] sm:$0xf] }
 0x851   : > { %6069 = vrsqrt.f32 %v2748_v5  ;;  %vm2755_vm12 = vweird.f32 %v2748_v5 }
 0x857   : > { %v6070_v6 = vpop.eup %6069 }
 0x858   : > { %v2750_v7 = vmul.f32 %v6070_v6, %v2748_v5  ;;  %vm2756_vm13 = vweird.f32 %v6070_v6  ;;  %v5636_v5 = vld [vmem:[%s7930_s1 + $0x54] sm:$0xf0] }
 0x859   : > { %vm2757_vm14 = vmor %vm2755_vm12, %vm2756_vm13 }
 0x85a   : > { %v2751_v8 = vmul.f32 %v6070_v6, %v2750_v7  ;;  %v5038_v7 = vor.u32 %v5636_v5, %v5037_v4  ;;  %v4999_v4 = vld [vmem:[%s7930_s1 + $0x8] sm:$0xf0] }
 0x85c   : > { %v2752_v42 = vmul.f32 0.5, %v2751_v8  ;;  %v5029_v8 = vld [vmem:[%s7930_s1 + $0x40] sm:$0xf]  ;;  %2498 = vmatpush.bf16.msrb.mxu2 %v5038_v7  ;;  %v5670_v7 = vld [vmem:[%s7929_s2 + $0x68] sm:$0xf0] }
 0x85e   : > { %v2753_v57 = vsub.f32 1.5, %v2752_v42  ;;  %v5634_v42 = vld [vmem:[%s7930_s1 + $0x44] sm:$0xf0] }
 0x860   : > { %v2754_v9 = vmul.f32 %v6070_v6, %v2753_v57  ;;  %v5030_v57 = vor.u32 %v5634_v42, %v5029_v8 }
 0x862   : > { %v2758_v12 = vsel %vm2757_vm14, %v6070_v6, %v2754_v9  ;;  %v5058_v6 = vor.u32 %v5639_v0, %v5055_v2  ;;  %2499 = vmatpush.bf16.msrb.mxu2 %v5030_v57  ;;  %v5185_v0 = vld [vmem:[%s7929_s2 + $0x78] sm:$0xf]  ;;  %v5673_v2 = vld [vmem:[%s7929_s2 + $0x80] sm:$0xf0]  ;;  %v5161_v57 = vld [vmem:[%s7929_s2 + $0x48] sm:$0xf] }
 0x863   : > { %v2759_v13 = vmul.f32 %v2758_v12, %v2743_v49  ;;  %v5154_v49 = vor.u32 %v5663_v47, %v5151_v48  ;;  %v5626_v47 = vld [vmem:[%s7930_s1 + $0x4] sm:$0xf0]  ;;  %v5186_v5 = vor.u32 %v5673_v2, %v5185_v0  ;;  %v5677_v0 = vld [vmem:[%s7929_s2 + $0xa0] sm:$0xf0] }
 0x864   : > { %2509 = vmatpush.bf16.msrb.mxu0 %v5058_v6  ;;  %v5173_v6 = vld [vmem:[%s7929_s2 + $0x60] sm:$0xf] }
 0x865   : > { %v2763_v15 = vmul.f32 %v6027_v10, %v2759_v13  ;;  %v5174_v42 = vor.u32 %v5670_v7, %v5173_v6  ;;  %v5649_v2 = vld [vmem:[%s7933_s26 + $0x40] sm:$0xff] }
 0x867   : > { %v7405_v16 = vadd.f32 %v6028_v14, %v2763_v15 }
 0x869   : > { %2770 = vadd.xlane.f32.xlu1 %v7405_v16 }
 0x8b7   : > { %v2353_v18 = vpop.f32.mrf.mxu1 }
 0x8b8   : > { %v2357_v19 = vadd.f32 %v2353_v18, %v7277_v30  ;;  %v5678_v30 = vld [vmem:[%s7929_s2 + $0xac] sm:$0xf] }
 0x8b9   : > { %v5214_v27 = vor.u32 %v5678_v30, %v5211_v26  ;;  %v5021_v30 = vld [vmem:[%s7930_s1 + $0x30] sm:$0xf]  ;;  %v5632_v26 = vld [vmem:[%s7930_s1 + $0x34] sm:$0xf0] }
 0x8ba   : > { %v7410_v20 = vadd.f32 %v6029_v17, %v2357_v19  ;;  %v6030_v17 = vld [vmem:[#allocation2] ss:$0 sm:$0xff] }
 0x8bb   : > { %2980 = vmatpush.bf16.msra.mxu3 %v5214_v27  ;;  %v5022_v27 = vor.u32 %v5632_v26, %v5021_v30  ;;  %v5658_v30 = vld [vmem:[%s7929_s2 + $0x8] sm:$0xf0] }
 0x8bc   : > { %2365 = vadd.xlane.f32.xlu0 %v7410_v20 }
 0x8bd   : > { %2500 = vmatpush.bf16.msrb.mxu2 %v5022_v27 }
 0x8bf   : > { %v2355_v21 = vpop.f32.mrf.mxu1  ;;  %2981 = vmatpush.bf16.msra.mxu3 %v5202_v36  ;;  %v5635_v36 = vld [vmem:[%s7930_s1 + $0x54] sm:$0xf] }
 0x8c0   : > { %v6031_v21 = vld [vmem:[#allocation5] ss:$0 sm:$0xff]  ;;  %v5042_v38 = vor.u32 %v5635_v36, %v5039_v37 }
 0x8c3   : > { %2982 = vmatpush.bf16.msra.mxu3 %v5190_v39  ;;  %v5005_v39 = vld [vmem:[%s7930_s1 + $0x10] sm:$0xf] }
 0x8c4   : > { %v5006_v41 = vor.u32 %v5628_v40, %v5005_v39 }
 0x8c7   : > { %2983 = vmatpush.bf16.msra.mxu3 %v5178_v43  ;;  %v5633_v43 = vld [vmem:[%s7930_s1 + $0x44] sm:$0xf] }
 0x8c8   : > { %v5034_v45 = vor.u32 %v5633_v43, %v5031_v44  ;;  %v5648_v43 = vld [vmem:[%s7933_s26 + $0x38] sm:$0xff] }
 0x8c9   : > { %v5656_v44 = vld [vmem:[%s7933_s26 + $0x78] sm:$0xff] }
 0x8ca   : > { %2683 = vmatpush.bf16.msra.mxu1 %v5656_v44  ;;  %v7534_v44 = vld [vmem:[#allocation7] sm:$0x7] }
 0x8cb   : > { %2984 = vmatpush.bf16.msra.mxu3 %v5166_v46  ;;  %v4997_v46 = vld [vmem:[%s7930_s1] sm:$0xf] }
 0x8cc   : > { %v4998_v48 = vor.u32 %v5626_v47, %v4997_v46 }
 0x8cf   : > { %2985 = vmatpush.bf16.msra.mxu3 %v5154_v49  ;;  %v5631_v49 = vld [vmem:[%s7930_s1 + $0x34] sm:$0xf] }
 0x8d3   : > { %2986 = vmatpush.bf16.msra.mxu3 %v5142_v52  ;;  %v5026_v52 = vor.u32 %v5631_v49, %v5023_v50  ;;  %v5645_v49 = vld [vmem:[%s7933_s26 + $0x20] sm:$0xff]  ;;  %v5654_v50 = vld [vmem:[%s7933_s26 + $0x68] sm:$0xff] }
 0x8d7   : > { %2987 = vmatpush.bf16.msra.mxu3 %v5130_v55  ;;  %v5629_v55 = vld [vmem:[%s7930_s1 + $0x24] sm:$0xf] }
 0x8d8   : > { %v5018_v59 = vor.u32 %v5629_v55, %v5015_v56  ;;  %v5642_v55 = vld [vmem:[%s7933_s26 + $0x8] sm:$0xff]  ;;  %v5651_v56 = vld [vmem:[%s7933_s26 + $0x50] sm:$0xff] }
 0x8dc   : > { %v2771_v22 = vpop.xlane.xlu1 %2770 }
 0x8dd   : > { %v2772_v23 = vmul.f32 %v2771_v22, %v7271_v11 }
 0x8df   : > { %v7415_v24 = vsub.f32 %v7405_v16, %v2772_v23 }
 0x8e1   : > { %v2774_v25 = vmul.f32 %v7415_v24, %v7415_v24 }
 0x8e3   : > { %2775 = vadd.xlane.f32.xlu0 %v2774_v25 }
 0x92f   : > { %v2366_v28 = vpop.xlane.xlu0 %2365 }
 0x930   : > { %v2367_v31 = vmul.f32 %v2366_v28, %v7271_v11  ;;  %v5637_v28 = vld [vmem:[%s7930_s1 + $0x64] sm:$0xf] }
 0x932   : > { %v7423_v32 = vsub.f32 %v7410_v20, %v2367_v31  ;;  %v5047_v31 = vld [vmem:[%s7930_s1 + $0x68] sm:$0xf0] }
 0x934   : > { %v2369_v33 = vmul.f32 %v7423_v32, %v7423_v32 }
 0x936   : > { %2370 = vadd.xlane.f32.xlu2 %v2369_v33  ;;  %v5050_v33 = vor.u32 %v5637_v28, %v5047_v31 }
 0x938   : > { %2510 = vmatpush.bf16.msrb.mxu0 %v5050_v33 }
 0x93c   : > { %2511 = vmatpush.bf16.msrb.mxu0 %v5042_v38  ;;  %v6033_v38 = vld [vmem:[%s7932_s5] ss:$0 sm:$0xff] }
 0x940   : > { %2512 = vmatpush.bf16.msrb.mxu0 %v5034_v45  ;;  %v5647_v45 = vld [vmem:[%s7933_s26 + $0x30] sm:$0xff] }
 0x944   : > { %2513 = vmatpush.bf16.msrb.mxu0 %v5026_v52  ;;  %v5653_v52 = vld [vmem:[%s7933_s26 + $0x60] sm:$0xff] }
 0x948   : > { %2514 = vmatpush.bf16.msrb.mxu0 %v5018_v59  ;;  %v5217_v59 = vld [vmem:[%s7929_s2 + $0xb0] sm:$0xf] }
 0x956   : > { %v2776_v60 = vpop.xlane.xlu0 %2775 }
 0x957   : > { %v2777_v63 = vmul.f32 %v2776_v60, %v7271_v11  ;;  %v5676_v60 = vld [vmem:[%s7929_s2 + $0x98] sm:$0xf0] }
 0x958   : > { %v5198_v61 = vor.u32 %v5676_v60, %v5197_v58  ;;  %v5641_v58 = vld [vmem:[%s7933_s26] sm:$0xff]  ;;  %v5680_v60 = vld [vmem:[%s7929_s2 + $0xb8] sm:$0xf0] }
 0x959   : > { %v2778_v3 = vadd.f32 1e-05, %v2777_v63  ;;  %v5007_v63 = vld [vmem:[%s7930_s1 + $0x18] sm:$0xf0] }
 0x95a   : > { %v5010_v1 = vor.u32 %v5627_v62, %v5007_v63  ;;  %v5650_v62 = vld [vmem:[%s7933_s26 + $0x48] sm:$0xff]  ;;  %v5205_v63 = vld [vmem:[%s7929_s2 + $0x98] sm:$0xf] }
 0x95b   : > { %6071 = vrsqrt.f32 %v2778_v3  ;;  %vm2785_vm0 = vweird.f32 %v2778_v3 }
 0x95c   : > { %2515 = vmatpush.bf16.msrb.mxu0 %v5010_v1  ;;  %v5206_v1 = vor.u32 %v5677_v0, %v5205_v63 }
 0x961   : > { %v6072_v9 = vpop.eup %6071 }
 0x962   : > { %v2780_v10 = vmul.f32 %v6072_v9, %v2778_v3  ;;  %vm2786_vm15 = vweird.f32 %v6072_v9  ;;  %v5625_v3 = vld [vmem:[%s7930_s1 + $0x4] sm:$0xf] }
 0x963   : > { %vm2787_vm1 = vmor %vm2785_vm0, %vm2786_vm15  ;;  %v5002_v8 = vor.u32 %v5625_v3, %v4999_v4  ;;  %v5193_v3 = vld [vmem:[%s7929_s2 + $0x80] sm:$0xf]  ;;  %v5674_v4 = vld [vmem:[%s7929_s2 + $0x88] sm:$0xf0] }
 0x964   : > { %v2781_v12 = vmul.f32 %v6072_v9, %v2780_v10  ;;  %v5194_v6 = vor.u32 %v5674_v4, %v5193_v3 }
 0x965   : > { %2516 = vmatpush.bf16.msrb.mxu0 %v5002_v8  ;;  %v5181_v8 = vld [vmem:[%s7929_s2 + $0x68] sm:$0xf] }
 0x966   : > { %v2782_v13 = vmul.f32 0.5, %v2781_v12  ;;  %v5149_v12 = vld [vmem:[%s7929_s2 + $0x30] sm:$0xf] }
 0x968   : > { %v2783_v14 = vsub.f32 1.5, %v2782_v13  ;;  %v5664_v13 = vld [vmem:[%s7929_s2 + $0x38] sm:$0xf0] }
 0x969   : > { %2670 = vmatpush.bf16.msra.mxu0 %v5648_v43 }
 0x96a   : > { %v2784_v15 = vmul.f32 %v6072_v9, %v2783_v14 }
 0x96c   : > { %v2788_v18 = vsel %vm2787_vm1, %v6072_v9, %v2784_v15  ;;  %v5667_v9 = vld [vmem:[%s7929_s2 + $0x50] sm:$0xf0] }
 0x96d   : > { %v2789_v19 = vmul.f32 %v2788_v18, %v7415_v24  ;;  %v5013_v24 = vld [vmem:[%s7930_s1 + $0x20] sm:$0xf]  ;;  %v5162_v10 = vor.u32 %v5667_v9, %v5161_v57  ;;  %2671 = vmatpush.bf16.msra.mxu0 %v5647_v45  ;;  %s7946_s1 = sld [smem:[#allocation72_spill]] }
 0x96e   : > { %v5014_v35 = vor.u32 %v5630_v34, %v5013_v24 }
 0x96f   : > { %v2793_v22 = vmul.f32 %v6030_v17, %v2789_v19  ;;  %v5150_v17 = vor.u32 %v5664_v13, %v5149_v12  ;;  %v5137_v19 = vld [vmem:[%s7929_s2 + $0x18] sm:$0xf]  ;;  %v5169_v12 = vld [vmem:[%s7929_s2 + $0x50] sm:$0xf]  ;;  %v5668_v13 = vld [vmem:[%s7929_s2 + $0x58] sm:$0xf0] }
 0x970   : > { %2501 = vmatpush.bf16.msrb.mxu2 %v5014_v35  ;;  %v6032_v35 = vld [vmem:[%s7931_s7] ss:$0 sm:$0xff]  ;;  %s7936_s7 = sld [smem:[#allocation64_spill]] }
 0x971   : > { %v2797_v23 = vadd.f32 %v6031_v21, %v2793_v22  ;;  %v5661_v21 = vld [vmem:[%s7929_s2 + $0x20] sm:$0xf0] }
 0x972   : > { %v5138_v22 = vor.u32 %v5661_v21, %v5137_v19 }
 0x973   : > { %v7453_v25 = vpack.c.bf16 %v2797_v23, %v2797_v23  ;;  %v5125_v23 = vld [vmem:[%s7929_s2] sm:$0xf] }
 0x974   : > { %2502 = vmatpush.bf16.msrb.mxu2 %v5006_v41  ;;  %v5126_v26 = vor.u32 %v5658_v30, %v5125_v23 }
 0x975   : > { %2988 = vmatmul.bf16.vlgmr.msra.gmra.mxu3 %v7453_v25 }
 0x976   : > { %s7937_s5 = smov %s7936_s7 }
 0x978   : > { %2503 = vmatpush.bf16.msrb.mxu2 %v4998_v48  ;;  %v5655_v48 = vld [vmem:[%s7933_s26 + $0x70] sm:$0xff] }
 0x979   : > { %2684 = vmatpush.bf16.msra.mxu1 %v5655_v48  ;;  %v2833_v48 = vperm.slane %v7534_v44, 0 }
 0x97c   : > { %2967 = vmatpush.bf16.msra.mxu2 %v5210_v54  ;;  %v5652_v54 = vld [vmem:[%s7933_s26 + $0x58] sm:$0xff] }
 0x97d   : > { %2685 = vmatpush.bf16.msra.mxu1 %v5654_v50 }
 0x980   : > { %2968 = vmatpush.bf16.msra.mxu2 %v5198_v61  ;;  %v5218_v61 = vor.u32 %v5680_v60, %v5217_v59 }
 0x981   : > { %2686 = vmatpush.bf16.msra.mxu1 %v5653_v52 }
 0x984   : > { %2969 = vmatpush.bf16.msra.mxu2 %v5186_v5  ;;  %v2410_v5 = vld [vmem:[%s7934_s18] sm:$0x3]  ;;  %s7938_s18 = sld [smem:[#allocation65_spill]] }
 0x985   : > { %2687 = vmatpush.bf16.msra.mxu1 %v5652_v54  ;;  %v2413_v7 = vperm.slane %v2410_v5, 1  ;;  %v2412_v19 = vperm.slane %v2410_v5, 0 }
 0x988   : > { %2970 = vmatpush.bf16.msra.mxu2 %v5174_v42  ;;  %v5671_v42 = vld [vmem:[%s7929_s2 + $0x70] sm:$0xf0] }
 0x989   : > { %2688 = vmatpush.bf16.msra.mxu1 %v5651_v56  ;;  %v5182_v57 = vor.u32 %v5671_v42, %v5181_v8 }
 0x98c   : > { %2971 = vmatpush.bf16.msra.mxu2 %v5162_v10 }
 0x98d   : > { %2689 = vmatpush.bf16.msra.mxu1 %v5650_v62 }
 0x990   : > { %2972 = vmatpush.bf16.msra.mxu2 %v5150_v17  ;;  %v5665_v17 = vld [vmem:[%s7929_s2 + $0x40] sm:$0xf0] }
 0x991   : > { %2690 = vmatpush.bf16.msra.mxu1 %v5649_v2 }
 0x994   : > { %2973 = vmatpush.bf16.msra.mxu2 %v5138_v22 }
 0x998   : > { %2974 = vmatpush.bf16.msra.mxu2 %v5126_v26 }
 0x9a9   : > { %v2371_v14 = vpop.xlane.xlu2 %2370 }
 0x9aa   : > { %v2372_v15 = vmul.f32 %v2371_v14, %v7271_v11  ;;  %v5170_v14 = vor.u32 %v5668_v13, %v5169_v12 }
 0x9ac   : > { %v2373_v18 = vadd.f32 1e-05, %v2372_v15  ;;  %v5157_v15 = vld [vmem:[%s7929_s2 + $0x38] sm:$0xf] }
 0x9ad   : > { %v5158_v21 = vor.u32 %v5665_v17, %v5157_v15 }
 0x9ae   : > { %6073 = vrsqrt.f32 %v2373_v18  ;;  %vm2380_vm3 = vweird.f32 %v2373_v18 }
 0x9b4   : > { %v6074_v27 = vpop.eup %6073 }
 0x9b5   : > { %v2375_v28 = vmul.f32 %v6074_v27, %v2373_v18  ;;  %vm2381_vm2 = vweird.f32 %v6074_v27 }
 0x9b6   : > { %vm2382_vm4 = vmor %vm2380_vm3, %vm2381_vm2 }
 0x9b7   : > { %v2376_v31 = vmul.f32 %v6074_v27, %v2375_v28  ;;  %v5145_v28 = vld [vmem:[%s7929_s2 + $0x20] sm:$0xf] }
 0x9b9   : > { %v2377_v33 = vmul.f32 0.5, %v2376_v31  ;;  %v5662_v31 = vld [vmem:[%s7929_s2 + $0x28] sm:$0xf0] }
 0x9bb   : > { %v2378_v24 = vsub.f32 1.5, %v2377_v33 }
 0x9bd   : > { %v2379_v34 = vmul.f32 %v6074_v27, %v2378_v24 }
 0x9bf   : > { %v2383_v36 = vsel %vm2382_vm4, %v6074_v27, %v2379_v34  ;;  %v5146_v34 = vor.u32 %v5662_v31, %v5145_v28 }
 0x9c0   : > { %v2384_v37 = vmul.f32 %v2383_v36, %v7423_v32  ;;  %v5646_v32 = vld [vmem:[%s7933_s26 + $0x28] sm:$0xff] }
 0x9c1   : > { %2672 = vmatpush.bf16.msra.mxu0 %v5646_v32 }
 0x9c2   : > { %v2388_v39 = vmul.f32 %v6032_v35, %v2384_v37  ;;  %v5133_v37 = vld [vmem:[%s7929_s2 + $0x8] sm:$0xf] }
 0x9c4   : > { %v2392_v40 = vadd.f32 %v6033_v38, %v2388_v39  ;;  %v5659_v38 = vld [vmem:[%s7929_s2 + $0x10] sm:$0xf0]  ;;  %s7947_s2 = sld [smem:[#allocation73_spill]] }
 0x9c5   : > { %2673 = vmatpush.bf16.msra.mxu0 %v5645_v49 }
 0x9c6   : > { %v2393_v41 = vpack.c.bf16 %v2392_v40, %v2392_v40  ;;  %v5134_v40 = vor.u32 %v5659_v38, %v5133_v37 }
 0x9c8   : > { %2504 = vmatmul.bf16.vlgmr.msrb.gmra.mxu2 %v2393_v41  ;;  %2517 = vmatmul.bf16.vlgmr.msrb.gmra.mxu0 %v2393_v41 }
 0x9c9   : > { %2674 = vmatpush.bf16.msra.mxu0 %v5644_v51 }
 0x9cd   : > { %2675 = vmatpush.bf16.msra.mxu0 %v5643_v53 }
 0x9d1   : > { %2676 = vmatpush.bf16.msra.mxu0 %v5642_v55 }
 0x9d5   : > { %2677 = vmatpush.bf16.msra.mxu0 %v5641_v58 }
 0x9d8   : > { %2975 = vmatmul.bf16.vlgmr.msra.gmra.mxu2 %v7453_v25 }
 0x9d9   : > { %2993 = vmatpush.bf16.msrb.mxu0 %v5218_v61 }
 0x9dd   : > { %2994 = vmatpush.bf16.msrb.mxu0 %v5206_v1 }
 0x9e1   : > { %2995 = vmatpush.bf16.msrb.mxu0 %v5194_v6 }
 0x9e5   : > { %2996 = vmatpush.bf16.msrb.mxu0 %v5182_v57 }
 0x9e9   : > { %2997 = vmatpush.bf16.msrb.mxu0 %v5170_v14 }
 0x9ed   : > { %2998 = vmatpush.bf16.msrb.mxu0 %v5158_v21 }
 0x9f1   : > { %2999 = vmatpush.bf16.msrb.mxu0 %v5146_v34 }
 0x9f5   : > { %3000 = vmatpush.bf16.msrb.mxu0 %v5134_v40 }
 0x9f8   : > { %v7503_v46 = vpop.f32.mrf.mxu3 }
 0xa00   : > { %v2991_v47 = vpop.f32.mrf.mxu3 }
 0xa01   : > { %v2834_v47 = vperm.slane %v7534_v44, 1 }
 0xa03   : > { %v2990_v52 = vadd.f32 %v7503_v46, %v2834_v47 }
 0xa45   : > { %v2518_v9 = vpop.f32.mrf.mxu0 }
 0xa46   : > { %v2519_v10 = vadd.f32 %v2518_v9, %v2413_v7 }
 0xa48   : > { %v2523_v18 = vmul.f32 %v2519_v10, %v2519_v10 }
 0xa4a   : > { %v2525_v22 = vmul.f32 %v2523_v18, %v2519_v10 }
 0xa4b   : > { %v2505_v23 = vpop.f32.mrf.mxu2 }
 0xa4c   : > { %v2527_v30 = vmul.f32 0.044715, %v2525_v22  ;;  %v2506_v26 = vadd.f32 %v2505_v23, %v2412_v19  ;;  %v6745_v19 = vmov -1e+09  }
 0xa4d   : > { %v2520_v27 = vpop.f32.mrf.mxu0 }
 0xa4e   : > { %v2529_v33 = vadd.f32 %v2527_v30, %v2519_v10  ;;  %v2522_v24 = vmul.f32 %v2506_v26, %v2506_v26  ;;  %v2835_v27 = vperm.slane %v7534_v44, 2 }
 0xa50   : > { %v2531_v35 = vmul.f32 0.7978846, %v2529_v33  ;;  %v2524_v36 = vmul.f32 %v2522_v24, %v2506_v26 }
 0xa52   : > { %6075 = vtanh.f32 %v2531_v35  ;;  %v2526_v39 = vmul.f32 0.044715, %v2524_v36 }
 0xa53   : > { %v2507_v41 = vpop.f32.mrf.mxu2 }
 0xa54   : > { %v2528_v43 = vadd.f32 %v2526_v39, %v2506_v26 }
 0xa56   : > { %v2530_v45 = vmul.f32 0.7978846, %v2528_v43 }
 0xa58   : > { %v6076_v32 = vpop.eup %6075  ;;  %6077 = vtanh.f32 %v2530_v45 }
 0xa59   : > { %v2535_v49 = vadd.f32 1.0, %v6076_v32 }
 0xa5b   : > { %v2976_v50 = vpop.f32.mrf.mxu2  ;;  %v2537_v51 = vmul.f32 0.5, %v2535_v49 }
 0xa5c   : > { %v2977_v53 = vadd.f32 %v2976_v50, %v2833_v48 }
 0xa5d   : > { %v2539_v54 = vmul.f32 %v2537_v51, %v2519_v10 }
 0xa5e   : > { %v6078_v55 = vpop.eup %6077  ;;  %v3006_v56 = vpack.c.bf16 %v2990_v52, %v2977_v53 }
 0xa5f   : > { %v2541_v58 = vpack.c.bf16 %v2539_v54, %v2539_v54  ;;  %v2534_v59 = vadd.f32 1.0, %v6078_v55 }
 0xa60   : > { %v3009_v60 = vunpack.c.h.b16 %v3006_v56  ;;  %v3061_v61 = vunpack.c.l.b16 %v3006_v56 }
 0xa61   : > { %2691 = vmatmul.bf16.vlgmr.msra.gmra.mxu1 %v2541_v58  ;;  %v2536_v62 = vmul.f32 0.5, %v2534_v59 }
 0xa62   : > { %v3062_v63 = vpack.c.b16 %v3061_v61, %v3061_v61  ;;  %v3010_v0 = vpack.c.b16 %v3009_v60, %v3009_v60 }
 0xa63   : > { %v2978_v1 = vpop.f32.mrf.mxu2  ;;  %v2538_v2 = vmul.f32 %v2536_v62, %v2506_v26 }
 0xa64   : > { %3063 = vrot.lane.b32.xlu2 %v3062_v63, %s6742_s15  ;;  %3124 = vrot.lane.b32.xlu0 %v3010_v0, %s6743_s11  ;;  %v3015_v46 = vsel %vm2036_vm7, %v3010_v0, 0 }
 0xa65   : > { %3065 = vrot.lane.b32.xlu1 %v3010_v0, %s6742_s15  ;;  %3024 = vmatpush.bf16.xpose.msrb.mxu1 %v3015_v46  ;;  %v2540_v3 = vpack.c.bf16 %v2538_v2, %v2538_v2 }
 0xa67   : > { %2678 = vmatmul.bf16.vlgmr.msra.gmra.mxu0 %v2540_v3 }
 0xa6c   : > { %3178 = vrot.lane.b32.xlu2 %v3062_v63, %s6744_s23  ;;  %3122 = vrot.lane.b32.xlu0 %v3062_v63, %s6743_s11 }
 0xa6d   : > { %3180 = vrot.lane.b32.xlu1 %v3010_v0, %s6744_s23 }
 0xa71   : > { %5219 = vmatmul.msk.bf16.vlgmr.msrb.gmra.mxu1 %vm2036_vm7, %v3006_v56 }
 0xa77   : > { %3001 = vmatmul.bf16.vlgmr.msrb.gmra.mxu0 %v7453_v25  ;;  %v1745_v25 = vlaneseq }
 0xa79   : > { %v1746_v14 = vshrl.u32 %v1745_v25, 7  ;;  %v7555_v15 = vand.u32 127, %v1745_v25 }
 0xa7b   : > { %vm1749_vm5 = vcmp.le.s32.totalorder %v7555_v15, %v1746_v14 }
 0xa7c   : > { %v1750_v21 = vsel %vm1749_vm5, 0.0, %v6745_v19  ;;  %vm4464_vm5 = vcmask 7168  }
 0xabe   : > { %v3064_v57 = vpop.permute.xlu2 %3063 }
 0xac6   : > { %v3179_v23 = vpop.permute.xlu2 %3178 }
 0xad6   : > { %v3125_v4 = vpop.permute.xlu0 %3124 }
 0xad7   : > { %v3130_v5 = vsel %vm2036_vm7, %v3125_v4, 0  ;;  %v3066_v6 = vpop.permute.xlu1 %3065 }
 0xad8   : > { %v3071_v7 = vsel %vm2036_vm7, %v3066_v6, 0  ;;  %3139 = vmatpush.bf16.xpose.msra.mxu1 %v3130_v5 }
 0xad9   : > { %3080 = vmatpush.bf16.xpose.msrb.mxu3 %v3071_v7 }
 0xade   : > { %v3123_v8 = vpop.permute.xlu0 %3122  ;;  %v2692_v42 = vpop.f32.mrf.mxu1 }
 0xadf   : > { %v3181_v9 = vpop.permute.xlu1 %3180  ;;  %5223 = vmatmul.msk.bf16.vlgmr.msra.gmra.mxu1 %vm2036_vm7, %v3123_v8 }
 0xae0   : > { %v3186_v10 = vsel %vm2036_vm7, %v3181_v9, 0  ;;  %5221 = vmatmul.msk.bf16.vlgmr.msrb.gmra.mxu3 %vm2036_vm7, %v3064_v57 }
 0xae1   : > { %3195 = vmatpush.bf16.xpose.msra.mxu3 %v3186_v10 }
 0xae4   : > { %v2679_v12 = vpop.f32.mrf.mxu0 }
 0xae5   : > { %v7553_v13 = vadd.f32 %v2692_v42, %v2679_v12  ;;  %v6034_v12 = vld [vmem:[%s7935_s4] ss:$0 sm:$0xff]  ;;  %s7939_s4 = sld [smem:[#allocation56_spill]] }
 0xae6   : > { %v2694_v17 = vpop.f32.mrf.mxu1 }
 0xae7   : > { %v2696_v25 = vadd.f32 %v7553_v13, %v7410_v20 }
 0xae9   : > { %v2701_v14 = vadd.f32 %v6034_v12, %v2696_v25  ;;  %v5707_v25 = vld [vmem:[%s7938_s18 + $0x54] sm:$0xf] }
 0xaec   : > { %v2681_v18 = vpop.f32.mrf.mxu0 }
 0xaee   : > { %v3026_v22 = vpop.f32.mrf.mxu1 }
 0xaef   : > { %v3027_v30 = vadd.f32 %v3026_v22, %v1750_v21 }
 0xaf0   : > { %5225 = vmatmul.msk.bf16.vlgmr.msra.gmra.mxu3 %vm2036_vm7, %v3179_v23 }
 0xaf1   : > { %v3030_v26 = vsel %vm2056_vm9, %v3027_v30, -inf }
 0xaf2   : > { %3031 = vmax.xlane.f32.xlu1 %v3030_v26 }
 0xaf4   : > { %v3002_v28 = vpop.f32.mrf.mxu0 }
 0xaf5   : > { %v3003_v31 = vadd.f32 %v3002_v28, %v2835_v27 }
 0xaf6   : > { %v3028_v33 = vpop.f32.mrf.mxu1 }
 0xaf7   : > { %v3007_v24 = vpack.c.bf16 %v3003_v31, %v3003_v31 }
 0xaf9   : > { %v3046_v34 = vsel %vm2072_vm8, %v3007_v24, 0  ;;  %v3099_v54 = vunpack.c.l.b16 %v3007_v24 }
 0xafa   : > { %3055 = vmatpush.bf16.msrb.mxu2 %v3046_v34 }
 0xafb   : > { %v3100_v55 = vpack.c.b16 %v3099_v54, %v3099_v54  ;;  %v5682_v54 = vld [vmem:[%s7937_s5 + $0x8] sm:$0xff] }
 0xafc   : > { %v3004_v35 = vpop.f32.mrf.mxu0 }
 0xb5c   : > { %v3141_v36 = vpop.f32.mrf.mxu1 }
 0xb5d   : > { %v3142_v37 = vadd.f32 %v3141_v36, %v1750_v21 }
 0xb5f   : > { %v3145_v38 = vsel %vm2056_vm9, %v3142_v37, -inf }
 0xb60   : > { %3146 = vmax.xlane.f32.xlu2 %v3145_v38 }
 0xb63   : > { %v3082_v39 = vpop.f32.mrf.mxu3 }
 0xb64   : > { %v3083_v40 = vadd.f32 %v3082_v39, %v1750_v21  ;;  %v3143_v41 = vpop.f32.mrf.mxu1 }
 0xb65   : > { %v3032_v43 = vpop.xlane.xlu1 %3031 }
 0xb66   : > { %v3033_v45 = vsub.f32 %v3027_v30, %v3032_v43  ;;  %v3086_v44 = vsel %vm2056_vm9, %v3083_v40, -inf }
 0xb67   : > { %3087 = vmax.xlane.f32.xlu0 %v3086_v44  ;;  %v5687_v44 = vld [vmem:[%s7937_s5 + $0x30] sm:$0xff] }
 0xb68   : > { %v3034_v32 = vmul.f32 1.442695, %v3033_v45  ;;  %v5688_v45 = vld [vmem:[%s7936_s7 + $0x38] sm:$0xff]  ;;  %s7940_s7 = sld [smem:[#allocation57_spill]] }
 0xb69   : > { %3314 = vmatpush.bf16.msrb.mxu1 %v5688_v45 }
 0xb6a   : > { %6079 = vpow2.f32 %v3034_v32  ;;  %v5686_v32 = vld [vmem:[%s7937_s5 + $0x28] sm:$0xff] }
 0xb6b   : > { %v3084_v47 = vpop.f32.mrf.mxu3 }
 0xb6d   : > { %3315 = vmatpush.bf16.msrb.mxu1 %v5687_v44  ;;  %v5293_v44 = vld [vmem:[%s7938_s18] sm:$0xf] }
 0xb70   : > { %v6080_v48 = vpop.eup %6079 }
 0xb71   : > { %v3036_v49 = vsel %vm2056_vm9, %v6080_v48, 0.0  ;;  %3316 = vmatpush.bf16.msrb.mxu1 %v5686_v32  ;;  %v5698_v32 = vld [vmem:[%s7938_s18 + $0x4] sm:$0xf0] }
 0xb72   : > { %3037 = vadd.xlane.f32.xlu0 %v3036_v49 }
 0xb73   : > { %v3197_v50 = vpop.f32.mrf.mxu3 }
 0xb74   : > { %v3198_v51 = vadd.f32 %v3197_v50, %v1750_v21 }
 0xb76   : > { %v3201_v52 = vsel %vm2056_vm9, %v3198_v51, -inf }
 0xb77   : > { %3202 = vmax.xlane.f32.xlu1 %v3201_v52  ;;  %v5684_v52 = vld [vmem:[%s7937_s5 + $0x18] sm:$0xff] }
 0xb7b   : > { %v3199_v53 = vpop.f32.mrf.mxu3 }
 0xb7c   : > { %v5683_v53 = vld [vmem:[%s7937_s5 + $0x10] sm:$0xff] }
 0xb90   : > { %3101 = vrot.lane.b32.xlu1 %v3100_v55, %s6742_s15 }
 0xbd3   : > { %v3147_v56 = vpop.xlane.xlu2 %3146 }
 0xbd4   : > { %v3148_v58 = vsub.f32 %v3142_v37, %v3147_v56  ;;  %v5349_v56 = vld [vmem:[%s7938_s18 + $0x70] sm:$0xf] }
 0xbd6   : > { %v3149_v59 = vmul.f32 1.442695, %v3148_v58  ;;  %v5712_v58 = vld [vmem:[%s7938_s18 + $0x74] sm:$0xf0] }
 0xbd8   : > { %6081 = vpow2.f32 %v3149_v59  ;;  %v5711_v59 = vld [vmem:[%s7938_s18 + $0x74] sm:$0xf] }
 0xbda   : > { %v3088_v60 = vpop.xlane.xlu0 %3087 }
 0xbdb   : > { %v3089_v61 = vsub.f32 %v3083_v40, %v3088_v60  ;;  %v5350_v60 = vor.u32 %v5712_v58, %v5349_v56 }
 0xbdd   : > { %v3090_v62 = vmul.f32 1.442695, %v3089_v61  ;;  %v5351_v61 = vld [vmem:[%s7938_s18 + $0x78] sm:$0xf0]  ;;  %3548 = vmatpush.bf16.msrb.mxu3 %v5350_v60 }
 0xbde   : > { %v6082_v63 = vpop.eup %6081 }
 0xbdf   : > { %6083 = vpow2.f32 %v3090_v62  ;;  %v3151_v0 = vsel %vm2056_vm9, %v6082_v63, 0.0  ;;  %v5354_v62 = vor.u32 %v5711_v59, %v5351_v61 }
 0xbe0   : > { %3152 = vadd.xlane.f32.xlu0 %v3151_v0 }
 0xbe5   : > { %v6084_v1 = vpop.eup %6083  ;;  %v3038_v2 = vpop.xlane.xlu0 %3037 }
 0xbe6   : > { %6085 = vrcp.f32 %v3038_v2  ;;  %v3092_v46 = vsel %vm2056_vm9, %v6084_v1, 0.0 }
 0xbe7   : > { %3093 = vadd.xlane.f32.xlu2 %v3092_v46 }
 0xbea   : > { %v3203_v3 = vpop.xlane.xlu1 %3202 }
 0xbeb   : > { %v3204_v4 = vsub.f32 %v3198_v51, %v3203_v3  ;;  %v5685_v51 = vld [vmem:[%s7937_s5 + $0x20] sm:$0xff] }
 0xbec   : > { %v6086_v5 = vpop.eup %6085  ;;  %3317 = vmatpush.bf16.msrb.mxu1 %v5685_v51 }
 0xbed   : > { %v3040_v6 = vmul.f32 %v6086_v5, %v6080_v48  ;;  %v3205_v7 = vmul.f32 1.442695, %v3204_v4  ;;  %v5341_v5 = vld [vmem:[%s7938_s18 + $0x60] sm:$0xf] }
 0xbef   : > { %v3041_v8 = vpack.c.bf16 %v3040_v6, %v3040_v6  ;;  %6087 = vpow2.f32 %v3205_v7  ;;  %v5710_v6 = vld [vmem:[%s7938_s18 + $0x64] sm:$0xf0]  ;;  %v5709_v7 = vld [vmem:[%s7938_s18 + $0x64] sm:$0xf] }
 0xbf0   : > { %3318 = vmatpush.bf16.msrb.mxu1 %v5684_v52 }
 0xbf1   : > { %5220 = vmatmul.msk.bf16.vlgmr.msrb.gmra.mxu2 %vm2056_vm9, %v3041_v8  ;;  %v5342_v8 = vor.u32 %v5710_v6, %v5341_v5  ;;  %v5695_v5 = vld [vmem:[#allocation13 + $0x30] sm:$0xff]  ;;  %v5694_v6 = vld [vmem:[#allocation13 + $0x28] sm:$0xff] }
 0xbf3   : > { %3549 = vmatpush.bf16.msrb.mxu3 %v5342_v8  ;;  %v6037_v8 = vld [vmem:[#allocation8] ss:$0 sm:$0xff] }
 0xbf4   : > { %3157 = vrot.lane.b32.xlu0 %v3100_v55, %s6743_s11  ;;  %3319 = vmatpush.bf16.msrb.mxu1 %v5683_v53 }
 0xbf5   : > { %v6088_v42 = vpop.eup %6087 }
 0xbf6   : > { %v3207_v57 = vsel %vm2056_vm9, %v6088_v42, 0.0 }
 0xbf7   : > { %3208 = vadd.xlane.f32.xlu2 %v3207_v57 }
 0xbf8   : > { %3320 = vmatpush.bf16.msrb.mxu1 %v5682_v54 }
 0xc02   : > { %v3102_v9 = vpop.permute.xlu1 %3101 }
 0xc03   : > { %v3107_v10 = vsel %vm2072_vm8, %v3102_v9, 0  ;;  %v5333_v9 = vld [vmem:[%s7938_s18 + $0x50] sm:$0xf] }
 0xc04   : > { %3116 = vmatpush.bf16.msra.mxu0 %v3107_v10  ;;  %v5708_v10 = vld [vmem:[%s7938_s18 + $0x54] sm:$0xf0] }
 0xc05   : > { %v5334_v12 = vor.u32 %v5708_v10, %v5333_v9  ;;  %v5692_v10 = vld [vmem:[#allocation13 + $0x18] sm:$0xff] }
 0xc07   : > { %3550 = vmatpush.bf16.msrb.mxu3 %v5334_v12  ;;  %v5690_v12 = vld [vmem:[#allocation13 + $0x8] sm:$0xff] }
 0xc0f   : > { %3213 = vrot.lane.b32.xlu2 %v3100_v55, %s6744_s23  ;;  %v5681_v55 = vld [vmem:[%s7937_s5] sm:$0xff]  ;;  %s7950_s5 = sand.u32 1, %s6665_s10  }
 0xc10   : > { %3321 = vmatpush.bf16.msrb.mxu1 %v5681_v55  ;;  %s4494_s6 = scalar_lea.sflag [#allocation4], %s7950_s5 }
 0xc38   : > { %2704 = vadd.xlane.f32.xlu2 %v2701_v14 }
 0xc53   : > { %v3153_v17 = vpop.xlane.xlu0 %3152 }
 0xc5a   : > { %v3094_v18 = vpop.xlane.xlu2 %3093 }
 0xc5b   : > { %6089 = vrcp.f32 %v3094_v18  ;;  %v5325_v18 = vld [vmem:[%s7938_s18 + $0x40] sm:$0xf] }
 0xc5c   : > { %6091 = vrcp.f32 %v3153_v17 }
 0xc61   : > { %v6090_v19 = vpop.eup %6089 }
 0xc62   : > { %v6092_v21 = vpop.eup %6091  ;;  %v3096_v22 = vmul.f32 %v6090_v19, %v6084_v1  ;;  %v5706_v19 = vld [vmem:[%s7938_s18 + $0x44] sm:$0xf0] }
 0xc63   : > { %v3155_v30 = vmul.f32 %v6092_v21, %v6082_v63  ;;  %v5705_v21 = vld [vmem:[%s7938_s18 + $0x44] sm:$0xf] }
 0xc64   : > { %v3097_v23 = vpack.c.bf16 %v3096_v22, %v3096_v22  ;;  %v5326_v22 = vor.u32 %v5706_v19, %v5325_v18 }
 0xc65   : > { %v3156_v28 = vpack.c.bf16 %v3155_v30, %v3155_v30 }
 0xc66   : > { %5222 = vmatmul.msk.bf16.vlgmr.msra.gmra.mxu0 %vm2056_vm9, %v3097_v23  ;;  %v3158_v26 = vpop.permute.xlu0 %3157  ;;  %v5327_v23 = vld [vmem:[%s7938_s18 + $0x48] sm:$0xf0]  ;;  %3551 = vmatpush.bf16.msrb.mxu3 %v5326_v22 }
 0xc67   : > { %v3163_v27 = vsel %vm2072_vm8, %v3158_v26, 0  ;;  %v5330_v30 = vor.u32 %v5705_v21, %v5327_v23  ;;  %v5317_v26 = vld [vmem:[%s7938_s18 + $0x30] sm:$0xf] }
 0xc68   : > { %3172 = vmatpush.bf16.msra.mxu2 %v3163_v27  ;;  %v5704_v27 = vld [vmem:[%s7938_s18 + $0x34] sm:$0xf0] }
 0xc6a   : > { %v3209_v20 = vpop.xlane.xlu2 %3208 }
 0xc6b   : > { %6093 = vrcp.f32 %v3209_v20  ;;  %5224 = vmatmul.msk.bf16.vlgmr.msra.gmra.mxu2 %vm2056_vm9, %v3156_v28  ;;  %v5703_v28 = vld [vmem:[%s7938_s18 + $0x34] sm:$0xf]  ;;  %v5318_v20 = vor.u32 %v5704_v27, %v5317_v26 }
 0xc6d   : > { %3552 = vmatpush.bf16.msrb.mxu3 %v5318_v20 }
 0xc71   : > { %v6094_v13 = vpop.eup %6093 }
 0xc72   : > { %v3211_v31 = vmul.f32 %v6094_v13, %v6088_v42  ;;  %v3214_v33 = vpop.permute.xlu2 %3213  ;;  %v5343_v42 = vld [vmem:[%s7938_s18 + $0x68] sm:$0xf0]  ;;  %v5319_v13 = vld [vmem:[%s7938_s18 + $0x38] sm:$0xf0] }
 0xc73   : > { %v3219_v24 = vsel %vm2072_vm8, %v3214_v33, 0  ;;  %v5346_v57 = vor.u32 %v5709_v7, %v5343_v42  ;;  %v5309_v33 = vld [vmem:[%s7938_s18 + $0x20] sm:$0xf]  ;;  %v5693_v7 = vld [vmem:[#allocation13 + $0x20] sm:$0xff] }
 0xc74   : > { %v3212_v34 = vpack.c.bf16 %v3211_v31, %v3211_v31  ;;  %3228 = vmatpush.bf16.msrb.mxu0 %v3219_v24  ;;  %v3057_v35 = vpop.f32.mrf.mxu2  ;;  %v5322_v31 = vor.u32 %v5703_v28, %v5319_v13  ;;  %v5702_v24 = vld [vmem:[%s7938_s18 + $0x24] sm:$0xf0] }
 0xc77   : > { %5226 = vmatmul.msk.bf16.vlgmr.msrb.gmra.mxu0 %vm2056_vm9, %v3212_v34  ;;  %v5701_v34 = vld [vmem:[%s7938_s18 + $0x24] sm:$0xf] }
 0xc78   : > { %3561 = vmatpush.bf16.msra.mxu0 %v5354_v62  ;;  %v6035_v62 = vld [vmem:[%s7939_s4] ss:$0 sm:$0xff] }
 0xc7c   : > { %v3059_v36 = vpop.f32.mrf.mxu2  ;;  %3562 = vmatpush.bf16.msra.mxu0 %v5346_v57 }
 0xc7d   : > { %v5311_v36 = vld [vmem:[%s7938_s18 + $0x28] sm:$0xf0] }
 0xcab   : > { %v2705_v47 = vpop.xlane.xlu2 %2704 }
 0xcac   : > { %v2706_v48 = vmul.f32 %v2705_v47, %v7271_v11  ;;  %v5697_v47 = vld [vmem:[%s7938_s18 + $0x4] sm:$0xf] }
 0xcae   : > { %v7589_v49 = vsub.f32 %v2701_v14, %v2706_v48  ;;  %v5335_v14 = vld [vmem:[%s7938_s18 + $0x58] sm:$0xf0]  ;;  %v5294_v48 = vor.u32 %v5698_v32, %v5293_v44 }
 0xcaf   : > { %v5338_v17 = vor.u32 %v5707_v25, %v5335_v14  ;;  %v5691_v25 = vld [vmem:[#allocation13 + $0x10] sm:$0xff]  ;;  %v5689_v14 = vld [vmem:[#allocation13] sm:$0xff] }
 0xcb0   : > { %v2708_v50 = vmul.f32 %v7589_v49, %v7589_v49 }
 0xcb1   : > { %3563 = vmatpush.bf16.msra.mxu0 %v5338_v17  ;;  %v3462_v17 = vld [vmem:[#allocation16] sm:$0x3] }
 0xcb2   : > { %v3465_v19 = vperm.slane %v3462_v17, 1  ;;  %v3464_v21 = vperm.slane %v3462_v17, 0 }
 0xcb5   : > { %3564 = vmatpush.bf16.msra.mxu0 %v5330_v30 }
 0xcb9   : > { %3565 = vmatpush.bf16.msra.mxu0 %v5322_v31 }
 0xce3   : > { %v3118_v37 = vpop.f32.mrf.mxu0 }
 0xce4   : > { %3235 = vrot.lane.b32.xlu1 %v3118_v37, %s6744_s23  ;;  %v5314_v37 = vor.u32 %v5701_v34, %v5311_v36 }
 0xce6   : > { %3566 = vmatpush.bf16.msra.mxu0 %v5314_v37 }
 0xceb   : > { %v3120_v38 = vpop.f32.mrf.mxu0 }
 0xcec   : > { %v5301_v38 = vld [vmem:[%s7938_s18 + $0x10] sm:$0xf] }
 0xcee   : > { %v3174_v39 = vpop.f32.mrf.mxu2 }
 0xcef   : > { %3239 = vrot.lane.b32.xlu0 %v3174_v39, %s6743_s11  ;;  %v5700_v39 = vld [vmem:[%s7938_s18 + $0x14] sm:$0xf0] }
 0xcf4   : > { %v3230_v40 = vpop.f32.mrf.mxu0 }
 0xcf5   : > { %3243 = vrot.lane.b32.xlu1 %v3230_v40, %s6742_s15  ;;  %v5699_v40 = vld [vmem:[%s7938_s18 + $0x14] sm:$0xf] }
 0xcf6   : > { %v3176_v41 = vpop.f32.mrf.mxu2 }
 0xcf7   : > { %v5302_v41 = vor.u32 %v5700_v39, %v5301_v38 }
 0xcfc   : > { %v3232_v43 = vpop.f32.mrf.mxu0 }
 0xcfd   : > { %v5303_v43 = vld [vmem:[%s7938_s18 + $0x18] sm:$0xf0] }
 0xcfe   : > { %v5306_v45 = vor.u32 %v5699_v40, %v5303_v43 }
 0xd00   : > { %3567 = vmatpush.bf16.msra.mxu0 %v5306_v45 }
 0xd1f   : > { %2709 = vadd.xlane.f32.xlu1 %v2708_v50  ;;  %v5295_v50 = vld [vmem:[%s7938_s18 + $0x8] sm:$0xf0] }
 0xd20   : > { %v5298_v51 = vor.u32 %v5697_v47, %v5295_v50 }
 0xd22   : > { %3568 = vmatpush.bf16.msra.mxu0 %v5298_v51 }
 0xd56   : > { %v3236_v63 = vpop.permute.xlu1 %3235 }
 0xd57   : > { %v3246_v1 = vsel %vm2036_vm7, %v3057_v35, %v3236_v63  ;;  %v5310_v35 = vor.u32 %v5702_v24, %v5309_v33 }
 0xd59   : > { %3553 = vmatpush.bf16.msrb.mxu3 %v5310_v35 }
 0xd5d   : > { %3554 = vmatpush.bf16.msrb.mxu3 %v5302_v41 }
 0xd61   : > { %v3240_v0 = vpop.permute.xlu0 %3239  ;;  %3555 = vmatpush.bf16.msrb.mxu3 %v5294_v48 }
 0xd62   : > { %v3247_v2 = vsel %vm2275_vm10, %v3246_v1, %v3240_v0  ;;  %v6036_v1 = vld [vmem:[%s7940_s7] ss:$0 sm:$0xff]  ;;  %s7945_s7 = sld [smem:[#allocation39_spill]] }
 0xd67   : > { %v3244_v46 = vpop.permute.xlu1 %3243 }
 0xd68   : > { %v3248_v3 = vsel %vm2277_vm11, %v3247_v2, %v3244_v46 }
 0xd69   : > { %v3249_v4 = vpack.c.bf16 %v3248_v3, %v3248_v3 }
 0xd6b   : > { %3322 = vmatmul.bf16.vlgmr.msrb.gmra.mxu1 %v3249_v4  ;;  %v5696_v4 = vld [vmem:[#allocation13 + $0x38] sm:$0xff] }
 0xd6c   : > { %3432 = vmatpush.bf16.msrb.mxu2 %v5696_v4 }
 0xd70   : > { %3433 = vmatpush.bf16.msrb.mxu2 %v5695_v5 }
 0xd74   : > { %3434 = vmatpush.bf16.msrb.mxu2 %v5694_v6 }
 0xd78   : > { %3435 = vmatpush.bf16.msrb.mxu2 %v5693_v7 }
 0xd7c   : > { %3436 = vmatpush.bf16.msrb.mxu2 %v5692_v10 }
 0xd80   : > { %3437 = vmatpush.bf16.msrb.mxu2 %v5691_v25 }
 0xd84   : > { %3438 = vmatpush.bf16.msrb.mxu2 %v5690_v12 }
 0xd88   : > { %3439 = vmatpush.bf16.msrb.mxu2 %v5689_v14 }
 0xd92   : > { %v2710_v52 = vpop.xlane.xlu1 %2709 }
 0xd93   : > { %v2711_v53 = vmul.f32 %v2710_v52, %v7271_v11 }
 0xd95   : > { %v2712_v54 = vadd.f32 1e-05, %v2711_v53 }
 0xd97   : > { %6095 = vrsqrt.f32 %v2712_v54  ;;  %vm2719_vm12 = vweird.f32 %v2712_v54 }
 0xd9d   : > { %v6096_v55 = vpop.eup %6095 }
 0xd9e   : > { %v2714_v56 = vmul.f32 %v6096_v55, %v2712_v54  ;;  %vm2720_vm6 = vweird.f32 %v6096_v55 }
 0xd9f   : > { %vm2721_vm13 = vmor %vm2719_vm12, %vm2720_vm6 }
 0xda0   : > { %v2715_v58 = vmul.f32 %v6096_v55, %v2714_v56 }
 0xda2   : > { %v2716_v59 = vmul.f32 0.5, %v2715_v58 }
 0xda4   : > { %v2717_v60 = vsub.f32 1.5, %v2716_v59  ;;  %v6039_v59 = vld [vmem:[#allocation11] ss:$0 sm:$0xff] }
 0xda6   : > { %v2718_v61 = vmul.f32 %v6096_v55, %v2717_v60 }
 0xda8   : > { %v2722_v63 = vsel %vm2721_vm13, %v6096_v55, %v2718_v61  ;;  %v6038_v55 = vld [vmem:[#allocation10] ss:$0 sm:$0xff] }
 0xda9   : > { %v2723_v0 = vmul.f32 %v2722_v63, %v7589_v49  ;;  %v6040_v63 = vld [vmem:[#allocation14] ss:$0 sm:$0xff] }
 0xdab   : > { %v2727_v2 = vmul.f32 %v6035_v62, %v2723_v0 }
 0xdad   : > { %v2731_v46 = vadd.f32 %v6036_v1, %v2727_v2 }
 0xdaf   : > { %v2732_v3 = vpack.c.bf16 %v2731_v46, %v2731_v46 }
 0xdb1   : > { %3556 = vmatmul.bf16.vlgmr.msrb.gmra.mxu3 %v2732_v3  ;;  %3569 = vmatmul.bf16.vlgmr.msra.gmra.mxu0 %v2732_v3 }
 0xde8   : > { %v3323_v42 = vpop.f32.mrf.mxu1 }
 0xde9   : > { %v3327_v57 = vadd.f32 %v3323_v42, %v7405_v16 }
 0xdeb   : > { %v7638_v9 = vadd.f32 %v6037_v8, %v3327_v57 }
 0xded   : > { %3335 = vadd.xlane.f32.xlu0 %v7638_v9 }
 0xdf0   : > { %v3325_v49 = vpop.f32.mrf.mxu1 }
 0xe2e   : > { %v3570_v18 = vpop.f32.mrf.mxu0 }
 0xe2f   : > { %v3571_v23 = vadd.f32 %v3570_v18, %v3465_v19 }
 0xe34   : > { %v3557_v22 = vpop.f32.mrf.mxu3 }
 0xe35   : > { %v3558_v16 = vadd.f32 %v3557_v22, %v3464_v21 }
 0xe36   : > { %v3572_v30 = vpop.f32.mrf.mxu0 }
 0xe37   : > { %v3574_v26 = vpack.c.bf16 %v3571_v23, %v3558_v16 }
 0xe39   : > { %v3607_v27 = vunpack.c.h.b16 %v3574_v26  ;;  %v3579_v28 = vsel %vm2036_vm7, %v3574_v26, 0  ;;  %v3633_v20 = vunpack.c.l.b16 %v3574_v26 }
 0xe3a   : > { %3588 = vmatpush.bf16.xpose.msra.mxu1 %v3579_v28 }
 0xe3b   : > { %v7642_v13 = vpack.c.b16 %v3607_v27, %v3607_v27  ;;  %v3634_v31 = vpack.c.b16 %v3633_v20, %v3633_v20 }
 0xe3c   : > { %v3559_v33 = vpop.f32.mrf.mxu3 }
 0xe3d   : > { %3635 = vrot.lane.b32.xlu0 %v3634_v31, %s6742_s15  ;;  %v3613_v24 = vsel %vm2072_vm8, %v7642_v13, 0 }
 0xe3e   : > { %3622 = vmatpush.bf16.msra.mxu2 %v3613_v24 }
 0xe45   : > { %3747 = vrot.lane.b32.xlu0 %v3634_v31, %s6744_s23 }
 0xe60   : > { %v3336_v34 = vpop.xlane.xlu0 %3335 }
 0xe61   : > { %v3337_v35 = vmul.f32 %v3336_v34, %v7271_v11 }
 0xe63   : > { %v3338_v36 = vsub.f32 %v7638_v9, %v3337_v35 }
 0xe65   : > { %v3339_v37 = vmul.f32 %v3338_v36, %v3338_v36 }
 0xe67   : > { %3340 = vadd.xlane.f32.xlu2 %v3339_v37 }
 0xe7f   : > { %3691 = vrot.lane.b32.xlu2 %v3634_v31, %s6743_s11 }
 0xeaf   : > { %v3636_v38 = vpop.permute.xlu0 %3635 }
 0xeb0   : > { %v3641_v39 = vsel %vm2036_vm7, %v3636_v38, 0 }
 0xeb1   : > { %3650 = vmatpush.bf16.xpose.msra.mxu3 %v3641_v39 }
 0xeb7   : > { %v3748_v40 = vpop.permute.xlu0 %3747 }
 0xeb8   : > { %v3753_v41 = vsel %vm2036_vm7, %v3748_v40, 0 }
 0xeb9   : > { %3762 = vmatpush.bf16.xpose.msrb.mxu3 %v3753_v41 }
 0xeda   : > { %v3341_v43 = vpop.xlane.xlu2 %3340 }
 0xedb   : > { %v3342_v45 = vmul.f32 %v3341_v43, %v7271_v11 }
 0xedd   : > { %v3343_v44 = vadd.f32 1e-05, %v3342_v45 }
 0xedf   : > { %6097 = vrsqrt.f32 %v3343_v44  ;;  %vm3350_vm15 = vweird.f32 %v3343_v44 }
 0xee2   : > { %v3692_v32 = vpop.permute.xlu2 %3691 }
 0xee3   : > { %v3697_v47 = vsel %vm2036_vm7, %v3692_v32, 0 }
 0xee4   : > { %3706 = vmatpush.bf16.xpose.msrb.mxu1 %v3697_v47 }
 0xee5   : > { %v6098_v48 = vpop.eup %6097 }
 0xee6   : > { %v3345_v50 = vmul.f32 %v6098_v48, %v3343_v44  ;;  %vm3351_vm14 = vweird.f32 %v6098_v48 }
 0xee7   : > { %vm3352_vm0 = vmor %vm3350_vm15, %vm3351_vm14 }
 0xee8   : > { %v3346_v51 = vmul.f32 %v6098_v48, %v3345_v50 }
 0xeea   : > { %v3347_v52 = vmul.f32 0.5, %v3346_v51 }
 0xeec   : > { %v3348_v53 = vsub.f32 1.5, %v3347_v52 }
 0xeee   : > { %v3349_v54 = vmul.f32 %v6098_v48, %v3348_v53 }
 0xef0   : > { %v3353_v56 = vsel %vm3352_vm0, %v6098_v48, %v3349_v54 }
 0xef1   : > { %v3354_v58 = vmul.f32 %v3353_v56, %v3338_v36 }
 0xef3   : > { %v3358_v60 = vmul.f32 %v6038_v55, %v3354_v58 }
 0xef5   : > { %v3362_v61 = vadd.f32 %v6039_v59, %v3358_v60 }
 0xef7   : > { %v3363_v62 = vpack.c.bf16 %v3362_v61, %v3362_v61 }
 0xef9   : > { %3440 = vmatmul.bf16.vlgmr.msrb.gmra.mxu2 %v3363_v62 }
 0xf7c   : > { %v3441_v0 = vpop.f32.mrf.mxu2 }
 0xf7d   : > { %v3442_v1 = vadd.f32 %v6040_v63, %v3441_v0 }
 0xf7f   : > { %v3445_v2 = vpack.c.bf16 %v3442_v1, %v3442_v1 }
 0xf81   : > { %v3629_v46 = vunpack.c.l.b16 %v3445_v2  ;;  %5355 = vmatmul.msk.bf16.vlgmr.msra.gmra.mxu1 %vm2036_vm7, %v3445_v2 }
 0xf83   : > { %v3630_v3 = vpack.c.b16 %v3629_v46, %v3629_v46 }
 0xf84   : > { %v3443_v4 = vpop.f32.mrf.mxu2 }
 0xf85   : > { %3745 = vrot.lane.b32.xlu2 %v3630_v3, %s6744_s23  ;;  %3689 = vrot.lane.b32.xlu0 %v3630_v3, %s6743_s11 }
 0xf86   : > { %3631 = vrot.lane.b32.xlu1 %v3630_v3, %s6742_s15 }
 0xfdf   : > { %v3746_v49 = vpop.permute.xlu2 %3745 }
 0xff7   : > { %v3690_v5 = vpop.permute.xlu0 %3689 }
 0xff8   : > { %v3632_v6 = vpop.permute.xlu1 %3631  ;;  %5359 = vmatmul.msk.bf16.vlgmr.msrb.gmra.mxu1 %vm2036_vm7, %v3690_v5 }
 0xff9   : > { %5357 = vmatmul.msk.bf16.vlgmr.msra.gmra.mxu3 %vm2036_vm7, %v3632_v6 }
 0xffe   : > { %v3590_v7 = vpop.f32.mrf.mxu1 }
 0xfff   : > { %v3591_v8 = vadd.f32 %v3590_v7, %v7351_v29 }
0x1001   : > { %v3594_v42 = vsel %vm2056_vm9, %v3591_v8, -inf }
0x1002   : > { %3595 = vmax.xlane.f32.xlu1 %v3594_v42 }
0x1006   : > { %v3592_v57 = vpop.f32.mrf.mxu1 }
0x1009   : > { %5361 = vmatmul.msk.bf16.vlgmr.msrb.gmra.mxu3 %vm2036_vm7, %v3746_v49 }
0x1075   : > { %v3596_v10 = vpop.xlane.xlu1 %3595  ;;  %v3708_v25 = vpop.f32.mrf.mxu1 }
0x1076   : > { %v3597_v12 = vsub.f32 %v3591_v8, %v3596_v10  ;;  %v3709_v14 = vadd.f32 %v3708_v25, %v7351_v29  ;;  %v5720_v25 = vld [vmem:[#allocation17 + $0x38] sm:$0xff] }
0x1077   : > { %3881 = vmatpush.bf16.msra.mxu1 %v5720_v25 }
0x1078   : > { %v3598_v17 = vmul.f32 1.442695, %v3597_v12  ;;  %v3712_v18 = vsel %vm2056_vm9, %v3709_v14, -inf  ;;  %v5719_v12 = vld [vmem:[#allocation17 + $0x30] sm:$0xff] }
0x1079   : > { %3713 = vmax.xlane.f32.xlu2 %v3712_v18  ;;  %v5716_v18 = vld [vmem:[#allocation17 + $0x18] sm:$0xff] }
0x107a   : > { %6099 = vpow2.f32 %v3598_v17  ;;  %v5717_v17 = vld [vmem:[#allocation17 + $0x20] sm:$0xff] }
0x107b   : > { %3882 = vmatpush.bf16.msra.mxu1 %v5719_v12 }
0x107c   : > { %v3652_v19 = vpop.f32.mrf.mxu3 }
0x107d   : > { %v3653_v21 = vadd.f32 %v3652_v19, %v7351_v29  ;;  %v3710_v22 = vpop.f32.mrf.mxu1  ;;  %v5715_v19 = vld [vmem:[#allocation17 + $0x10] sm:$0xff] }
0x107e   : > { %v5713_v22 = vld [vmem:[#allocation17] sm:$0xff] }
0x107f   : > { %v3656_v23 = vsel %vm2056_vm9, %v3653_v21, -inf }
0x1080   : > { %v6100_v16 = vpop.eup %6099  ;;  %3657 = vmax.xlane.f32.xlu0 %v3656_v23 }
0x1081   : > { %v3600_v30 = vsel %vm2056_vm9, %v6100_v16, 0.0 }
0x1082   : > { %3601 = vadd.xlane.f32.xlu2 %v3600_v30 }
0x1084   : > { %v3654_v26 = vpop.f32.mrf.mxu3 }
0x108c   : > { %v3764_v27 = vpop.f32.mrf.mxu3 }
0x108d   : > { %v3765_v28 = vadd.f32 %v3764_v27, %v7351_v29 }
0x108f   : > { %v3768_v20 = vsel %vm2056_vm9, %v3765_v28, -inf }
0x1090   : > { %3769 = vmax.xlane.f32.xlu1 %v3768_v20 }
0x1094   : > { %v3766_v31 = vpop.f32.mrf.mxu3 }
0x1095   : > { %v6041_v31 = vld [vmem:[#allocation19] ss:$0 sm:$0xff] }
0x10a9   : > { %3668 = vrot.lane.b32.xlu1 %v7642_v13, %s6742_s15 }
0x10ec   : > { %v3714_v33 = vpop.xlane.xlu2 %3713 }
0x10ed   : > { %v3715_v24 = vsub.f32 %v3709_v14, %v3714_v33  ;;  %v5718_v14 = vld [vmem:[#allocation17 + $0x28] sm:$0xff] }
0x10ee   : > { %3883 = vmatpush.bf16.msra.mxu1 %v5718_v14 }
0x10ef   : > { %v3716_v34 = vmul.f32 1.442695, %v3715_v24 }
0x10f1   : > { %6101 = vpow2.f32 %v3716_v34 }
0x10f2   : > { %3884 = vmatpush.bf16.msra.mxu1 %v5717_v17 }
0x10f3   : > { %v3658_v35 = vpop.xlane.xlu0 %3657 }
0x10f4   : > { %v3659_v36 = vsub.f32 %v3653_v21, %v3658_v35  ;;  %v5714_v21 = vld [vmem:[#allocation17 + $0x8] sm:$0xff] }
0x10f5   : > { %v3602_v37 = vpop.xlane.xlu2 %3601 }
0x10f6   : > { %v3660_v38 = vmul.f32 1.442695, %v3659_v36  ;;  %6103 = vrcp.f32 %v3602_v37  ;;  %3885 = vmatpush.bf16.msra.mxu1 %v5716_v18 }
0x10f7   : > { %v6102_v39 = vpop.eup %6101 }
0x10f8   : > { %6105 = vpow2.f32 %v3660_v38  ;;  %v3718_v29 = vsel %vm2056_vm9, %v6102_v39, 0.0 }
0x10f9   : > { %3719 = vadd.xlane.f32.xlu2 %v3718_v29 }
0x10fa   : > { %3886 = vmatpush.bf16.msra.mxu1 %v5715_v19 }
0x10fc   : > { %v6104_v40 = vpop.eup %6103 }
0x10fd   : > { %v3604_v41 = vmul.f32 %v6104_v40, %v6100_v16 }
0x10fe   : > { %v6106_v43 = vpop.eup %6105  ;;  %3887 = vmatpush.bf16.msra.mxu1 %v5714_v21 }
0x10ff   : > { %v3605_v45 = vpack.c.bf16 %v3604_v41, %v3604_v41  ;;  %v3662_v44 = vsel %vm2056_vm9, %v6106_v43, 0.0 }
0x1100   : > { %3663 = vadd.xlane.f32.xlu0 %v3662_v44 }
0x1101   : > { %5356 = vmatmul.msk.bf16.vlgmr.msra.gmra.mxu2 %vm2056_vm9, %v3605_v45 }
0x1102   : > { %3888 = vmatpush.bf16.msra.mxu1 %v5713_v22 }
0x1103   : > { %v3770_v32 = vpop.xlane.xlu1 %3769 }
0x1104   : > { %v3771_v47 = vsub.f32 %v3765_v28, %v3770_v32 }
0x1106   : > { %v3772_v48 = vmul.f32 1.442695, %v3771_v47 }
0x1108   : > { %6107 = vpow2.f32 %v3772_v48 }
0x110e   : > { %v6108_v50 = vpop.eup %6107 }
0x110f   : > { %v3774_v51 = vsel %vm2056_vm9, %v6108_v50, 0.0 }
0x1110   : > { %3775 = vadd.xlane.f32.xlu0 %v3774_v51 }
0x1111   : > { %3724 = vrot.lane.b32.xlu2 %v7642_v13, %s6743_s11 }
0x111b   : > { %v3669_v52 = vpop.permute.xlu1 %3668 }
0x111c   : > { %v3674_v53 = vsel %vm2072_vm8, %v3669_v52, 0 }
0x111d   : > { %3683 = vmatpush.bf16.msrb.mxu0 %v3674_v53 }
0x1124   : > { %3780 = vrot.lane.b32.xlu0 %v7642_v13, %s6744_s23 }
0x116c   : > { %v3720_v54 = vpop.xlane.xlu2 %3719 }
0x116d   : > { %6109 = vrcp.f32 %v3720_v54 }
0x1173   : > { %v6110_v55 = vpop.eup %6109  ;;  %v3664_v56 = vpop.xlane.xlu0 %3663 }
0x1174   : > { %v3722_v58 = vmul.f32 %v6110_v55, %v6102_v39  ;;  %6111 = vrcp.f32 %v3664_v56  ;;  %v3725_v59 = vpop.permute.xlu2 %3724 }
0x1175   : > { %v3730_v60 = vsel %vm2072_vm8, %v3725_v59, 0 }
0x1176   : > { %v3723_v61 = vpack.c.bf16 %v3722_v58, %v3722_v58  ;;  %3739 = vmatpush.bf16.msrb.mxu2 %v3730_v60 }
0x1179   : > { %5360 = vmatmul.msk.bf16.vlgmr.msrb.gmra.mxu2 %vm2056_vm9, %v3723_v61 }
0x117a   : > { %v6112_v62 = vpop.eup %6111 }
0x117b   : > { %v3666_v63 = vmul.f32 %v6112_v62, %v6106_v43 }
0x117d   : > { %v3667_v0 = vpack.c.bf16 %v3666_v63, %v3666_v63 }
0x117f   : > { %5358 = vmatmul.msk.bf16.vlgmr.msrb.gmra.mxu0 %vm2056_vm9, %v3667_v0 }
0x1183   : > { %v3776_v13 = vpop.xlane.xlu0 %3775 }
0x1184   : > { %v3624_v1 = vpop.f32.mrf.mxu2  ;;  %6113 = vrcp.f32 %v3776_v13 }
0x118a   : > { %v6114_v46 = vpop.eup %6113 }
0x118b   : > { %v3778_v3 = vmul.f32 %v6114_v46, %v6108_v50 }
0x118c   : > { %v3626_v2 = vpop.f32.mrf.mxu2 }
0x118d   : > { %v3779_v6 = vpack.c.bf16 %v3778_v3, %v3778_v3 }
0x1196   : > { %v3781_v4 = vpop.permute.xlu0 %3780 }
0x1197   : > { %v3786_v5 = vsel %vm2072_vm8, %v3781_v4, 0 }
0x1198   : > { %3795 = vmatpush.bf16.msra.mxu0 %v3786_v5 }
0x119b   : > { %5362 = vmatmul.msk.bf16.vlgmr.msra.gmra.mxu0 %vm2056_vm9, %v3779_v6 }
0x11fc   : > { %v3685_v7 = vpop.f32.mrf.mxu0  ;;  %v3741_v8 = vpop.f32.mrf.mxu2 }
0x11fd   : > { %3802 = vrot.lane.b32.xlu1 %v3685_v7, %s6744_s23 }
0x1204   : > { %v3687_v42 = vpop.f32.mrf.mxu0  ;;  %v3743_v57 = vpop.f32.mrf.mxu2 }
0x1205   : > { %3806 = vrot.lane.b32.xlu1 %v3741_v8, %s6743_s11  ;;  %s7941_s11 = sld [smem:[#allocation68_spill]] }
0x120b   : > { %s7942_s23 = smov %s7941_s11  ;;  %v5453_v36 = vld [vmem:[%s7941_s11 + $0x70] sm:$0xf]  ;;  %s4858_s11 = sshll.u32 %s7264_s22, 3 }
0x120c   : > { %v5736_v37 = vld [vmem:[%s7942_s23 + $0x74] sm:$0xf0]  ;;  %v5735_v38 = vld [vmem:[%s7942_s23 + $0x74] sm:$0xf]  ;;  %v5455_v29 = vld [vmem:[%s7942_s23 + $0x78] sm:$0xf0] }
0x120d   : > { %v5454_v39 = vor.u32 %v5736_v37, %v5453_v36  ;;  %v5458_v40 = vor.u32 %v5735_v38, %v5455_v29  ;;  %v5445_v44 = vld [vmem:[%s7942_s23 + $0x60] sm:$0xf]  ;;  %v5734_v32 = vld [vmem:[%s7942_s23 + $0x64] sm:$0xf0]  ;;  %v5733_v47 = vld [vmem:[%s7942_s23 + $0x64] sm:$0xf] }
0x120e   : > { %v5446_v48 = vor.u32 %v5734_v32, %v5445_v44  ;;  %v5447_v50 = vld [vmem:[%s7942_s23 + $0x68] sm:$0xf0]  ;;  %v5437_v52 = vld [vmem:[%s7942_s23 + $0x50] sm:$0xf]  ;;  %v5732_v53 = vld [vmem:[%s7942_s23 + $0x54] sm:$0xf0] }
0x120f   : > { %4033 = vmatpush.bf16.msra.mxu2 %v5454_v39  ;;  %4046 = vmatpush.bf16.msra.mxu3 %v5458_v40  ;;  %v5450_v51 = vor.u32 %v5733_v47, %v5447_v50  ;;  %v5731_v54 = vld [vmem:[%s7942_s23 + $0x54] sm:$0xf]  ;;  %v5438_v55 = vor.u32 %v5732_v53, %v5437_v52  ;;  %v5439_v56 = vld [vmem:[%s7942_s23 + $0x58] sm:$0xf0]  ;;  %v5429_v59 = vld [vmem:[%s7942_s23 + $0x40] sm:$0xf] }
0x1210   : > { %v5442_v58 = vor.u32 %v5731_v54, %v5439_v56  ;;  %v5730_v60 = vld [vmem:[%s7942_s23 + $0x44] sm:$0xf0]  ;;  %v5729_v61 = vld [vmem:[%s7942_s23 + $0x44] sm:$0xf]  ;;  %v5431_v63 = vld [vmem:[%s7942_s23 + $0x48] sm:$0xf0] }
0x1211   : > { %v5430_v62 = vor.u32 %v5730_v60, %v5429_v59  ;;  %v5434_v0 = vor.u32 %v5729_v61, %v5431_v63  ;;  %v5728_v13 = vld [vmem:[%s7942_s23 + $0x34] sm:$0xf0]  ;;  %v5727_v2 = vld [vmem:[%s7942_s23 + $0x34] sm:$0xf]  ;;  %v5423_v3 = vld [vmem:[%s7942_s23 + $0x38] sm:$0xf0] }
0x1212   : > { %v5426_v4 = vor.u32 %v5727_v2, %v5423_v3  ;;  %v5413_v5 = vld [vmem:[%s7942_s23 + $0x20] sm:$0xf]  ;;  %v5726_v6 = vld [vmem:[%s7942_s23 + $0x24] sm:$0xf0]  ;;  %v5725_v7 = vld [vmem:[%s7942_s23 + $0x24] sm:$0xf] }
0x1213   : > { %4034 = vmatpush.bf16.msra.mxu2 %v5446_v48  ;;  %4047 = vmatpush.bf16.msra.mxu3 %v5450_v51  ;;  %v5414_v8 = vor.u32 %v5726_v6, %v5413_v5  ;;  %v5415_v42 = vld [vmem:[%s7942_s23 + $0x28] sm:$0xf0]  ;;  %v5723_v25 = vld [vmem:[%s7942_s23 + $0x14] sm:$0xf]  ;;  %v5407_v14 = vld [vmem:[%s7942_s23 + $0x18] sm:$0xf0] }
0x1214   : > { %v5418_v57 = vor.u32 %v5725_v7, %v5415_v42  ;;  %v5410_v17 = vor.u32 %v5723_v25, %v5407_v14  ;;  %v5397_v18 = vld [vmem:[%s7942_s23] sm:$0xf]  ;;  %v5722_v19 = vld [vmem:[%s7942_s23 + $0x4] sm:$0xf0]  ;;  %v5721_v21 = vld [vmem:[%s7942_s23 + $0x4] sm:$0xf] }
0x1215   : > { %v5398_v22 = vor.u32 %v5722_v19, %v5397_v18  ;;  %v6042_v38 = vld [vmem:[#allocation20] ss:$0 sm:$0xff]  ;;  %v6043_v40 = vld [vmem:[#allocation22] ss:$0 sm:$0xff]  ;;  %v3947_v60 = vld [vmem:[#allocation23] sm:$0x3] }
0x1216   : > { %v3949_v61 = vperm.slane %v3947_v60, 0 }
0x1217   : > { %4035 = vmatpush.bf16.msra.mxu2 %v5438_v55  ;;  %4048 = vmatpush.bf16.msra.mxu3 %v5442_v58 }
0x1218   : > { %v3797_v49 = vpop.f32.mrf.mxu0 }
0x1219   : > { %3810 = vrot.lane.b32.xlu0 %v3797_v49, %s6742_s15  ;;  %v5405_v49 = vld [vmem:[%s7942_s23 + $0x10] sm:$0xf]  ;;  %s7943_s15 = sld [smem:[#allocation70_spill]] }
0x121b   : > { %4036 = vmatpush.bf16.msra.mxu2 %v5430_v62  ;;  %4049 = vmatpush.bf16.msra.mxu3 %v5434_v0  ;;  %v3950_v62 = vperm.slane %v3947_v60, 1 }
0x121f   : > { %4050 = vmatpush.bf16.msra.mxu3 %v5426_v4  ;;  %s7944_s4 = smov %s7943_s15 }
0x1220   : > { %v3799_v10 = vpop.f32.mrf.mxu0  ;;  %v5743_v44 = vld [vmem:[%s7944_s4 + $0x30] sm:$0xff]  ;;  %v5742_v47 = vld [vmem:[%s7944_s4 + $0x28] sm:$0xff]  ;;  %v5749_v50 = vld [vmem:[%s7944_s4 + $0x60] sm:$0xff] }
0x1221   : > { %v5724_v10 = vld [vmem:[%s7942_s23 + $0x14] sm:$0xf0]  ;;  %v5751_v32 = vld [vmem:[%s7944_s4 + $0x70] sm:$0xff]  ;;  %v5750_v48 = vld [vmem:[%s7944_s4 + $0x68] sm:$0xff] }
0x1222   : > { %v5406_v12 = vor.u32 %v5724_v10, %v5405_v49  ;;  %v5740_v51 = vld [vmem:[%s7944_s4 + $0x18] sm:$0xff]  ;;  %v5739_v53 = vld [vmem:[%s7944_s4 + $0x10] sm:$0xff]  ;;  %v5738_v55 = vld [vmem:[%s7944_s4 + $0x8] sm:$0xff] }
0x1223   : > { %4051 = vmatpush.bf16.msra.mxu3 %v5418_v57  ;;  %v5748_v52 = vld [vmem:[%s7944_s4 + $0x58] sm:$0xff]  ;;  %v5747_v54 = vld [vmem:[%s7944_s4 + $0x50] sm:$0xff]  ;;  %v5746_v56 = vld [vmem:[%s7944_s4 + $0x48] sm:$0xff] }
0x1224   : > { %v5737_v58 = vld [vmem:[%s7944_s4] sm:$0xff] }
0x1225   : > { %v5745_v59 = vld [vmem:[%s7944_s4 + $0x40] sm:$0xff] }
0x1227   : > { %4052 = vmatpush.bf16.msra.mxu3 %v5410_v17 }
0x126f   : > { %v3803_v23 = vpop.permute.xlu1 %3802 }
0x1270   : > { %v3813_v30 = vsel %vm2036_vm7, %v3624_v1, %v3803_v23  ;;  %v5421_v1 = vld [vmem:[%s7942_s23 + $0x30] sm:$0xf]  ;;  %v5399_v23 = vld [vmem:[%s7942_s23 + $0x8] sm:$0xf0] }
0x1271   : > { %v5422_v46 = vor.u32 %v5728_v13, %v5421_v1 }
0x1273   : > { %4037 = vmatpush.bf16.msra.mxu2 %v5422_v46 }
0x1277   : > { %v3807_v16 = vpop.permute.xlu1 %3806  ;;  %4038 = vmatpush.bf16.msra.mxu2 %v5414_v8 }
0x1278   : > { %v3814_v26 = vsel %vm2275_vm10, %v3813_v30, %v3807_v16  ;;  %v5402_v16 = vor.u32 %v5721_v21, %v5399_v23  ;;  %v5744_v30 = vld [vmem:[%s7943_s15 + $0x38] sm:$0xff]  ;;  %s1733_s15 = scalar_lea.vmem %s7945_s7, %s4858_s11  ;;  %s7846_s7 = sand.u32 1, %s6665_s10  }
0x1279   : > { %4207 = vmatpush.bf16.msrb.mxu0 %v5744_v30  ;;  %s4855_s11 = sshll.u32 %s7846_s7, 4 }
0x127a   : > { %4053 = vmatpush.bf16.msra.mxu3 %v5402_v16 }
0x127b   : > { %4039 = vmatpush.bf16.msra.mxu2 %v5406_v12 }
0x127d   : > { %4208 = vmatpush.bf16.msrb.mxu0 %v5743_v44 }
0x127f   : > { %4040 = vmatpush.bf16.msra.mxu2 %v5398_v22 }
0x1281   : > { %4209 = vmatpush.bf16.msrb.mxu0 %v5742_v47  ;;  %v5764_v47 = vld [vmem:[%s6986_s29 + $0x58] sm:$0xff] }
0x128b   : > { %v3811_v27 = vpop.permute.xlu0 %3810 }
0x128c   : > { %v3815_v28 = vsel %vm2277_vm11, %v3814_v26, %v3811_v27  ;;  %v5752_v26 = vld [vmem:[%s7944_s4 + $0x78] sm:$0xff] }
0x128d   : > { %v3816_v20 = vpack.c.bf16 %v3815_v28, %v3815_v28  ;;  %4220 = vmatpush.bf16.msrb.mxu1 %v5752_v26 }
0x128f   : > { %3889 = vmatmul.bf16.vlgmr.msra.gmra.mxu1 %v3816_v20 }
0x1291   : > { %4221 = vmatpush.bf16.msrb.mxu1 %v5751_v32  ;;  %v5756_v32 = vld [vmem:[%s6986_s29 + $0x18] sm:$0xff] }
0x1295   : > { %4222 = vmatpush.bf16.msrb.mxu1 %v5750_v48  ;;  %v5755_v48 = vld [vmem:[%s6986_s29 + $0x10] sm:$0xff] }
0x1299   : > { %4223 = vmatpush.bf16.msrb.mxu1 %v5749_v50  ;;  %v5754_v50 = vld [vmem:[%s6986_s29 + $0x8] sm:$0xff] }
0x129d   : > { %4224 = vmatpush.bf16.msrb.mxu1 %v5748_v52  ;;  %v5753_v52 = vld [vmem:[%s6986_s29] sm:$0xff] }
0x12a1   : > { %4225 = vmatpush.bf16.msrb.mxu1 %v5747_v54  ;;  %v7773_v54 = vld [vmem:[%s1733_s15] sm:$0xff] }
0x12a2   : > { %vm4459_vm4 = vcmp.ne.s32.totalorder %v7773_v54, 4294967196 }
0x12a5   : > { %4226 = vmatpush.bf16.msrb.mxu1 %v5746_v56  ;;  %v6746_v56 = vmov 0  }
0x12a6   : > { %6022 = vset.pattern.permute.xlu0 %v6746_v56 }
0x12a9   : > { %4227 = vmatpush.bf16.msrb.mxu1 %v5745_v59 }
0x130c   : > { %v3890_v33 = vpop.f32.mrf.mxu1 }
0x130d   : > { %v3894_v24 = vadd.f32 %v3890_v33, %v7638_v9 }
0x130f   : > { %v7694_v34 = vadd.f32 %v6041_v31, %v3894_v24 }
0x1311   : > { %3902 = vadd.xlane.f32.xlu2 %v7694_v34 }
0x1314   : > { %v3892_v35 = vpop.f32.mrf.mxu1 }
0x1384   : > { %v3903_v9 = vpop.xlane.xlu2 %3902 }
0x1385   : > { %v3904_v41 = vmul.f32 %v3903_v9, %v7271_v11 }
0x1387   : > { %v7703_v43 = vsub.f32 %v7694_v34, %v3904_v41 }
0x1389   : > { %v3906_v45 = vmul.f32 %v7703_v43, %v7703_v43 }
0x138b   : > { %3907 = vadd.xlane.f32.xlu1 %v3906_v45 }
0x13fe   : > { %v3908_v27 = vpop.xlane.xlu1 %3907 }
0x13ff   : > { %v3909_v28 = vmul.f32 %v3908_v27, %v7271_v11 }
0x1401   : > { %v3910_v20 = vadd.f32 1e-05, %v3909_v28  ;;  %v6044_v28 = vld [vmem:[#allocation25] ss:$0 sm:$0xff] }
0x1403   : > { %6115 = vrsqrt.f32 %v3910_v20  ;;  %vm3917_vm8 = vweird.f32 %v3910_v20 }
0x1409   : > { %v6116_v31 = vpop.eup %6115 }
0x140a   : > { %v3912_v33 = vmul.f32 %v6116_v31, %v3910_v20  ;;  %vm3918_vm7 = vweird.f32 %v6116_v31 }
0x140b   : > { %vm3919_vm9 = vmor %vm3917_vm8, %vm3918_vm7 }
0x140c   : > { %v3913_v24 = vmul.f32 %v6116_v31, %v3912_v33 }
0x140e   : > { %v3914_v35 = vmul.f32 0.5, %v3913_v24 }
0x1410   : > { %v3915_v36 = vsub.f32 1.5, %v3914_v35  ;;  %v5760_v35 = vld [vmem:[%s6986_s29 + $0x38] sm:$0xff] }
0x1411   : > { %4404 = vmatpush.bf16.xpose.msrb.mxu2 %v5760_v35 }
0x1412   : > { %v3916_v37 = vmul.f32 %v6116_v31, %v3915_v36  ;;  %v5768_v36 = vld [vmem:[%s6986_s29 + $0x78] sm:$0xff] }
0x1413   : > { %4417 = vmatpush.bf16.xpose.msrb.mxu3 %v5768_v36 }
0x1414   : > { %v3920_v39 = vsel %vm3919_vm9, %v6116_v31, %v3916_v37  ;;  %v5759_v37 = vld [vmem:[%s6986_s29 + $0x30] sm:$0xff] }
0x1415   : > { %v3921_v29 = vmul.f32 %v3920_v39, %v7703_v43  ;;  %v5741_v43 = vld [vmem:[%s7944_s4 + $0x20] sm:$0xff]  ;;  %v5758_v39 = vld [vmem:[%s6986_s29 + $0x28] sm:$0xff] }
0x1416   : > { %4210 = vmatpush.bf16.msrb.mxu0 %v5741_v43  ;;  %v5763_v43 = vld [vmem:[%s6986_s29 + $0x50] sm:$0xff] }
0x1417   : > { %v3925_v9 = vmul.f32 %v6042_v38, %v3921_v29  ;;  %v5767_v38 = vld [vmem:[%s6986_s29 + $0x70] sm:$0xff]  ;;  %v5766_v29 = vld [vmem:[%s6986_s29 + $0x68] sm:$0xff] }
0x1419   : > { %v3929_v41 = vadd.f32 %v6043_v40, %v3925_v9  ;;  %4405 = vmatpush.bf16.xpose.msrb.mxu2 %v5759_v37  ;;  %v5765_v40 = vld [vmem:[%s6986_s29 + $0x60] sm:$0xff] }
0x141a   : > { %4211 = vmatpush.bf16.msrb.mxu0 %v5740_v51  ;;  %v5762_v51 = vld [vmem:[%s6986_s29 + $0x48] sm:$0xff] }
0x141b   : > { %v3930_v45 = vpack.c.bf16 %v3929_v41, %v3929_v41  ;;  %4418 = vmatpush.bf16.xpose.msrb.mxu3 %v5767_v38 }
0x141d   : > { %4041 = vmatmul.bf16.vlgmr.msra.gmra.mxu2 %v3930_v45  ;;  %4054 = vmatmul.bf16.vlgmr.msra.gmra.mxu3 %v3930_v45 }
0x141e   : > { %4212 = vmatpush.bf16.msrb.mxu0 %v5739_v53  ;;  %v5761_v53 = vld [vmem:[%s6986_s29 + $0x40] sm:$0xff] }
0x1421   : > { %4406 = vmatpush.bf16.xpose.msrb.mxu2 %v5758_v39 }
0x1422   : > { %4213 = vmatpush.bf16.msrb.mxu0 %v5738_v55 }
0x1423   : > { %4419 = vmatpush.bf16.xpose.msrb.mxu3 %v5766_v29 }
0x1426   : > { %4214 = vmatpush.bf16.msrb.mxu0 %v5737_v58 }
0x142b   : > { %4420 = vmatpush.bf16.xpose.msrb.mxu3 %v5765_v40 }
0x1433   : > { %4421 = vmatpush.bf16.xpose.msrb.mxu3 %v5764_v47 }
0x143b   : > { %4422 = vmatpush.bf16.xpose.msrb.mxu3 %v5763_v43 }
0x1443   : > { %4423 = vmatpush.bf16.xpose.msrb.mxu3 %v5762_v51 }
0x144b   : > { %4424 = vmatpush.bf16.xpose.msrb.mxu3 %v5761_v53 }
0x14a0   : > { %v4042_v63 = vpop.f32.mrf.mxu2  ;;  %v4055_v0 = vpop.f32.mrf.mxu3 }
0x14a1   : > { %v4043_v1 = vadd.f32 %v4042_v63, %v3949_v61  ;;  %v4056_v13 = vadd.f32 %v4055_v0, %v3950_v62 }
0x14a3   : > { %v4059_v2 = vmul.f32 %v4043_v1, %v4043_v1  ;;  %v4060_v46 = vmul.f32 %v4056_v13, %v4056_v13 }
0x14a5   : > { %v4061_v3 = vmul.f32 %v4059_v2, %v4043_v1  ;;  %v4062_v4 = vmul.f32 %v4060_v46, %v4056_v13  ;;  %v6046_v46 = vld [vmem:[%s7947_s2] ss:$0 sm:$0xff]  ;;  %s7784_s2 = scalar_lea.vmem [#allocation26], %s4855_s11  ;;  %s5769_s11 = sshll.u32 %s7024_s0, 4 }
0x14a6   : > { %s4510_s3 = sshll.u32 %s7784_s2, 4  ;;  %s4511_s3 = int_to_ptr.vmem [resolvable:$true] %s4510_s3 }
0x14a7   : > { %v4063_v5 = vmul.f32 0.044715, %v4061_v3  ;;  %v4064_v6 = vmul.f32 0.044715, %v4062_v4 }
0x14a8   : > { %v4044_v7 = vpop.f32.mrf.mxu2  ;;  %v4057_v8 = vpop.f32.mrf.mxu3 }
0x14a9   : > { %v4065_v42 = vadd.f32 %v4063_v5, %v4043_v1  ;;  %v4066_v57 = vadd.f32 %v4064_v6, %v4056_v13  ;;  %v4302_v6 = vld [vmem:[%s6991_s21] sm:$0x3] }
0x14aa   : > { %v4304_v7 = vperm.slane %v4302_v6, 0  ;;  %v4305_v8 = vperm.slane %v4302_v6, 1 }
0x14ab   : > { %v4067_v49 = vmul.f32 0.7978846, %v4065_v42  ;;  %v4068_v10 = vmul.f32 0.7978846, %v4066_v57 }
0x14ad   : > { %6117 = vtanh.f32 %v4067_v49 }
0x14ae   : > { %6119 = vtanh.f32 %v4068_v10 }
0x14b3   : > { %v6118_v25 = vpop.eup %6117 }
0x14b4   : > { %v6120_v12 = vpop.eup %6119  ;;  %v4071_v14 = vadd.f32 1.0, %v6118_v25  ;;  %v4448_v25 = vadd.s32 128, %v7555_v15 }
0x14b5   : > { %v4072_v17 = vadd.f32 1.0, %v6120_v12 }
0x14b6   : > { %v4073_v18 = vmul.f32 0.5, %v4071_v14 }
0x14b7   : > { %v4074_v19 = vmul.f32 0.5, %v4072_v17 }
0x14b8   : > { %v4075_v21 = vmul.f32 %v4073_v18, %v4043_v1 }
0x14b9   : > { %v4076_v22 = vmul.f32 %v4074_v19, %v4056_v13  ;;  %v6045_v13 = vld [vmem:[%s7946_s1] ss:$0 sm:$0xff]  ;;  %s7948_s1 = sld [smem:[#allocation74_spill]] }
0x14ba   : > { %v4077_v23 = vpack.c.bf16 %v4075_v21, %v4075_v21 }
0x14bb   : > { %v4078_v16 = vpack.c.bf16 %v4076_v22, %v4076_v22 }
0x14bc   : > { %4215 = vmatmul.bf16.vlgmr.msrb.gmra.mxu0 %v4077_v23 }
0x14bd   : > { %4228 = vmatmul.bf16.vlgmr.msrb.gmra.mxu1 %v4078_v16 }
0x14bf   : > { %s4508_s7 = scalar_lea.hbm %s7948_s1, %s5769_s11  ;;  %s6599_s12 = scalar_lea.hbm %s7948_s1, 32 }
0x14c0   : > { %s4512_s4 = sshll.u32 %s4508_s7, 4  ;;  %s4513_s4 = int_to_ptr.hbm [resolvable:$true] %s4512_s4 }
0x14c1   : > { %s6593_s8 = sshra.s32 %s4513_s4, 4  ;;  %s6594_s8 = int_to_ptr.hbm [resolvable:$true] %s6593_s8 }
0x14c2   : > { %s6595_s9 = scalar_lea.hbm %s6594_s8, 16  ;;  %p6600_p1 = scmp.lt.s32.totalorder %s6594_s8, %s7948_s1 }
0x14c3   : > { %p6596_p9 = scmp.ne.s32.totalorder %s6594_s8, %s6595_s9  ;;  %p6601_p2 = scmp.lt.s32.totalorder %s6599_s12, %s6595_s9 }
0x14c5   : > { %p6597_p12 = pnand %p6596_p9, %p7041_p5  ;;  %p6602_p3 = por %p6601_p2, %p6600_p1 }
0x14c7   : > { %p6598_p0 = pneg %p6597_p12 }
0x14c9   : > { %p6603_p4 = pnand %p6602_p3, %p6598_p0 }
0x1539   : > { %v4216_v30 = vpop.f32.mrf.mxu0 }
0x153a   : > { %v4229_v26 = vpop.f32.mrf.mxu1 }
0x153b   : > { %v4230_v27 = vadd.f32 %v4229_v26, %v4216_v30 }
0x153d   : > { %v4233_v20 = vadd.f32 %v4230_v27, %v7694_v34  ;;  %v5757_v34 = vld [vmem:[%s6986_s29 + $0x20] sm:$0xff] }
0x153e   : > { %4407 = vmatpush.bf16.xpose.msrb.mxu2 %v5757_v34 }
0x153f   : > { %v4238_v31 = vadd.f32 %v6044_v28, %v4233_v20 }
0x1541   : > { %4241 = vadd.xlane.f32.xlu0 %v4238_v31  ;;  %v4218_v33 = vpop.f32.mrf.mxu0 }
0x1542   : > { %v4231_v24 = vpop.f32.mrf.mxu1  ;;  %v6747_v33 = vmov 0.0  }
0x1543   : > { %v5587_v24 = vsel %vm4459_vm4, 1.0, %v6747_v33 }
0x1544   : > { %v4475_v35 = vsel %vm4464_vm5, %v5587_v24, 0.0 }
0x1546   : > { %4408 = vmatpush.bf16.xpose.msrb.mxu2 %v5756_v32 }
0x154e   : > { %4409 = vmatpush.bf16.xpose.msrb.mxu2 %v5755_v48 }
0x1555   : > { %4450 = vperm.xlu0 %6022, %v7773_v54  }
0x1556   : > { %4410 = vmatpush.bf16.xpose.msrb.mxu2 %v5754_v50 }
0x155e   : > { %4411 = vmatpush.bf16.xpose.msrb.mxu2 %v5753_v52 }
0x15b4   : > { %v4242_v9 = vpop.xlane.xlu0 %4241 }
0x15b5   : > { %v4243_v41 = vmul.f32 %v4242_v9, %v7271_v11 }
0x15b7   : > { %v4244_v45 = vsub.f32 %v4238_v31, %v4243_v41 }
0x15b9   : > { %v4245_v44 = vmul.f32 %v4244_v45, %v4244_v45 }
0x15bb   : > { %4246 = vadd.xlane.f32.xlu2 %v4245_v44 }
0x15c7   : > { %v4451_v12 = vpop.permute.xlu0 %4450 }
0x15c8   : > { %vm4452_vm2 = vcmp.eq.s32.totalorder %v7555_v15, %v4451_v12  ;;  %vm4453_vm3 = vcmp.eq.s32.totalorder %v4448_v25, %v4451_v12 }
0x162e   : > { %v4247_v55 = vpop.xlane.xlu2 %4246 }
0x162f   : > { %v4248_v58 = vmul.f32 %v4247_v55, %v7271_v11 }
0x1631   : > { %v4249_v59 = vadd.f32 1e-05, %v4248_v58 }
0x1633   : > { %6121 = vrsqrt.f32 %v4249_v59  ;;  %vm4256_vm11 = vweird.f32 %v4249_v59 }
0x1639   : > { %v6122_v60 = vpop.eup %6121 }
0x163a   : > { %v4251_v61 = vmul.f32 %v6122_v60, %v4249_v59  ;;  %vm4257_vm10 = vweird.f32 %v6122_v60 }
0x163b   : > { %vm4258_vm1 = vmor %vm4256_vm11, %vm4257_vm10 }
0x163c   : > { %v4252_v62 = vmul.f32 %v6122_v60, %v4251_v61 }
0x163e   : > { %v4253_v63 = vmul.f32 0.5, %v4252_v62 }
0x1640   : > { %v4254_v0 = vsub.f32 1.5, %v4253_v63 }
0x1642   : > { %v4255_v1 = vmul.f32 %v6122_v60, %v4254_v0 }
0x1644   : > { %v4259_v2 = vsel %vm4258_vm1, %v6122_v60, %v4255_v1 }
0x1645   : > { %v4260_v11 = vmul.f32 %v4259_v2, %v4244_v45 }
0x1647   : > { %v4264_v3 = vmul.f32 %v6045_v13, %v4260_v11 }
0x1649   : > { %v4268_v4 = vadd.f32 %v6046_v46, %v4264_v3 }
0x164b   : > { %v4269_v5 = vpack.c.bf16 %v4268_v4, %v4268_v4 }
0x164d   : > { %4412 = vmatmul.bf16.vlgmr.msrb.gmra.mxu2 %v4269_v5  ;;  %4425 = vmatmul.bf16.vlgmr.msrb.gmra.mxu3 %v4269_v5 }
0x16d0   : > { %v4413_v42 = vpop.f32.mrf.mxu2  ;;  %v4426_v57 = vpop.f32.mrf.mxu3 }
0x16d1   : > { %v4414_v49 = vadd.f32 %v4413_v42, %v4304_v7  ;;  %v4427_v10 = vadd.f32 %v4426_v57, %v4305_v8 }
0x16d3   : > { %v4432_v14 = vmax.f32 %v4414_v49, %v4427_v10  ;;  %4430 = vst [vmem:[%s7784_s2] sm:$0xff] %v4414_v49  ;;  %v4454_v17 = vsel %vm4452_vm2, %v4414_v49, 0.0  ;;  %v4455_v18 = vsel %vm4453_vm3, %v4427_v10, 0.0 }
0x16d4   : > { %4431 = vst [vmem:[%s7784_s2 + $0x8] sm:$0xff] %v4427_v10  ;;  %v4456_v22 = vadd.f32 %v4455_v18, %v4454_v17 }
0x16d5   : > { %4433 = vmax.xlane.f32.xlu1 %v4432_v14 }
0x16d8   : > { %v4415_v19 = vpop.f32.mrf.mxu2  ;;  %v4428_v21 = vpop.f32.mrf.mxu3 }
0x16dd   : > { %4457 = vadd.xlane.f32.xlu1 %v4456_v22 }
0x16e5   : > { %4476 = vadd.xlane.f32.xlu1 %v4475_v35 }
0x1748   : > { %v4434_v23 = vpop.xlane.xlu1 %4433 }
0x1749   : > { %v4435_v16 = vsub.f32 %v4414_v49, %v4434_v23  ;;  %v4436_v30 = vsub.f32 %v4427_v10, %v4434_v23 }
0x174b   : > { %v4437_v26 = vmul.f32 1.442695, %v4435_v16  ;;  %v4439_v27 = vmul.f32 1.442695, %v4436_v30 }
0x174d   : > { %6123 = vpow2.f32 %v4437_v26 }
0x174e   : > { %6125 = vpow2.f32 %v4439_v27 }
0x1750   : > { %v4458_v29 = vpop.xlane.xlu1 %4457 }
0x1753   : > { %v6124_v28 = vpop.eup %6123 }
0x1754   : > { %v6126_v20 = vpop.eup %6125 }
0x1755   : > { %v4441_v31 = vadd.f32 %v6126_v20, %v6124_v28 }
0x1757   : > { %4442 = vadd.xlane.f32.xlu2 %v4441_v31 }
0x17ca   : > { %v4443_v36 = vpop.xlane.xlu2 %4442 }
0x17cb   : > { %6127 = vlog2.f32 %v4443_v36 }
0x17d1   : > { %v6128_v37 = vpop.eup %6127 }
0x17d2   : > { %v4445_v38 = vmul.f32 0.6931472, %v6128_v37 }
0x17d4   : > { %v4446_v39 = vadd.f32 %v4445_v38, %v4434_v23 }
0x17d6   : > { %v4462_v34 = vsub.f32 %v4446_v39, %v4458_v29 }
0x17d8   : > { %v4463_v40 = vmul.f32 %v5587_v24, %v4462_v34 }
0x17da   : > { %v4465_v9 = vsel %vm4464_vm5, %v4463_v40, 0.0 }
0x17db   : > { %4466 = vadd.xlane.f32.xlu2 %v4465_v9 }
0x17dc   : > { %6606 = shalt.err (!%p6603_p4)
}
0x17dd   : > { %5834 = dma.vmem_to_hbm [thread:$0]  (%p7041_p5), %s4511_s3, 256, %s4513_s4, %s4494_s6   ;;  %v4477_v41 = vpop.xlane.xlu1 %4476  ;;  %vm4485_vm6 = vcmp.eq.s32.totalorder %v7555_v15, 0  ;;  %vm4488_vm12 = vcmp.eq.s32.totalorder %v7555_v15, 1 }
0x17de   : > { %v4478_v45 = vrot.slane %v4477_v41, 4  ;;  %s7951_s0 = sld [smem:[#allocation75_spill]] }
0x17e0   : > { %v4479_v44 = vadd.f32 %v4478_v45, %v4477_v41 }
0x17e2   : > { %v4480_v47 = vrot.slane %v4479_v44, 2 }
0x17e4   : > { %v4481_v50 = vadd.f32 %v4480_v47, %v4479_v44  ;;  %s1736_s8 = scalar_lea.vmem %s7951_s0, %s7264_s22 }
0x17e6   : > { %v4482_v53 = vrot.slane %v4481_v50, 1 }
0x17e8   : > { %v4483_v56 = vadd.f32 %v4482_v53, %v4481_v50 }
0x184e   : > { %v4467_v32 = vpop.xlane.xlu2 %4466 }
0x184f   : > { %v4468_v48 = vrot.slane %v4467_v32, 4 }
0x1851   : > { %v4469_v43 = vadd.f32 %v4468_v48, %v4467_v32 }
0x1853   : > { %v4470_v51 = vrot.slane %v4469_v43, 2 }
0x1855   : > { %v4471_v52 = vadd.f32 %v4470_v51, %v4469_v43 }
0x1857   : > { %v4472_v54 = vrot.slane %v4471_v52, 1 }
0x1859   : > { %v4473_v55 = vadd.f32 %v4472_v54, %v4471_v52 }
0x185b   : > { %5770 = vpush %v4473_v55 }
0x185c   : > { %5772 = vpush %v4483_v56 }
0x188c   : > { %s5771_s9 = spop %5770 }
0x188d   : > { %v4486_v58 = vstv %s5771_s9  ;;  %s5773_s3 = spop %5772 }
0x188e   : > { %v4487_v59 = vsel %vm4485_vm6, %v4486_v58, 0.0  ;;  %v4489_v60 = vstv %s5773_s3 }
0x188f   : > { %v4490_v61 = vsel %vm4488_vm12, %v4489_v60, 0.0 }
0x1890   : > { %v4491_v62 = vadd.f32 %v4490_v61, %v4487_v59 }
0x1892   : > { %4492 = vst [vmem:[%s1736_s8] sm:$0x1] %v4491_v62 }
0x1893 PF: > { %s7952_s6 = sld [smem:[#allocation78_spill]] }
0x1894   : > { %s7953_s12 = sld [smem:[#allocation76_spill]] }
0x1899   : > { %p5916_p5 = scmp.ge.s32.totalorder %s7952_s6, 2 }
0x189a   : > { %s4527_s4 = sand.u32 1, %s7953_s12  }
0x189b   : > { %p5883_p7 = pnand %p5916_p5, %p7045_p6  ;;  %s4528_s7 = scalar_lea.sflag [#allocation4], %s4527_s4 }
0x189d   : > { %p5884_p8 = pneg %p5883_p7 }
0x189f   : > { %6656 = dma.done.wait (%p5884_p8), %s4528_s7, 256  }
0x18a0   : > { %6658 = vsyncadd (%p5884_p8), %s4528_s7, 4294967040  ;;  %s7955_s15 = sld [smem:[#allocation79_spill]]  ;;  %s7958_s7 = smov %s6665_s10 }
0x18a1   : > { %s7956_s2 = sld [smem:[#allocation77_spill]] }
0x18a2   : > { %s7957_s11 = sld [smem:[#allocation80_spill]] }
0x18a6   : > { %p118_p11 = scmp.ge.s32.totalorder %s7955_s15, 4  }
0x18a7   : > { %s7959_s10 = smov %s7956_s2 }
0x18a8   :  { %120 = sbr.rel (!%p118_p11) target bundleno = 110 (0x6e), region = 378 }
0x18ad   :  { %4540 = vsyncpa [#allocation3], 1 }
0x18ae   :  { %4542 = vsyncpa [#allocation3 + $0x1], 1 }
0x18af   :  { %4543 = vsyncpa [#allocation6], 1 }
0x18b0   :  { %4544 = vsyncpa [#allocation9], 1 }
0x18b1   :  { %4545 = vsyncpa [#allocation12], 1 }
0x18b2   :  { %4546 = vsyncpa [#allocation15], 1 }
0x18b3   :  { %4547 = vsyncpa [#allocation18], 1 }
0x18b4   :  { %4548 = vsyncpa [#allocation21], 1 }
0x18b5   :  { %4549 = vsyncpa [#allocation24], 1 }
0x18b6   :  { %4550 = vsyncpa [#allocation4], 1 }
0x18b7   :  { %4552 = vsyncpa [#allocation4 + $0x1], 1 }

</bundles_post_ra>
